<compile_context>
chip_gen: v5e
topology: v5e:2x2
jax: 0.10.0
libtpu: 0.0.40
codegen_flags: <defaults>
</compile_context>

<pallas_src>
import functools

import jax
import jax.numpy as jnp
import numpy as np
from jax.experimental import pallas as pl
from jax.experimental.pallas import tpu as pltpu


def transa_kernel(x_ref, e_ref, wr_ref, part_ref, *, margin):
    # x_ref block: (2, bt, H) = [pe; ne] (pre-computed |h+r-t| errors).
    pe = x_ref[0]                      # (bt, H) positive-triple error
    ne = x_ref[1]                      # (bt, H) negative-triple error

    # e_ref block: (2, H, H*H) constant 0/1 expansion matrices,
    #   rep_mat[k, i*H+j] = (i == k)   -> (x @ rep_mat)[b, i*H+j] = x[b, i]
    #   til_mat[k, i*H+j] = (j == k)   -> (x @ til_mat)[b, i*H+j] = x[b, j]
    rep_mat = e_ref[0]
    til_mat = e_ref[1]

    dot = functools.partial(jnp.dot, preferred_element_type=jnp.float32,
                            precision=jax.lax.Precision.HIGHEST)
    ne_rep = dot(ne, rep_mat)          # (bt, H*H)
    ne_til = dot(ne, til_mat)
    pe_rep = dot(pe, rep_mat)
    pe_til = dot(pe, til_mat)

    # relWr[b, i*H+j] = ne[b,i]*ne[b,j] - pe[b,i]*pe[b,j]
    # Single lane-dense, unmasked store of the whole (bt, H*H) tile.
    wr_ref[...] = ne_rep * ne_til - pe_rep * pe_til

    # Scores and Frobenius norm computed algebraically (no Wr re-read):
    #   p - n            = 2*(pe.ne)^2 - (pe.pe)^2 - (ne.ne)^2
    #   ||Wr_b||_F^2     = (ne.ne)^2 - 2*(pe.ne)^2 + (pe.pe)^2
    pn = jnp.sum(pe * ne, axis=1, keepdims=True)     # (bt, 1)
    pp = jnp.sum(pe * pe, axis=1, keepdims=True)
    nn = jnp.sum(ne * ne, axis=1, keepdims=True)
    diff = 2.0 * pn * pn - pp * pp - nn * nn
    hinge = jnp.maximum(diff + margin, 0.0)

    margin_sum = jnp.sum(hinge, axis=(0, 1), keepdims=True)                 # (1,1)
    wrsq_sum = jnp.sum(nn * nn - 2.0 * pn * pn + pp * pp,
                       axis=(0, 1), keepdims=True)                          # (1,1)

    # Pack the two partial sums into row 0 of one lane-dense (8, 128) tile.
    row = jax.lax.broadcasted_iota(jnp.int32, (8, 128), 0)
    col = jax.lax.broadcasted_iota(jnp.int32, (8, 128), 1)
    r0 = row == 0
    vals = jnp.where(r0 & (col == 0), margin_sum, 0.0)
    vals = vals + jnp.where(r0 & (col == 1), wrsq_sum, 0.0)
    part_ref[0] = vals


def _pick_bt(batch_size, hidden):
    """Batch-tile size.

    * bt must be a multiple of 8 or equal the full batch (the (8,128) rule
      on the block's second-minor dim) and must divide B exactly.
    * Target a multi-MiB-class double-buffered Wr block (amortize the
      ~0.35us/grid-step overhead) but keep it modest for v7x's 64 MiB VMEM.
    * For B >= 16, cap bt <= B//2 so the 'parallel' grid axis has >= 2
      blocks and both v7x TensorCores get work.
    """
    if batch_size < 16:
        return batch_size
    row_bytes = (hidden * hidden + 2 * hidden) * 4
    cap = max(8, (2 * 1024 * 1024) // (2 * row_bytes))   # ~2 MiB double-buffered
    cap = min(cap, batch_size // 2, 512)
    cap = (cap // 8) * 8
    bt = cap
    while bt >= 8:
        if batch_size % bt == 0:
            return bt
        bt -= 8
    return batch_size   # fallback: single block (B has no suitable divisor)


def transa_forward(inp, ent_emb, rel_emb, *, batch_size, margin, lamb, reg):
    B = batch_size
    H = ent_emb.shape[1]
    if H > 64:
        # TODO(synk): for H > 64 the (H, H*H) expansion constants get large;
        # switch to a per-row-slab emission path (rows are already lane-dense
        # at H >= 128).
        raise NotImplementedError("transa_forward kernel tuned for H <= 64")

    # Embedding gather + error computation in plain JAX (fuses with gather).
    h = ent_emb[inp[:, 0]].astype(jnp.float32)    # (2B, H)
    r = rel_emb[inp[:, 1]].astype(jnp.float32)
    t = ent_emb[inp[:, 2]].astype(jnp.float32)
    err = jnp.abs(h + r - t)                      # (2B, H): pos rows then neg rows
    x = err.reshape(2, B, H)                      # free reshape -> [pe; ne]

    # Constant 0/1 expansion matrices (one DMA total: constant index_map).
    cols = np.arange(H * H)
    rows = np.arange(H)[:, None]
    rep_mat = (cols // H == rows).astype(np.float32)   # (H, H*H)
    til_mat = (cols % H == rows).astype(np.float32)    # (H, H*H)
    e_const = jnp.asarray(np.stack([rep_mat, til_mat], axis=0))   # (2, H, H*H)

    bt = _pick_bt(B, H)
    assert B % bt == 0, "batch tile must divide the batch size"
    nblk = B // bt

    kernel = functools.partial(transa_kernel, margin=float(margin))

    # VMEM accounting: double-buffered blocks + matmul intermediates, with
    # headroom under v7x's 64 MiB (generous on v5e/v6e's 128 MiB).
    blk_x = 2 * bt * H * 4
    blk_e = 2 * H * (H * H) * 4
    blk_wr = bt * H * H * 4
    blk_part = 8 * 128 * 4
    dbuf = 2 * (blk_x + blk_e + blk_wr + blk_part)
    scratch = 6 * bt * H * H * 4
    vmem_limit = int(min(48 * 1024 * 1024,
                         max(16 * 1024 * 1024, 2 * (dbuf + scratch))))

    wr_flat, parts = pl.pallas_call(
        kernel,
        out_shape=(jax.ShapeDtypeStruct((B, H * H), jnp.float32),
                   jax.ShapeDtypeStruct((nblk, 8, 128), jnp.float32)),
        grid_spec=pltpu.PrefetchScalarGridSpec(
            num_scalar_prefetch=0,
            grid=(nblk,),
            in_specs=[pl.BlockSpec((2, bt, H), lambda i: (0, i, 0)),
                      pl.BlockSpec((2, H, H * H), lambda i: (0, 0, 0))],
            out_specs=[pl.BlockSpec((bt, H * H), lambda i: (i, 0)),
                       pl.BlockSpec((1, 8, 128), lambda i: (i, 0, 0))],
        ),
        compiler_params=pltpu.CompilerParams(
            dimension_semantics=("parallel",),
            vmem_limit_bytes=vmem_limit),
    )(x, e_const)

    # Finalize the loss from the per-block partial sums in plain JAX.
    sums = jnp.sum(parts, axis=(0, 1))                  # (128,)
    margin_loss = sums[0] / B
    wr_loss = jnp.sqrt(jnp.maximum(sums[1], 0.0)) * lamb        # ||relWr||_F * lamb
    norm_loss = (jnp.sqrt(jnp.sum(h * h)) + jnp.sqrt(jnp.sum(r * r))
                 + jnp.sqrt(jnp.sum(t * t))) * reg
    loss = margin_loss + wr_loss + norm_loss

    rel_wr = wr_flat.reshape(B, H, H)                   # free reshape, no transpose
    return loss, rel_wr


def reference_loss(inp, ent_emb, rel_emb, *, batch_size, margin, lamb, reg):
    h = ent_emb[inp[:, 0]][:, None, :]
    r = rel_emb[inp[:, 1]][:, None, :]
    t = ent_emb[inp[:, 2]][:, None, :]
    err = jnp.abs(h + r - t)[:, 0, :]
    pos, neg = err[:batch_size], err[batch_size:]
    wr = (jnp.einsum('bi,bj->bij', neg, neg)
          - jnp.einsum('bi,bj->bij', pos, pos))
    p = jnp.einsum('bi,bij,bj->b', pos, wr, pos)
    n = jnp.einsum('bi,bij,bj->b', neg, wr, neg)
    margin_loss = jnp.sum(jnp.maximum(p - n + margin, 0.0)) / batch_size
    wr_loss = jnp.sqrt(jnp.sum(wr * wr)) * lamb
    norm_loss = (jnp.linalg.norm(h) + jnp.linalg.norm(r)
                 + jnp.linalg.norm(t)) * reg
    return margin_loss + wr_loss + norm_loss, wr


if __name__ == "__main__":
    # small config consistent with the module: L=2, usegpu irrelevant here
    batch_size = 4
    hidden = 32
    ent_total = 16
    rel_total = 8
    margin, lamb, reg = 1.0, 0.01, 0.001
    B2 = 2 * batch_size   # batch_seq_size = pos + neg

    key = jax.random.PRNGKey(0)
    k_ent, k_rel, k_h, k_r, k_t = jax.random.split(key, 5)

    # deterministic xavier_uniform init for the two embedding tables
    b_ent = float(np.sqrt(6.0 / (ent_total + hidden)))
    b_rel = float(np.sqrt(6.0 / (rel_total + hidden)))
    ent_emb = jax.random.uniform(k_ent, (ent_total, hidden), jnp.float32, -b_ent, b_ent)
    rel_emb = jax.random.uniform(k_rel, (rel_total, hidden), jnp.float32, -b_rel, b_rel)

    # input: (batch_seq_size, 3) int ids, columns = [h, r, t]; negatives share r
    h_ids = jax.random.randint(k_h, (B2,), 0, ent_total, dtype=jnp.int32)
    t_ids = jax.random.randint(k_t, (B2,), 0, ent_total, dtype=jnp.int32)
    r_pos = jax.random.randint(k_r, (batch_size,), 0, rel_total, dtype=jnp.int32)
    r_ids = jnp.concatenate([r_pos, r_pos])
    inp = jnp.stack([h_ids, r_ids, t_ids], axis=1)

    loss, rel_wr = transa_forward(inp, ent_emb, rel_emb, batch_size=batch_size,
                                  margin=margin, lamb=lamb, reg=reg)
    loss = jax.block_until_ready(loss)
    rel_wr = jax.block_until_ready(rel_wr)

    # self.Wr.scatter_(0, pos_batch_r, relWr): stateful buffer update in PyTorch;
    # done functionally here as glue (does not affect the returned loss).
    wr_buffer = jnp.zeros((rel_total, hidden, hidden), jnp.float32).at[r_pos].set(rel_wr)
    jax.block_until_ready(wr_buffer)

    ref, ref_wr = reference_loss(inp, ent_emb, rel_emb, batch_size=batch_size,
                                 margin=margin, lamb=lamb, reg=reg)
    np.testing.assert_allclose(np.array(rel_wr), np.array(ref_wr), rtol=1e-4, atol=1e-4)
    np.testing.assert_allclose(np.array(loss), np.array(ref), rtol=1e-4, atol=1e-4)

    print("KERNEL_OK")
</pallas_src>

<mosaic_0001>
module attributes {stable_mosaic.version = 11 : i64} {
  func.func @transa_kernel(%arg0: i32, %arg1: memref<2x4x32xf32, #tpu.memory_space<vmem>>, %arg2: memref<2x32x1024xf32, #tpu.memory_space<vmem>>, %arg3: memref<4x1024xf32, #tpu.memory_space<vmem>>, %arg4: memref<1x8x128xf32, #tpu.memory_space<vmem>>) attributes {dimension_semantics = [#tpu.dimension_semantics<parallel>], iteration_bounds = array<i64: 1>, scalar_prefetch = 0 : i64, scratch_operands = 0 : i64, tpu.core_type = #tpu.core_type<tc>, window_params = [{transform_indices = @transform_0, window_bounds = array<i64: 2, 4, 32>}, {pipeline_mode = #tpu.pipeline_mode<synchronous>, transform_indices = @transform_1, window_bounds = array<i64: 2, 32, 1024>}, {transform_indices = @transform_2, window_bounds = array<i64: 4, 1024>}, {transform_indices = @transform_3, window_bounds = array<i64: 1, 8, 128>}]} {
    %c0 = arith.constant 0 : index
    %c0_0 = arith.constant 0 : index
    %c0_1 = arith.constant 0 : index
    %0 = vector.load %arg1[%c0, %c0_0, %c0_1] : memref<2x4x32xf32, #tpu.memory_space<vmem>>, vector<1x4x32xf32>
    %1 = vector.shape_cast %0 : vector<1x4x32xf32> to vector<4x32xf32>
    %c1 = arith.constant 1 : index
    %c0_2 = arith.constant 0 : index
    %c0_3 = arith.constant 0 : index
    %2 = vector.load %arg1[%c1, %c0_2, %c0_3] : memref<2x4x32xf32, #tpu.memory_space<vmem>>, vector<1x4x32xf32>
    %3 = vector.shape_cast %2 : vector<1x4x32xf32> to vector<4x32xf32>
    %c0_4 = arith.constant 0 : index
    %c0_5 = arith.constant 0 : index
    %c0_6 = arith.constant 0 : index
    %4 = vector.load %arg2[%c0_4, %c0_5, %c0_6] : memref<2x32x1024xf32, #tpu.memory_space<vmem>>, vector<1x32x1024xf32>
    %5 = vector.shape_cast %4 : vector<1x32x1024xf32> to vector<32x1024xf32>
    %c1_7 = arith.constant 1 : index
    %c0_8 = arith.constant 0 : index
    %c0_9 = arith.constant 0 : index
    %6 = vector.load %arg2[%c1_7, %c0_8, %c0_9] : memref<2x32x1024xf32, #tpu.memory_space<vmem>>, vector<1x32x1024xf32>
    %7 = vector.shape_cast %6 : vector<1x32x1024xf32> to vector<32x1024xf32>
    %cst = arith.constant dense<0.000000e+00> : vector<4x1024xf32>
    %8 = tpu.matmul %3, %5, %cst {dimension_numbers = #tpu.dot_dimension_numbers<[1], [0], [0], [1], [0, 0, 1, 1], [], []>, precision = #tpu.contract_precision<fp32>} : vector<4x32xf32>, vector<32x1024xf32>, vector<4x1024xf32> -> vector<4x1024xf32>
    %cst_10 = arith.constant dense<0.000000e+00> : vector<4x1024xf32>
    %9 = tpu.matmul %3, %7, %cst_10 {dimension_numbers = #tpu.dot_dimension_numbers<[1], [0], [0], [1], [0, 0, 1, 1], [], []>, precision = #tpu.contract_precision<fp32>} : vector<4x32xf32>, vector<32x1024xf32>, vector<4x1024xf32> -> vector<4x1024xf32>
    %cst_11 = arith.constant dense<0.000000e+00> : vector<4x1024xf32>
    %10 = tpu.matmul %1, %5, %cst_11 {dimension_numbers = #tpu.dot_dimension_numbers<[1], [0], [0], [1], [0, 0, 1, 1], [], []>, precision = #tpu.contract_precision<fp32>} : vector<4x32xf32>, vector<32x1024xf32>, vector<4x1024xf32> -> vector<4x1024xf32>
    %cst_12 = arith.constant dense<0.000000e+00> : vector<4x1024xf32>
    %11 = tpu.matmul %1, %7, %cst_12 {dimension_numbers = #tpu.dot_dimension_numbers<[1], [0], [0], [1], [0, 0, 1, 1], [], []>, precision = #tpu.contract_precision<fp32>} : vector<4x32xf32>, vector<32x1024xf32>, vector<4x1024xf32> -> vector<4x1024xf32>
    %12 = arith.mulf %8, %9 : vector<4x1024xf32>
    %13 = arith.mulf %10, %11 : vector<4x1024xf32>
    %14 = arith.subf %12, %13 : vector<4x1024xf32>
    %c0_13 = arith.constant 0 : index
    %c0_14 = arith.constant 0 : index
    %15 = vector.load %arg3[%c0_13, %c0_14] : memref<4x1024xf32, #tpu.memory_space<vmem>>, vector<4x1024xf32>
    tpu.vector_store %arg3[%c0_13, %c0_14], %14 {strides = array<i32>} : memref<4x1024xf32, #tpu.memory_space<vmem>>, vector<4x1024xf32>,
    %16 = arith.mulf %1, %3 : vector<4x32xf32>
    %cst_15 = arith.constant dense<0.000000e+00> : vector<4xf32>
    %17 = vector.multi_reduction <add>, %16, %cst_15 [1] : vector<4x32xf32> to vector<4xf32>
    %18 = vector.shape_cast %17 : vector<4xf32> to vector<4x1xf32>
    %19 = arith.mulf %1, %1 : vector<4x32xf32>
    %cst_16 = arith.constant dense<0.000000e+00> : vector<4xf32>
    %20 = vector.multi_reduction <add>, %19, %cst_16 [1] : vector<4x32xf32> to vector<4xf32>
    %21 = vector.shape_cast %20 : vector<4xf32> to vector<4x1xf32>
    %22 = arith.mulf %3, %3 : vector<4x32xf32>
    %cst_17 = arith.constant dense<0.000000e+00> : vector<4xf32>
    %23 = vector.multi_reduction <add>, %22, %cst_17 [1] : vector<4x32xf32> to vector<4xf32>
    %24 = vector.shape_cast %23 : vector<4xf32> to vector<4x1xf32>
    %cst_18 = arith.constant 2.000000e+00 : f32
    %25 = vector.broadcast %cst_18 : f32 to vector<4x1xf32>
    %26 = arith.mulf %25, %18 : vector<4x1xf32>
    %27 = arith.mulf %26, %18 : vector<4x1xf32>
    %28 = arith.mulf %21, %21 : vector<4x1xf32>
    %29 = arith.subf %27, %28 : vector<4x1xf32>
    %30 = arith.mulf %24, %24 : vector<4x1xf32>
    %31 = arith.subf %29, %30 : vector<4x1xf32>
    %cst_19 = arith.constant 1.000000e+00 : f32
    %32 = vector.broadcast %cst_19 : f32 to vector<4x1xf32>
    %33 = arith.addf %31, %32 : vector<4x1xf32>
    %cst_20 = arith.constant 0.000000e+00 : f32
    %34 = vector.broadcast %cst_20 : f32 to vector<4x1xf32>
    %35 = arith.maximumf %33, %34 : vector<4x1xf32>
    %36 = vector.shape_cast %35 : vector<4x1xf32> to vector<1x4x1xf32>
    %cst_21 = arith.constant dense<0.000000e+00> : vector<1xf32>
    %37 = vector.multi_reduction <add>, %36, %cst_21 [1, 2] : vector<1x4x1xf32> to vector<1xf32>
    %38 = vector.shape_cast %37 : vector<1xf32> to vector<1x1x1xf32>
    %39 = vector.extract %38[0, 0, 0] : f32 from vector<1x1x1xf32>
    %40 = vector.broadcast %39 : f32 to vector<1x1xf32>
    %41 = arith.mulf %24, %24 : vector<4x1xf32>
    %cst_22 = arith.constant 2.000000e+00 : f32
    %42 = vector.broadcast %cst_22 : f32 to vector<4x1xf32>
    %43 = arith.mulf %42, %18 : vector<4x1xf32>
    %44 = arith.mulf %43, %18 : vector<4x1xf32>
    %45 = arith.subf %41, %44 : vector<4x1xf32>
    %46 = arith.mulf %21, %21 : vector<4x1xf32>
    %47 = arith.addf %45, %46 : vector<4x1xf32>
    %48 = vector.shape_cast %47 : vector<4x1xf32> to vector<1x4x1xf32>
    %cst_23 = arith.constant dense<0.000000e+00> : vector<1xf32>
    %49 = vector.multi_reduction <add>, %48, %cst_23 [1, 2] : vector<1x4x1xf32> to vector<1xf32>
    %50 = vector.shape_cast %49 : vector<1xf32> to vector<1x1x1xf32>
    %51 = vector.extract %50[0, 0, 0] : f32 from vector<1x1x1xf32>
    %52 = vector.broadcast %51 : f32 to vector<1x1xf32>
    %53 = tpu.iota {dimensions = array<i32: 0>} : vector<8x128xi32>
    %54 = tpu.iota {dimensions = array<i32: 1>} : vector<8x128xi32>
    %c0_i32 = arith.constant 0 : i32
    %55 = vector.broadcast %c0_i32 : i32 to vector<8x128xi32>
    %56 = arith.cmpi eq, %53, %55 : vector<8x128xi32>
    %c0_i32_24 = arith.constant 0 : i32
    %57 = vector.broadcast %c0_i32_24 : i32 to vector<8x128xi32>
    %58 = arith.cmpi eq, %54, %57 : vector<8x128xi32>
    %59 = arith.andi %56, %58 : vector<8x128xi1>
    %cst_25 = arith.constant 0.000000e+00 : f32
    %60 = vector.shape_cast %40 : vector<1x1xf32> to vector<1x1xf32>
    %61 = vector.broadcast %60 : vector<1x1xf32> to vector<8x128xf32>
    %62 = vector.broadcast %cst_25 : f32 to vector<8x128xf32>
    %63 = arith.select %59, %61, %62 : vector<8x128xi1>, vector<8x128xf32>
    %c1_i32 = arith.constant 1 : i32
    %64 = vector.broadcast %c1_i32 : i32 to vector<8x128xi32>
    %65 = arith.cmpi eq, %54, %64 : vector<8x128xi32>
    %66 = arith.andi %56, %65 : vector<8x128xi1>
    %cst_26 = arith.constant 0.000000e+00 : f32
    %67 = vector.shape_cast %52 : vector<1x1xf32> to vector<1x1xf32>
    %68 = vector.broadcast %67 : vector<1x1xf32> to vector<8x128xf32>
    %69 = vector.broadcast %cst_26 : f32 to vector<8x128xf32>
    %70 = arith.select %66, %68, %69 : vector<8x128xi1>, vector<8x128xf32>
    %71 = arith.addf %63, %70 : vector<8x128xf32>
    %c0_27 = arith.constant 0 : index
    %c0_28 = arith.constant 0 : index
    %c0_29 = arith.constant 0 : index
    %72 = vector.load %arg4[%c0_27, %c0_28, %c0_29] : memref<1x8x128xf32, #tpu.memory_space<vmem>>, vector<1x8x128xf32>
    %73 = vector.shape_cast %72 : vector<1x8x128xf32> to vector<8x128xf32>
    %74 = vector.shape_cast %71 : vector<8x128xf32> to vector<1x8x128xf32>
    tpu.vector_store %arg4[%c0_27, %c0_28, %c0_29], %74 {strides = array<i32>} : memref<1x8x128xf32, #tpu.memory_space<vmem>>, vector<1x8x128xf32>,
    return
  }
  func.func @transform_0(%arg0: i32) -> (i32, i32, i32) {
    %c0_i32 = arith.constant 0 : i32
    %c0_i32_0 = arith.constant 0 : i32
    %c0_i32_1 = arith.constant 0 : i32
    return %c0_i32, %arg0, %c0_i32_0 : i32, i32, i32
  }
  func.func @transform_1(%arg0: i32) -> (i32, i32, i32) {
    %c0_i32 = arith.constant 0 : i32
    %c0_i32_0 = arith.constant 0 : i32
    %c0_i32_1 = arith.constant 0 : i32
    %c0_i32_2 = arith.constant 0 : i32
    return %c0_i32, %c0_i32_0, %c0_i32_1 : i32, i32, i32
  }
  func.func @transform_2(%arg0: i32) -> (i32, i32) {
    %c0_i32 = arith.constant 0 : i32
    %c0_i32_0 = arith.constant 0 : i32
    return %arg0, %c0_i32 : i32, i32
  }
  func.func @transform_3(%arg0: i32) -> (i32, i32, i32) {
    %c0_i32 = arith.constant 0 : i32
    %c0_i32_0 = arith.constant 0 : i32
    %c0_i32_1 = arith.constant 0 : i32
    return %arg0, %c0_i32, %c0_i32_0 : i32, i32, i32
  }
}

</mosaic_0001>

<bundles_post_ra>
// kernel: tpu_custom_call.1
= control target key start
LH: loop header
LB: loop body
LE: loop exit
PB: predicated region body
PF: predicated region fallthrough
CT: control target
= control target key end

     0   :  { %9 = vsyncpa [#allocation3], 0  ;;  %s8414_s0 = inlined_call_operand.hbm [shape: f32[2,4,32], index: 0, kind: input, shape index: {}]   ;;  %s8415_s1 = inlined_call_operand.hbm [shape: f32[2,32,1024], index: 1, kind: input, shape index: {}]   ;;  %s8416_s2 = inlined_call_operand.hbm [shape: f32[4,1024], index: 2, kind: output, shape index: {0}]   ;;  %s8417_s3 = inlined_call_operand.hbm [shape: f32[1,8,128], index: 3, kind: output, shape index: {1}]  }
   0x1   :  { %10 = vsyncpa [#allocation6], 0 }
   0x2   :  { %11 = vsyncpa [#allocation4], 0 }
   0x3   :  { %12 = vsyncpa [#allocation9], 0  ;;  %s17_s14 = sshll.u32 %s8414_s0, 4  ;;  %s6300_s15 = smov [#allocation2]   ;;  %s18_s14 = int_to_ptr.hbm [resolvable:$true] %s17_s14 }
   0x4   :  { %s19_s16 = sshll.u32 %s6300_s15, 4  ;;  %s30_s19 = sshll.u32 %s8415_s1, 4  ;;  %s20_s16 = int_to_ptr.vmem [resolvable:$true] %s19_s16  ;;  %s31_s19 = int_to_ptr.hbm [resolvable:$true] %s30_s19 }
   0x5   :  { %s6301_s20 = smov 64   ;;  %s6302_s21 = smov 4  }
   0x6   :  { %25 = dma.hbm_to_vmem [thread:$0]  %s18_s14, 128, %s20_s16, [#allocation3], %s6301_s20, %s6301_s20, %s6302_s21  }
   0x7   :  { %s6303_s22 = smov [#allocation5]   ;;  %s6304_s24 = smov 1024  }
   0x8   :  { %s32_s23 = sshll.u32 %s6303_s22, 4  ;;  %s33_s23 = int_to_ptr.vmem [resolvable:$true] %s32_s23 }
   0x9   :  { %38 = dma.hbm_to_vmem [thread:$0]  %s31_s19, 8192, %s33_s23, [#allocation6], %s6304_s24, %s6304_s24, %s6301_s20  }
   0xa   :  { %6292 = dma.done.wait [#allocation3], 128  }
   0xb   :  { %6293 = vsyncadd [#allocation3], 4294967168 }
   0xc   :  { %6294 = dma.done.wait [#allocation6], 8192  }
   0xd   :  { %6295 = vsyncadd [#allocation6], 4294959104  ;;  %vm115_vm0 = vcmask 261120   ;;  %v74_v0 = vld [vmem:[#allocation5 + $0xc0] sm:$0xff]  ;;  %v49_v7 = vld [vmem:[#allocation2 + $0x4] sm:$0xf] }
   0xe   :  { %v66_v1 = vld [vmem:[#allocation5 + $0x80] sm:$0xff]  ;;  %v6333_v3 = vand.u32 4294901760, %v74_v0  ;;  %v117_v9 = vsel %vm115_vm0, %v49_v7, 0  ;;  %v75_v10 = vld [vmem:[#allocation5 + $0xc8] sm:$0xff]  ;;  %v76_v53 = vld [vmem:[#allocation5 + $0xd0] sm:$0xff]  ;;  %vm6092_vm1 = vcmask 257024  }
   0xf   :  { %v58_v2 = vld [vmem:[#allocation5 + $0x40] sm:$0xff]  ;;  %v6335_v4 = vand.u32 4294901760, %v66_v1  ;;  %v67_v11 = vld [vmem:[#allocation5 + $0x88] sm:$0xff]  ;;  %v6353_v16 = vand.u32 4294901760, %v117_v9  ;;  %v6358_v18 = vand.u32 4294901760, %v75_v10  ;;  %v68_v55 = vld [vmem:[#allocation5 + $0x90] sm:$0xff] }
  0x10   :  { %v6337_v5 = vand.u32 4294901760, %v58_v2  ;;  %v50_v6 = vld [vmem:[#allocation5] sm:$0xff]  ;;  %v59_v12 = vld [vmem:[#allocation5 + $0x48] sm:$0xff]  ;;  %132 = vmatpush.msra.mxu0 %v6333_v3  ;;  %v6344_v13 = vsub.f32 %v74_v0, %v6333_v3  ;;  %232 = vmatpush.msra.mxu3 %v6333_v3  ;;  %v6360_v19 = vand.u32 4294901760, %v67_v11  ;;  %v6468_v56 = vand.u32 4294901760, %v76_v53  ;;  %v60_v58 = vld [vmem:[#allocation5 + $0x50] sm:$0xff] }
  0x11   :  { %v6339_v8 = vand.u32 4294901760, %v50_v6  ;;  %v6348_v14 = vsub.f32 %v66_v1, %v6335_v4  ;;  %v6362_v20 = vand.u32 4294901760, %v59_v12  ;;  %v6373_v23 = vsub.f32 %v117_v9, %v6353_v16  ;;  %v51_v36 = vld [vmem:[#allocation5 + $0x8] sm:$0xff]  ;;  %v52_v62 = vld [vmem:[#allocation5 + $0x10] sm:$0xff]  ;;  %v77_v63 = vld [vmem:[#allocation5 + $0xd8] sm:$0xff]  ;;  %s6305_s1 = smov [#allocation8]  }
  0x12   :  { %v6351_v15 = vsub.f32 %v58_v2, %v6337_v5  ;;  %203 = vmatpush.msra.mxu2 %v6344_v13  ;;  %134 = vmatpush.msra.mxu0 %v6335_v4  ;;  %v6367_v21 = vand.u32 4294901760, %v6344_v13  ;;  %v6380_v25 = vsub.f32 %v75_v10, %v6358_v18  ;;  %v6386_v27 = vsub.f32 %v67_v11, %v6360_v19  ;;  %v69_v1 = vld [vmem:[#allocation5 + $0x98] sm:$0xff]  ;;  %s6166_s25 = sshll.u32 %s6305_s1, 4  ;;  %s6168_s29 = sshll.u32 %s8417_s3, 4  ;;  %s6167_s25 = int_to_ptr.vmem [resolvable:$true] %s6166_s25  ;;  %s6169_s29 = int_to_ptr.hbm [resolvable:$true] %s6168_s29 }
  0x13   :  { %v6356_v17 = vsub.f32 %v50_v6, %v6339_v8  ;;  %v6370_v22 = vand.u32 4294901760, %v6348_v14  ;;  %234 = vmatpush.msra.mxu3 %v6335_v4  ;;  %v6389_v28 = vsub.f32 %v59_v12, %v6362_v20  ;;  %v6398_v31 = vand.u32 4294901760, %v6373_v23  ;;  %8672 = vst [vmem:[#allocation16_spill] sm:$0xff] %v6468_v56  ;;  %v61_v10 = vld [vmem:[#allocation5 + $0x58] sm:$0xff]  ;;  %s6306_s3 = smov [#allocation7]   ;;  %s6157_s6 = sshll.u32 %s8416_s2, 4  ;;  %s6158_s6 = int_to_ptr.hbm [resolvable:$true] %s6157_s6 }
  0x14   :  { %v6376_v24 = vand.u32 4294901760, %v6351_v15  ;;  %206 = vmatpush.msra.mxu2 %v6348_v14  ;;  %136 = vmatpush.msra.mxu0 %v6337_v5  ;;  %v163_v29 = vsub.f32 %v6344_v13, %v6367_v21  ;;  %v6404_v33 = vand.u32 4294901760, %v6380_v25  ;;  %v6407_v34 = vand.u32 4294901760, %v6386_v27  ;;  %s6155_s30 = sshll.u32 %s6306_s3, 4  ;;  %s6156_s30 = int_to_ptr.vmem [resolvable:$true] %s6155_s30 }
  0x15   :  { %v6383_v26 = vand.u32 4294901760, %v6356_v17  ;;  %v169_v30 = vsub.f32 %v6348_v14, %v6370_v22  ;;  %236 = vmatpush.msra.mxu3 %v6337_v5  ;;  %v6410_v35 = vand.u32 4294901760, %v6389_v28  ;;  %v142_v39 = vsub.f32 %v6373_v23, %v6398_v31 }
  0x16   :  { %v175_v32 = vsub.f32 %v6351_v15, %v6376_v24  ;;  %v6412_v37 = vand.u32 4294901760, %v163_v29  ;;  %209 = vmatpush.msra.mxu2 %v6351_v15  ;;  %138 = vmatpush.msra.mxu0 %v6339_v8  ;;  %v348_v41 = vsub.f32 %v6380_v25, %v6404_v33  ;;  %v354_v42 = vsub.f32 %v6386_v27, %v6407_v34  ;;  %v53_v29 = vld [vmem:[#allocation5 + $0x18] sm:$0xff] }
  0x17   :  { %v6416_v38 = vand.u32 4294901760, %v169_v30  ;;  %v181_v40 = vsub.f32 %v6356_v17, %v6383_v26  ;;  %238 = vmatpush.msra.mxu3 %v6339_v8  ;;  %v6430_v43 = vand.u32 4294901760, %v142_v39  ;;  %v360_v45 = vsub.f32 %v6389_v28, %v6410_v35 }
  0x18   :  { %261 = vmatpush.msrb.mxu0 %v6367_v21  ;;  %165 = vmatpush.msra.mxu1 %v6412_v37  ;;  %v6432_v44 = vand.u32 4294901760, %v175_v32  ;;  %v6436_v46 = vand.u32 4294901760, %v51_v36  ;;  %v6440_v47 = vand.u32 4294901760, %v348_v41  ;;  %v6442_v48 = vand.u32 4294901760, %v354_v42 }
  0x19   :  { %212 = vmatpush.msra.mxu2 %v6356_v17  ;;  %242 = vmatmul.f32.vlgmr.msra.gmra.mxu3 %v6398_v31  ;;  %v6446_v49 = vand.u32 4294901760, %v181_v40  ;;  %v6455_v51 = vand.u32 4294901760, %v360_v45  ;;  %v6476_v59 = vand.u32 4294901760, %v68_v55  ;;  %v6483_v60 = vsub.f32 %v76_v53, %v6468_v56 }
  0x1a   :  { %215 = vmatmul.f32.vlgmr.msra.gmra.mxu2 %v6373_v23  ;;  %171 = vmatpush.msra.mxu1 %v6416_v38  ;;  %v6449_v50 = vsub.f32 %v51_v36, %v6436_v46  ;;  %v6485_v61 = vand.u32 4294901760, %v60_v58  ;;  %v6496_v2 = vand.u32 4294901760, %v52_v62  ;;  %v6498_v6 = vand.u32 4294901760, %v77_v63 }
  0x1b   :  { %144 = vmatmul.f32.vlgmr.msra.gmra.mxu0 %v6430_v43  ;;  %317 = vmatpush.msrb.mxu2 %v6358_v18  ;;  %8673 = vst [vmem:[#allocation17_spill] sm:$0xff] %v6476_v59  ;;  %v6492_v0 = vsub.f32 %v68_v55, %v6476_v59  ;;  %v6503_v7 = vand.u32 4294901760, %v6483_v60  ;;  %v6510_v11 = vand.u32 4294901760, %v69_v1  ;;  %v6525_v36 = vand.u32 4294901760, %v61_v10 }
  0x1c   :  { %8670 = vst [vmem:[#allocation14_spill] sm:$0xff] %v6449_v50  ;;  %350 = vmatpush.msrb.mxu3 %v6440_v47  ;;  %177 = vmatpush.msra.mxu1 %v6432_v44  ;;  %v6458_v52 = vand.u32 4294901760, %v6449_v50  ;;  %v6506_v9 = vsub.f32 %v60_v58, %v6485_v61  ;;  %v6520_v30 = vsub.f32 %v52_v62, %v6496_v2  ;;  %v6539_v42 = vand.u32 4294901760, %v53_v29 }
  0x1d   :  { %265 = vmatpush.msrb.mxu0 %v6370_v22  ;;  %319 = vmatpush.msrb.mxu2 %v6360_v19  ;;  %8674 = vst [vmem:[#allocation18_spill] sm:$0xff] %v6483_v60  ;;  %v6515_v12 = vand.u32 4294901760, %v6492_v0  ;;  %v6523_v32 = vsub.f32 %v77_v63, %v6498_v6  ;;  %v533_v39 = vsub.f32 %v6483_v60, %v6503_v7  ;;  %vm6112_vm2 = vcmask 3072  }
  0x1e   :  { %8671 = vst [vmem:[#allocation15_spill] sm:$0xff] %v6458_v52  ;;  %356 = vmatpush.msrb.mxu3 %v6442_v48  ;;  %183 = vmatpush.msra.mxu1 %v6446_v49  ;;  %v366_v54 = vsub.f32 %v6449_v50, %v6458_v52  ;;  %v6532_v40 = vand.u32 4294901760, %v6506_v9  ;;  %v6537_v41 = vsub.f32 %v69_v1, %v6510_v11  ;;  %vm6078_vm3 = vcmask 1043456  }
  0x1f   :  { %269 = vmatpush.msrb.mxu0 %v6376_v24  ;;  %185 = vmatmul.f32.vlgmr.msra.gmra.mxu1 %v6353_v16  ;;  %8675 = vst [vmem:[#allocation19_spill] sm:$0xff] %v6485_v61  ;;  %v539_v45 = vsub.f32 %v6492_v0, %v6515_v12  ;;  %v6548_v53 = vand.u32 4294901760, %v6523_v32  ;;  %v6554_v55 = vsub.f32 %v61_v10, %v6525_v36  ;;  %v6558_v58 = vand.u32 4294901760, %v533_v39 }
  0x20   :  { %321 = vmatpush.msrb.mxu2 %v6362_v20  ;;  %292 = vmatpush.msrb.mxu1 %v6333_v3  ;;  %v6472_v57 = vand.u32 4294901760, %v366_v54  ;;  %8676 = vst [vmem:[#allocation20_spill] sm:$0xff] %v6492_v0  ;;  %v6551_v54 = vand.u32 4294901760, %v6520_v30  ;;  %v545_v62 = vsub.f32 %v6506_v9, %v6532_v40  ;;  %v6565_v63 = vand.u32 4294901760, %v6537_v41 }
  0x21   :  { %362 = vmatpush.msrb.mxu3 %v6455_v51  ;;  %273 = vmatpush.msrb.mxu0 %v6383_v26  ;;  %8677 = vst [vmem:[#allocation21_spill] sm:$0xff] %v6496_v2  ;;  %v6568_v1 = vsub.f32 %v53_v29, %v6539_v42  ;;  %v6572_v10 = vand.u32 4294901760, %v539_v45  ;;  %v718_v39 = vsub.f32 %v6523_v32, %v6548_v53 }
  0x22   :  { %323 = vmatpush.msrb.mxu2 %v6436_v46  ;;  %294 = vmatpush.msrb.mxu1 %v6335_v4  ;;  %8678 = vst [vmem:[#allocation22_spill] sm:$0xff] %v6498_v6  ;;  %v6585_v29 = vand.u32 4294901760, %v545_v62  ;;  %v724_v45 = vsub.f32 %v6537_v41, %v6565_v63 }
  0x23   :  { %368 = vmatpush.msrb.mxu3 %v6472_v57  ;;  %275 = vmatmul.f32.vlgmr.msrb.gmra.mxu0 %v6353_v16  ;;  %8679 = vst [vmem:[#allocation23_spill] sm:$0xff] %v6503_v7  ;;  %v6598_v62 = vand.u32 4294901760, %v718_v39  ;;  %v78_v39 = vld [vmem:[#allocation5 + $0xe0] sm:$0xff] }
  0x24   :  { %329 = vmatmul.f32.vlgmr.msrb.gmra.mxu2 %v6430_v43  ;;  %296 = vmatpush.msrb.mxu1 %v6337_v5  ;;  %8680 = vst [vmem:[#allocation24_spill] sm:$0xff] %v6506_v9 }
  0x25   :  { %370 = vmatmul.f32.vlgmr.msrb.gmra.mxu3 %v6353_v16  ;;  %446 = vmatpush.msra.mxu2 %v6404_v33  ;;  %8681 = vst [vmem:[#allocation25_spill] sm:$0xff] %v6510_v11 }
  0x26   :  { %388 = vmatpush.msra.mxu0 %v6380_v25  ;;  %477 = vmatpush.msra.mxu3 %v6358_v18  ;;  %8682 = vst [vmem:[#allocation26_spill] sm:$0xff] %v6515_v12 }
  0x27   :  { %298 = vmatpush.msrb.mxu1 %v6339_v8  ;;  %450 = vmatpush.msra.mxu2 %v6407_v34  ;;  %8683 = vst [vmem:[#allocation27_spill] sm:$0xff] %v6520_v30 }
  0x28   :  { %391 = vmatpush.msra.mxu0 %v6386_v27  ;;  %479 = vmatpush.msra.mxu3 %v6360_v19  ;;  %8684 = vst [vmem:[#allocation28_spill] sm:$0xff] %v6523_v32 }
  0x29   :  { %300 = vmatmul.f32.vlgmr.msrb.gmra.mxu1 %v6353_v16  ;;  %454 = vmatpush.msra.mxu2 %v6410_v35  ;;  %8685 = vst [vmem:[#allocation29_spill] sm:$0xff] %v6525_v36 }
  0x2a   :  { %417 = vmatpush.msra.mxu1 %v6358_v18  ;;  %394 = vmatpush.msra.mxu0 %v6389_v28  ;;  %8686 = vst [vmem:[#allocation30_spill] sm:$0xff] %v6532_v40 }
  0x2b   :  { %481 = vmatpush.msra.mxu3 %v6362_v20  ;;  %458 = vmatpush.msra.mxu2 %v6458_v52  ;;  %8687 = vst [vmem:[#allocation31_spill] sm:$0xff] %v6537_v41 }
  0x2c   :  { %419 = vmatpush.msra.mxu1 %v6360_v19  ;;  %397 = vmatpush.msra.mxu0 %v6449_v50  ;;  %8688 = vst [vmem:[#allocation32_spill] sm:$0xff] %v6539_v42  ;;  %v6581_v50 = vand.u32 4294901760, %v6554_v55 }
  0x2d   :  { %483 = vmatpush.msra.mxu3 %v6436_v46  ;;  %400 = vmatmul.f32.vlgmr.msra.gmra.mxu0 %v6373_v23  ;;  %8689 = vst [vmem:[#allocation33_spill] sm:$0xff] %v6548_v53 }
  0x2e   :  { %421 = vmatpush.msra.mxu1 %v6362_v20  ;;  %460 = vmatmul.f32.vlgmr.msra.gmra.mxu2 %v6353_v16  ;;  %8690 = vst [vmem:[#allocation34_spill] sm:$0xff] %v6551_v54 }
  0x2f   :  { %485 = vmatmul.f32.vlgmr.msra.gmra.mxu3 %v6353_v16  ;;  %8691 = vst [vmem:[#allocation35_spill] sm:$0xff] %v6554_v55  ;;  %573 = vmatpush.msrb.mxu2 %v6483_v60  ;;  %v551_v60 = vsub.f32 %v6520_v30, %v6551_v54 }
  0x30   :  { %502 = vmatpush.msrb.mxu0 %v6468_v56  ;;  %8692 = vst [vmem:[#allocation36_spill] sm:$0xff] %v6558_v58  ;;  %602 = vmatpush.msrb.mxu3 %v6468_v56 }
  0x31   :  { %423 = vmatpush.msra.mxu1 %v6436_v46  ;;  %8693 = vst [vmem:[#allocation37_spill] sm:$0xff] %v6565_v63  ;;  %576 = vmatpush.msrb.mxu2 %v6492_v0  ;;  %v6592_v0 = vand.u32 4294901760, %v6568_v1 }
  0x32   :  { %8694 = vst [vmem:[#allocation38_spill] sm:$0xff] %v6568_v1  ;;  %504 = vmatpush.msrb.mxu0 %v6476_v59  ;;  %604 = vmatpush.msrb.mxu3 %v6476_v59 }
  0x33   :  { %8695 = vst [vmem:[#allocation39_spill] sm:$0xff] %v6572_v10  ;;  %427 = vmatmul.f32.vlgmr.msra.gmra.mxu1 %v6398_v31  ;;  %579 = vmatpush.msrb.mxu2 %v6506_v9  ;;  %v730_v9 = vsub.f32 %v6554_v55, %v6581_v50 }
  0x34   :  { %8696 = vst [vmem:[#allocation40_spill] sm:$0xff] %v6581_v50  ;;  %535 = vmatpush.msrb.mxu1 %v6558_v58  ;;  %506 = vmatpush.msrb.mxu0 %v6485_v61  ;;  %v6600_v58 = vand.u32 4294901760, %v551_v60 }
  0x35   :  { %8697 = vst [vmem:[#allocation41_spill] sm:$0xff] %v6585_v29  ;;  %606 = vmatpush.msrb.mxu3 %v6485_v61  ;;  %582 = vmatpush.msrb.mxu2 %v6520_v30  ;;  %v736_v30 = vsub.f32 %v6568_v1, %v6592_v0  ;;  %v6616_v60 = vand.u32 4294901760, %v730_v9  ;;  %v62_v9 = vld [vmem:[#allocation5 + $0x60] sm:$0xff] }
  0x36   :  { %8698 = vst [vmem:[#allocation42_spill] sm:$0xff] %v6592_v0  ;;  %541 = vmatpush.msrb.mxu1 %v6572_v10  ;;  %508 = vmatpush.msrb.mxu0 %v6496_v2  ;;  %v6608_v10 = vand.u32 4294901760, %v724_v45 }
  0x37   :  { %608 = vmatpush.msrb.mxu3 %v6496_v2  ;;  %8699 = vst [vmem:[#allocation43_spill] sm:$0xff] %v6598_v62  ;;  %514 = vmatmul.f32.vlgmr.msrb.gmra.mxu0 %v6430_v43  ;;  %v6622_v45 = vand.u32 4294901760, %v736_v30 }
  0x38   :  { %8700 = vst [vmem:[#allocation44_spill] sm:$0xff] %v6600_v58  ;;  %547 = vmatpush.msrb.mxu1 %v6585_v29  ;;  %585 = vmatmul.f32.vlgmr.msrb.gmra.mxu2 %v6373_v23  ;;  %v70_v29 = vld [vmem:[#allocation5 + $0xa0] sm:$0xff] }
  0x39   :  { %612 = vmatmul.f32.vlgmr.msrb.gmra.mxu3 %v6398_v31  ;;  %8701 = vst [vmem:[#allocation45_spill] sm:$0xff] %v6608_v10  ;;  %687 = vmatpush.msra.mxu2 %v6498_v6 }
  0x3a   :  { %631 = vmatpush.msra.mxu0 %v6503_v7  ;;  %720 = vmatpush.msra.mxu3 %v6598_v62  ;;  %8702 = vst [vmem:[#allocation46_spill] sm:$0xff] %v6616_v60  ;;  %v6626_v62 = vand.u32 4294901760, %v78_v39 }
  0x3b   :  { %553 = vmatpush.msrb.mxu1 %v6600_v58  ;;  %689 = vmatpush.msra.mxu2 %v6510_v11  ;;  %8703 = vst [vmem:[#allocation47_spill] sm:$0xff] %v6622_v45 }
  0x3c   :  { %635 = vmatpush.msra.mxu0 %v6515_v12  ;;  %726 = vmatpush.msra.mxu3 %v6608_v10  ;;  %8704 = vst [vmem:[#allocation48_spill] sm:$0xff] %v6626_v62  ;;  %v6632_v10 = vand.u32 4294901760, %v70_v29  ;;  %v6639_v30 = vsub.f32 %v78_v39, %v6626_v62  ;;  %v79_v12 = vld [vmem:[#allocation5 + $0xe8] sm:$0xff] }
  0x3d   :  { %555 = vmatmul.f32.vlgmr.msrb.gmra.mxu1 %v6353_v16  ;;  %691 = vmatpush.msra.mxu2 %v6525_v36  ;;  %v6654_v58 = vand.u32 4294901760, %v79_v12 }
  0x3e   :  { %662 = vmatpush.msra.mxu1 %v6468_v56  ;;  %639 = vmatpush.msra.mxu0 %v6532_v40  ;;  %8705 = vst [vmem:[#allocation49_spill] sm:$0xff] %v6632_v10  ;;  %v6641_v40 = vand.u32 4294901760, %v62_v9 }
  0x3f   :  { %732 = vmatpush.msra.mxu3 %v6616_v60  ;;  %693 = vmatpush.msra.mxu2 %v6539_v42  ;;  %8706 = vst [vmem:[#allocation50_spill] sm:$0xff] %v6639_v30  ;;  %v54_v60 = vld [vmem:[#allocation5 + $0x20] sm:$0xff] }
  0x40   :  { %664 = vmatpush.msra.mxu1 %v6476_v59  ;;  %643 = vmatpush.msra.mxu0 %v6551_v54  ;;  %8707 = vst [vmem:[#allocation51_spill] sm:$0xff] %v6641_v40  ;;  %v71_v54 = vld [vmem:[#allocation5 + $0xa8] sm:$0xff]  ;;  %v6652_v39 = vand.u32 4294901760, %v54_v60 }
  0x41   :  { %738 = vmatpush.msra.mxu3 %v6622_v45  ;;  %645 = vmatmul.f32.vlgmr.msra.gmra.mxu0 %v6353_v16  ;;  %v6648_v45 = vsub.f32 %v70_v29, %v6632_v10  ;;  %8710 = vst [vmem:[#allocation54_spill] sm:$0xff] %v6654_v58  ;;  %v63_v29 = vld [vmem:[#allocation5 + $0x68] sm:$0xff]  ;;  %v6666_v7 = vand.u32 4294901760, %v71_v54 }
  0x42   :  { %666 = vmatpush.msra.mxu1 %v6485_v61  ;;  %699 = vmatmul.f32.vlgmr.msra.gmra.mxu2 %v6430_v43  ;;  %8709 = vst [vmem:[#allocation53_spill] sm:$0xff] %v6652_v39  ;;  %v6681_v61 = vand.u32 4294901760, %v63_v29 }
  0x43   :  { %740 = vmatmul.f32.vlgmr.msra.gmra.mxu3 %v6353_v16  ;;  %816 = vmatpush.msrb.mxu2 %v6548_v53  ;;  %8708 = vst [vmem:[#allocation52_spill] sm:$0xff] %v6648_v45  ;;  %v6659_v53 = vand.u32 4294901760, %v6639_v30 }
  0x44   :  { %758 = vmatpush.msrb.mxu0 %v6523_v32  ;;  %847 = vmatpush.msrb.mxu3 %v6498_v6  ;;  %v6662_v32 = vsub.f32 %v62_v9, %v6641_v40  ;;  %8713 = vst [vmem:[#allocation57_spill] sm:$0xff] %v6666_v7  ;;  %v6676_v9 = vsub.f32 %v54_v60, %v6652_v39 }
  0x45   :  { %668 = vmatpush.msra.mxu1 %v6496_v2  ;;  %820 = vmatpush.msrb.mxu2 %v6565_v63  ;;  %8711 = vst [vmem:[#allocation55_spill] sm:$0xff] %v6659_v53  ;;  %v6671_v63 = vand.u32 4294901760, %v6648_v45  ;;  %v6679_v2 = vsub.f32 %v79_v12, %v6654_v58  ;;  %v6693_v60 = vsub.f32 %v71_v54, %v6666_v7 }
  0x46   :  { %761 = vmatpush.msrb.mxu0 %v6537_v41  ;;  %8712 = vst [vmem:[#allocation56_spill] sm:$0xff] %v6662_v32  ;;  %849 = vmatpush.msrb.mxu3 %v6510_v11  ;;  %v55_v41 = vld [vmem:[#allocation5 + $0x28] sm:$0xff]  ;;  %v6710_v54 = vsub.f32 %v63_v29, %v6681_v61 }
  0x47   :  { %670 = vmatmul.f32.vlgmr.msra.gmra.mxu1 %v6353_v16  ;;  %824 = vmatpush.msrb.mxu2 %v6581_v50  ;;  %8714 = vst [vmem:[#allocation58_spill] sm:$0xff] %v6671_v63  ;;  %v903_v50 = vsub.f32 %v6639_v30, %v6659_v53  ;;  %v6695_v12 = vand.u32 4294901760, %v55_v41  ;;  %v6721_v59 = vand.u32 4294901760, %v6693_v60 }
  0x48   :  { %787 = vmatpush.msrb.mxu1 %v6498_v6  ;;  %764 = vmatpush.msrb.mxu0 %v6554_v55  ;;  %8715 = vst [vmem:[#allocation59_spill] sm:$0xff] %v6676_v9  ;;  %v6688_v6 = vand.u32 4294901760, %v6662_v32  ;;  %v6707_v55 = vand.u32 4294901760, %v6676_v9 }
  0x49   :  { %851 = vmatpush.msrb.mxu3 %v6525_v36  ;;  %8716 = vst [vmem:[#allocation60_spill] sm:$0xff] %v6679_v2  ;;  %828 = vmatpush.msrb.mxu2 %v6592_v0  ;;  %v909_v0 = vsub.f32 %v6648_v45, %v6671_v63  ;;  %v6724_v56 = vsub.f32 %v55_v41, %v6695_v12 }
  0x4a   :  { %8717 = vst [vmem:[#allocation61_spill] sm:$0xff] %v6681_v61  ;;  %789 = vmatpush.msrb.mxu1 %v6510_v11  ;;  %767 = vmatpush.msrb.mxu0 %v6568_v1  ;;  %v6704_v1 = vand.u32 4294901760, %v6679_v2  ;;  %v915_v11 = vsub.f32 %v6662_v32, %v6688_v6 }
  0x4b   :  { %8718 = vst [vmem:[#allocation62_spill] sm:$0xff] %v6688_v6  ;;  %853 = vmatpush.msrb.mxu3 %v6539_v42  ;;  %770 = vmatmul.f32.vlgmr.msrb.gmra.mxu0 %v6373_v23  ;;  %v6728_v29 = vand.u32 4294901760, %v909_v0  ;;  %v1094_v0 = vsub.f32 %v6693_v60, %v6721_v59 }
  0x4c   :  { %8719 = vst [vmem:[#allocation63_spill] sm:$0xff] %v6693_v60  ;;  %791 = vmatpush.msrb.mxu1 %v6525_v36  ;;  %830 = vmatmul.f32.vlgmr.msrb.gmra.mxu2 %v6353_v16  ;;  %v6714_v36 = vand.u32 4294901760, %v903_v50  ;;  %v1088_v50 = vsub.f32 %v6679_v2, %v6704_v1  ;;  %v6741_v41 = vand.u32 4294901760, %v915_v11 }
  0x4d   :  { %8720 = vst [vmem:[#allocation64_spill] sm:$0xff] %v6695_v12  ;;  %855 = vmatmul.f32.vlgmr.msrb.gmra.mxu3 %v6353_v16  ;;  %943 = vmatpush.msra.mxu2 %v6639_v30  ;;  %v921_v30 = vsub.f32 %v6676_v9, %v6707_v55 }
  0x4e   :  { %8721 = vst [vmem:[#allocation65_spill] sm:$0xff] %v6704_v1  ;;  %872 = vmatpush.msra.mxu0 %v6626_v62  ;;  %972 = vmatpush.msra.mxu3 %v6626_v62  ;;  %v6754_v11 = vand.u32 4294901760, %v1088_v50  ;;  %v80_v50 = vld [vmem:[#allocation5 + $0xf0] sm:$0xff] }
  0x4f   :  { %8722 = vst [vmem:[#allocation66_spill] sm:$0xff] %v6707_v55  ;;  %793 = vmatpush.msrb.mxu1 %v6539_v42  ;;  %946 = vmatpush.msra.mxu2 %v6648_v45  ;;  %v6737_v42 = vand.u32 4294901760, %v6710_v54  ;;  %v6748_v45 = vand.u32 4294901760, %v6724_v56 }
  0x50   :  { %8723 = vst [vmem:[#allocation67_spill] sm:$0xff] %v6710_v54  ;;  %874 = vmatpush.msra.mxu0 %v6632_v10  ;;  %974 = vmatpush.msra.mxu3 %v6632_v10 }
  0x51   :  { %8724 = vst [vmem:[#allocation68_spill] sm:$0xff] %v6714_v36  ;;  %797 = vmatmul.f32.vlgmr.msrb.gmra.mxu1 %v6398_v31  ;;  %949 = vmatpush.msra.mxu2 %v6662_v32  ;;  %v1100_v32 = vsub.f32 %v6710_v54, %v6737_v42 }
  0x52   :  { %8725 = vst [vmem:[#allocation69_spill] sm:$0xff] %v6721_v59  ;;  %905 = vmatpush.msra.mxu1 %v6714_v36  ;;  %876 = vmatpush.msra.mxu0 %v6641_v40  ;;  %v6756_v36 = vand.u32 4294901760, %v921_v30 }
  0x53   :  { %8726 = vst [vmem:[#allocation70_spill] sm:$0xff] %v6724_v56  ;;  %976 = vmatpush.msra.mxu3 %v6641_v40  ;;  %952 = vmatpush.msra.mxu2 %v6676_v9  ;;  %v1106_v9 = vsub.f32 %v6724_v56, %v6748_v45  ;;  %v6772_v30 = vand.u32 4294901760, %v1100_v32  ;;  %v64_v32 = vld [vmem:[#allocation5 + $0x70] sm:$0xff] }
  0x54   :  { %8727 = vst [vmem:[#allocation71_spill] sm:$0xff] %v6728_v29  ;;  %911 = vmatpush.msra.mxu1 %v6728_v29  ;;  %878 = vmatpush.msra.mxu0 %v6652_v39  ;;  %v6764_v29 = vand.u32 4294901760, %v1094_v0 }
  0x55   :  { %8728 = vst [vmem:[#allocation72_spill] sm:$0xff] %v6737_v42  ;;  %978 = vmatpush.msra.mxu3 %v6652_v39  ;;  %884 = vmatmul.f32.vlgmr.msra.gmra.mxu0 %v6430_v43  ;;  %v6778_v0 = vand.u32 4294901760, %v1106_v9 }
  0x56   :  { %8729 = vst [vmem:[#allocation73_spill] sm:$0xff] %v6741_v41  ;;  %917 = vmatpush.msra.mxu1 %v6741_v41  ;;  %955 = vmatmul.f32.vlgmr.msra.gmra.mxu2 %v6373_v23  ;;  %v72_v41 = vld [vmem:[#allocation5 + $0xb0] sm:$0xff] }
  0x57   :  { %8730 = vst [vmem:[#allocation74_spill] sm:$0xff] %v6748_v45  ;;  %982 = vmatmul.f32.vlgmr.msra.gmra.mxu3 %v6398_v31  ;;  %1057 = vmatpush.msrb.mxu2 %v6654_v58 }
  0x58   :  { %8731 = vst [vmem:[#allocation75_spill] sm:$0xff] %v6754_v11  ;;  %1001 = vmatpush.msrb.mxu0 %v6659_v53  ;;  %1090 = vmatpush.msrb.mxu3 %v6754_v11  ;;  %v6782_v11 = vand.u32 4294901760, %v80_v50 }
  0x59   :  { %8732 = vst [vmem:[#allocation76_spill] sm:$0xff] %v6756_v36  ;;  %923 = vmatpush.msra.mxu1 %v6756_v36  ;;  %1059 = vmatpush.msrb.mxu2 %v6666_v7 }
  0x5a   :  { %8733 = vst [vmem:[#allocation77_spill] sm:$0xff] %v6764_v29  ;;  %1005 = vmatpush.msrb.mxu0 %v6671_v63  ;;  %1096 = vmatpush.msrb.mxu3 %v6764_v29  ;;  %v6788_v29 = vand.u32 4294901760, %v72_v41  ;;  %v6795_v9 = vsub.f32 %v80_v50, %v6782_v11  ;;  %v81_v63 = vld [vmem:[#allocation5 + $0xf8] sm:$0xff] }
  0x5b   :  { %8734 = vst [vmem:[#allocation78_spill] sm:$0xff] %v6772_v30  ;;  %925 = vmatmul.f32.vlgmr.msra.gmra.mxu1 %v6353_v16  ;;  %1061 = vmatpush.msrb.mxu2 %v6681_v61  ;;  %v6810_v36 = vand.u32 4294901760, %v81_v63 }
  0x5c   :  { %8735 = vst [vmem:[#allocation79_spill] sm:$0xff] %v6778_v0  ;;  %1032 = vmatpush.msrb.mxu1 %v6626_v62  ;;  %1009 = vmatpush.msrb.mxu0 %v6688_v6  ;;  %v6797_v6 = vand.u32 4294901760, %v64_v32 }
  0x5d   :  { %8736 = vst [vmem:[#allocation80_spill] sm:$0xff] %v6782_v11  ;;  %1102 = vmatpush.msrb.mxu3 %v6772_v30  ;;  %1063 = vmatpush.msrb.mxu2 %v6695_v12  ;;  %v56_v30 = vld [vmem:[#allocation5 + $0x30] sm:$0xff] }
  0x5e   :  { %1034 = vmatpush.msrb.mxu1 %v6632_v10  ;;  %8737 = vst [vmem:[#allocation81_spill] sm:$0xff] %v6788_v29  ;;  %1013 = vmatpush.msrb.mxu0 %v6707_v55  ;;  %v73_v55 = vld [vmem:[#allocation5 + $0xb8] sm:$0xff]  ;;  %v6808_v50 = vand.u32 4294901760, %v56_v30 }
  0x5f   :  { %1108 = vmatpush.msrb.mxu3 %v6778_v0  ;;  %1015 = vmatmul.f32.vlgmr.msrb.gmra.mxu0 %v6353_v16  ;;  %8738 = vst [vmem:[#allocation82_spill] sm:$0xff] %v6795_v9  ;;  %v6804_v0 = vsub.f32 %v72_v41, %v6788_v29  ;;  %v65_v41 = vld [vmem:[#allocation5 + $0x78] sm:$0xff]  ;;  %v6822_v53 = vand.u32 4294901760, %v73_v55 }
  0x60   :  { %1036 = vmatpush.msrb.mxu1 %v6641_v40  ;;  %8739 = vst [vmem:[#allocation83_spill] sm:$0xff] %v6797_v6  ;;  %1069 = vmatmul.f32.vlgmr.msrb.gmra.mxu2 %v6430_v43  ;;  %v6837_v40 = vand.u32 4294901760, %v65_v41 }
  0x61   :  { %1110 = vmatmul.f32.vlgmr.msrb.gmra.mxu3 %v6353_v16  ;;  %1186 = vmatpush.msra.mxu2 %v6704_v1  ;;  %8740 = vst [vmem:[#allocation84_spill] sm:$0xff] %v6804_v0  ;;  %v6815_v1 = vand.u32 4294901760, %v6795_v9 }
  0x62   :  { %1128 = vmatpush.msra.mxu0 %v6679_v2  ;;  %1217 = vmatpush.msra.mxu3 %v6654_v58  ;;  %8741 = vst [vmem:[#allocation85_spill] sm:$0xff] %v6808_v50  ;;  %v6818_v2 = vsub.f32 %v64_v32, %v6797_v6  ;;  %v6832_v32 = vsub.f32 %v56_v30, %v6808_v50 }
  0x63   :  { %1038 = vmatpush.msrb.mxu1 %v6652_v39  ;;  %8742 = vst [vmem:[#allocation86_spill] sm:$0xff] %v6810_v36  ;;  %1190 = vmatpush.msra.mxu2 %v6721_v59  ;;  %v6827_v59 = vand.u32 4294901760, %v6804_v0  ;;  %v6835_v39 = vsub.f32 %v81_v63, %v6810_v36  ;;  %v6849_v30 = vsub.f32 %v73_v55, %v6822_v53 }
  0x64   :  { %1131 = vmatpush.msra.mxu0 %v6693_v60  ;;  %8743 = vst [vmem:[#allocation87_spill] sm:$0xff] %v6815_v1  ;;  %1219 = vmatpush.msra.mxu3 %v6666_v7  ;;  %v57_v60 = vld [vmem:[#allocation5 + $0x38] sm:$0xff]  ;;  %v6866_v55 = vsub.f32 %v65_v41, %v6837_v40 }
  0x65   :  { %8744 = vst [vmem:[#allocation88_spill] sm:$0xff] %v6818_v2  ;;  %1040 = vmatmul.f32.vlgmr.msrb.gmra.mxu1 %v6353_v16  ;;  %1194 = vmatpush.msra.mxu2 %v6737_v42  ;;  %v1273_v42 = vsub.f32 %v6795_v9, %v6815_v1  ;;  %v6851_v63 = vand.u32 4294901760, %v57_v60  ;;  %v6877_v10 = vand.u32 4294901760, %v6849_v30 }
  0x66   :  { %8745 = vst [vmem:[#allocation89_spill] sm:$0xff] %v6822_v53  ;;  %1157 = vmatpush.msra.mxu1 %v6654_v58  ;;  %1134 = vmatpush.msra.mxu0 %v6710_v54  ;;  %v6844_v58 = vand.u32 4294901760, %v6818_v2  ;;  %v6863_v54 = vand.u32 4294901760, %v6832_v32 }
  0x67   :  { %8746 = vst [vmem:[#allocation90_spill] sm:$0xff] %v6827_v59  ;;  %1221 = vmatpush.msra.mxu3 %v6681_v61  ;;  %1198 = vmatpush.msra.mxu2 %v6748_v45  ;;  %v1279_v45 = vsub.f32 %v6804_v0, %v6827_v59  ;;  %v6880_v62 = vsub.f32 %v57_v60, %v6851_v63 }
  0x68   :  { %8747 = vst [vmem:[#allocation91_spill] sm:$0xff] %v6832_v32  ;;  %1159 = vmatpush.msra.mxu1 %v6666_v7  ;;  %1137 = vmatpush.msra.mxu0 %v6724_v56  ;;  %v6860_v56 = vand.u32 4294901760, %v6835_v39  ;;  %v1285_v7 = vsub.f32 %v6818_v2, %v6844_v58 }
  0x69   :  { %8748 = vst [vmem:[#allocation92_spill] sm:$0xff] %v6835_v39  ;;  %1223 = vmatpush.msra.mxu3 %v6695_v12  ;;  %1140 = vmatmul.f32.vlgmr.msra.gmra.mxu0 %v6373_v23  ;;  %v6884_v41 = vand.u32 4294901760, %v1279_v45  ;;  %v1464_v45 = vsub.f32 %v6849_v30, %v6877_v10 }
  0x6a   :  { %8749 = vst [vmem:[#allocation93_spill] sm:$0xff] %v6837_v40  ;;  %1161 = vmatpush.msra.mxu1 %v6681_v61  ;;  %1200 = vmatmul.f32.vlgmr.msra.gmra.mxu2 %v6353_v16  ;;  %v6870_v61 = vand.u32 4294901760, %v1273_v42  ;;  %v1458_v42 = vsub.f32 %v6835_v39, %v6860_v56  ;;  %v6897_v60 = vand.u32 4294901760, %v1285_v7 }
  0x6b   :  { %8750 = vst [vmem:[#allocation94_spill] sm:$0xff] %v6844_v58  ;;  %1225 = vmatmul.f32.vlgmr.msra.gmra.mxu3 %v6353_v16  ;;  %1313 = vmatpush.msrb.mxu2 %v6795_v9  ;;  %v1291_v9 = vsub.f32 %v6832_v32, %v6863_v54 }
  0x6c   :  { %8751 = vst [vmem:[#allocation95_spill] sm:$0xff] %v6849_v30  ;;  %1242 = vmatpush.msrb.mxu0 %v6782_v11  ;;  %1342 = vmatpush.msrb.mxu3 %v6782_v11  ;;  %v6910_v7 = vand.u32 4294901760, %v1458_v42  ;;  %v107_v42 = vld [vmem:[#allocation5 + $0x1c0] sm:$0xff] }
  0x6d   :  { %8752 = vst [vmem:[#allocation96_spill] sm:$0xff] %v6851_v63  ;;  %1163 = vmatpush.msra.mxu1 %v6695_v12  ;;  %1316 = vmatpush.msrb.mxu2 %v6804_v0  ;;  %v6893_v12 = vand.u32 4294901760, %v6866_v55  ;;  %v6904_v0 = vand.u32 4294901760, %v6880_v62 }
  0x6e   :  { %8753 = vst [vmem:[#allocation97_spill] sm:$0xff] %v6860_v56  ;;  %1244 = vmatpush.msrb.mxu0 %v6788_v29  ;;  %1344 = vmatpush.msrb.mxu3 %v6788_v29 }
  0x6f   :  { %8754 = vst [vmem:[#allocation98_spill] sm:$0xff] %v6863_v54  ;;  %1167 = vmatmul.f32.vlgmr.msra.gmra.mxu1 %v6398_v31  ;;  %1319 = vmatpush.msrb.mxu2 %v6818_v2  ;;  %v1470_v2 = vsub.f32 %v6866_v55, %v6893_v12 }
  0x70   :  { %8755 = vst [vmem:[#allocation99_spill] sm:$0xff] %v6866_v55  ;;  %1275 = vmatpush.msrb.mxu1 %v6870_v61  ;;  %1246 = vmatpush.msrb.mxu0 %v6797_v6 }
  0x71   :  { %8756 = vst [vmem:[#allocation100_spill] sm:$0xff] %v6870_v61  ;;  %1346 = vmatpush.msrb.mxu3 %v6797_v6  ;;  %1322 = vmatpush.msrb.mxu2 %v6832_v32  ;;  %v6912_v61 = vand.u32 4294901760, %v1291_v9  ;;  %v1476_v32 = vsub.f32 %v6880_v62, %v6904_v0  ;;  %v6928_v9 = vand.u32 4294901760, %v1470_v2  ;;  %v91_v2 = vld [vmem:[#allocation5 + $0x140] sm:$0xff] }
  0x72   :  { %8757 = vst [vmem:[#allocation101_spill] sm:$0xff] %v6877_v10  ;;  %1281 = vmatpush.msrb.mxu1 %v6884_v41  ;;  %1248 = vmatpush.msrb.mxu0 %v6808_v50 }
  0x73   :  { %8758 = vst [vmem:[#allocation102_spill] sm:$0xff] %v6880_v62  ;;  %1348 = vmatpush.msrb.mxu3 %v6808_v50  ;;  %1254 = vmatmul.f32.vlgmr.msrb.gmra.mxu0 %v6430_v43 }
  0x74   :  { %8759 = vst [vmem:[#allocation103_spill] sm:$0xff] %v6884_v41  ;;  %1287 = vmatpush.msrb.mxu1 %v6897_v60  ;;  %1325 = vmatmul.f32.vlgmr.msrb.gmra.mxu2 %v6373_v23  ;;  %v6920_v41 = vand.u32 4294901760, %v1464_v45  ;;  %v6934_v45 = vand.u32 4294901760, %v1476_v32 }
  0x75   :  { %8760 = vst [vmem:[#allocation104_spill] sm:$0xff] %v6893_v12  ;;  %1352 = vmatmul.f32.vlgmr.msrb.gmra.mxu3 %v6398_v31  ;;  %1427 = vmatpush.msra.mxu2 %v6810_v36 }
  0x76   :  { %8761 = vst [vmem:[#allocation105_spill] sm:$0xff] %v6897_v60  ;;  %1371 = vmatpush.msra.mxu0 %v6815_v1  ;;  %1460 = vmatpush.msra.mxu3 %v6910_v7  ;;  %v99_v60 = vld [vmem:[#allocation5 + $0x180] sm:$0xff] }
  0x77   :  { %8762 = vst [vmem:[#allocation106_spill] sm:$0xff] %v6904_v0  ;;  %1293 = vmatpush.msrb.mxu1 %v6912_v61  ;;  %1429 = vmatpush.msra.mxu2 %v6822_v53 }
  0x78   :  { %8763 = vst [vmem:[#allocation107_spill] sm:$0xff] %v6910_v7  ;;  %1375 = vmatpush.msra.mxu0 %v6827_v59  ;;  %1466 = vmatpush.msra.mxu3 %v6920_v41  ;;  %v6938_v7 = vand.u32 4294901760, %v107_v42  ;;  %v108_v59 = vld [vmem:[#allocation5 + $0x1c8] sm:$0xff] }
  0x79   :  { %8764 = vst [vmem:[#allocation108_spill] sm:$0xff] %v6912_v61  ;;  %1295 = vmatmul.f32.vlgmr.msrb.gmra.mxu1 %v6353_v16  ;;  %1431 = vmatpush.msra.mxu2 %v6837_v40  ;;  %v6966_v61 = vand.u32 4294901760, %v108_v59 }
  0x7a   :  { %8765 = vst [vmem:[#allocation109_spill] sm:$0xff] %v6920_v41  ;;  %1402 = vmatpush.msra.mxu1 %v6782_v11  ;;  %1379 = vmatpush.msra.mxu0 %v6844_v58  ;;  %v6944_v41 = vand.u32 4294901760, %v99_v60  ;;  %v6951_v32 = vsub.f32 %v107_v42, %v6938_v7  ;;  %v6953_v58 = vand.u32 4294901760, %v91_v2 }
  0x7b   :  { %8766 = vst [vmem:[#allocation110_spill] sm:$0xff] %v6928_v9  ;;  %1472 = vmatpush.msra.mxu3 %v6928_v9  ;;  %1433 = vmatpush.msra.mxu2 %v6851_v63  ;;  %v83_v9 = vld [vmem:[#allocation5 + $0x100] sm:$0xff] }
  0x7c   :  { %8767 = vst [vmem:[#allocation111_spill] sm:$0xff] %v6934_v45  ;;  %1404 = vmatpush.msra.mxu1 %v6788_v29  ;;  %1383 = vmatpush.msra.mxu0 %v6863_v54  ;;  %v100_v54 = vld [vmem:[#allocation5 + $0x188] sm:$0xff]  ;;  %v6964_v42 = vand.u32 4294901760, %v83_v9 }
  0x7d   :  { %8768 = vst [vmem:[#allocation112_spill] sm:$0xff] %v6938_v7  ;;  %1478 = vmatpush.msra.mxu3 %v6934_v45  ;;  %1385 = vmatmul.f32.vlgmr.msra.gmra.mxu0 %v6353_v16  ;;  %v6960_v45 = vsub.f32 %v99_v60, %v6944_v41  ;;  %v92_v60 = vld [vmem:[#allocation5 + $0x148] sm:$0xff]  ;;  %v6978_v1 = vand.u32 4294901760, %v100_v54 }
  0x7e   :  { %8769 = vst [vmem:[#allocation113_spill] sm:$0xff] %v6944_v41  ;;  %1406 = vmatpush.msra.mxu1 %v6797_v6  ;;  %1439 = vmatmul.f32.vlgmr.msra.gmra.mxu2 %v6430_v43  ;;  %v6993_v6 = vand.u32 4294901760, %v92_v60 }
  0x7f   :  { %8770 = vst [vmem:[#allocation114_spill] sm:$0xff] %v6951_v32  ;;  %1480 = vmatmul.f32.vlgmr.msra.gmra.mxu3 %v6353_v16  ;;  %1556 = vmatpush.msrb.mxu2 %v6860_v56  ;;  %v6971_v56 = vand.u32 4294901760, %v6951_v32 }
  0x80   :  { %8771 = vst [vmem:[#allocation115_spill] sm:$0xff] %v6953_v58  ;;  %1498 = vmatpush.msrb.mxu0 %v6835_v39  ;;  %1587 = vmatpush.msrb.mxu3 %v6810_v36  ;;  %v6974_v39 = vsub.f32 %v91_v2, %v6953_v58  ;;  %v6988_v2 = vsub.f32 %v83_v9, %v6964_v42 }
  0x81   :  { %8772 = vst [vmem:[#allocation116_spill] sm:$0xff] %v6960_v45  ;;  %1408 = vmatpush.msra.mxu1 %v6808_v50  ;;  %1560 = vmatpush.msrb.mxu2 %v6877_v10  ;;  %v6983_v10 = vand.u32 4294901760, %v6960_v45  ;;  %v6991_v50 = vsub.f32 %v108_v59, %v6966_v61  ;;  %v7005_v9 = vsub.f32 %v100_v54, %v6978_v1 }
  0x82   :  { %8773 = vst [vmem:[#allocation117_spill] sm:$0xff] %v6964_v42  ;;  %1501 = vmatpush.msrb.mxu0 %v6849_v30  ;;  %1589 = vmatpush.msrb.mxu3 %v6822_v53  ;;  %v84_v30 = vld [vmem:[#allocation5 + $0x108] sm:$0xff]  ;;  %v7022_v54 = vsub.f32 %v92_v60, %v6993_v6 }
  0x83   :  { %8774 = vst [vmem:[#allocation118_spill] sm:$0xff] %v6966_v61  ;;  %1410 = vmatmul.f32.vlgmr.msra.gmra.mxu1 %v6353_v16  ;;  %1564 = vmatpush.msrb.mxu2 %v6893_v12  ;;  %v1643_v12 = vsub.f32 %v6951_v32, %v6971_v56  ;;  %v7007_v59 = vand.u32 4294901760, %v84_v30  ;;  %v7033_v29 = vand.u32 4294901760, %v7005_v9 }
  0x84   :  { %8775 = vst [vmem:[#allocation119_spill] sm:$0xff] %v6971_v56  ;;  %1527 = vmatpush.msrb.mxu1 %v6810_v36  ;;  %1504 = vmatpush.msrb.mxu0 %v6866_v55  ;;  %v7000_v36 = vand.u32 4294901760, %v6974_v39  ;;  %v7019_v55 = vand.u32 4294901760, %v6988_v2 }
  0x85   :  { %8776 = vst [vmem:[#allocation120_spill] sm:$0xff] %v6974_v39  ;;  %1591 = vmatpush.msrb.mxu3 %v6837_v40  ;;  %1568 = vmatpush.msrb.mxu2 %v6904_v0  ;;  %v1649_v0 = vsub.f32 %v6960_v45, %v6983_v10  ;;  %v7036_v11 = vsub.f32 %v84_v30, %v7007_v59 }
  0x86   :  { %8777 = vst [vmem:[#allocation121_spill] sm:$0xff] %v6978_v1  ;;  %1529 = vmatpush.msrb.mxu1 %v6822_v53  ;;  %1507 = vmatpush.msrb.mxu0 %v6880_v62  ;;  %v7016_v62 = vand.u32 4294901760, %v6991_v50  ;;  %v1655_v53 = vsub.f32 %v6974_v39, %v7000_v36 }
  0x87   :  { %8778 = vst [vmem:[#allocation122_spill] sm:$0xff] %v6983_v10  ;;  %1593 = vmatpush.msrb.mxu3 %v6851_v63  ;;  %1510 = vmatmul.f32.vlgmr.msrb.gmra.mxu0 %v6373_v23  ;;  %v7040_v60 = vand.u32 4294901760, %v1649_v0  ;;  %v1834_v0 = vsub.f32 %v7005_v9, %v7033_v29 }
  0x88   :  { %8779 = vst [vmem:[#allocation123_spill] sm:$0xff] %v6988_v2  ;;  %1531 = vmatpush.msrb.mxu1 %v6837_v40  ;;  %1570 = vmatmul.f32.vlgmr.msrb.gmra.mxu2 %v6353_v16  ;;  %v7026_v40 = vand.u32 4294901760, %v1643_v12  ;;  %v1828_v12 = vsub.f32 %v6991_v50, %v7016_v62  ;;  %v7053_v30 = vand.u32 4294901760, %v1655_v53 }
  0x89   :  { %8780 = vst [vmem:[#allocation124_spill] sm:$0xff] %v6991_v50  ;;  %1595 = vmatmul.f32.vlgmr.msrb.gmra.mxu3 %v6353_v16  ;;  %1683 = vmatpush.msra.mxu2 %v6951_v32  ;;  %v1661_v32 = vsub.f32 %v6988_v2, %v7019_v55 }
  0x8a   :  { %8781 = vst [vmem:[#allocation125_spill] sm:$0xff] %v6993_v6  ;;  %1612 = vmatpush.msra.mxu0 %v6938_v7  ;;  %1712 = vmatpush.msra.mxu3 %v6938_v7  ;;  %v7066_v53 = vand.u32 4294901760, %v1828_v12  ;;  %v109_v12 = vld [vmem:[#allocation5 + $0x1d0] sm:$0xff] }
  0x8b   :  { %8782 = vst [vmem:[#allocation126_spill] sm:$0xff] %v7000_v36  ;;  %1533 = vmatpush.msrb.mxu1 %v6851_v63  ;;  %1686 = vmatpush.msra.mxu2 %v6960_v45  ;;  %v7049_v63 = vand.u32 4294901760, %v7022_v54  ;;  %v7060_v45 = vand.u32 4294901760, %v7036_v11 }
  0x8c   :  { %8783 = vst [vmem:[#allocation127_spill] sm:$0xff] %v7005_v9  ;;  %1614 = vmatpush.msra.mxu0 %v6944_v41  ;;  %1714 = vmatpush.msra.mxu3 %v6944_v41 }
  0x8d   :  { %8784 = vst [vmem:[#allocation128_spill] sm:$0xff] %v7007_v59  ;;  %1537 = vmatmul.f32.vlgmr.msrb.gmra.mxu1 %v6398_v31  ;;  %1689 = vmatpush.msra.mxu2 %v6974_v39  ;;  %v1840_v39 = vsub.f32 %v7022_v54, %v7049_v63 }
  0x8e   :  { %8785 = vst [vmem:[#allocation129_spill] sm:$0xff] %v7016_v62  ;;  %1645 = vmatpush.msra.mxu1 %v7026_v40  ;;  %1616 = vmatpush.msra.mxu0 %v6953_v58 }
  0x8f   :  { %8786 = vst [vmem:[#allocation130_spill] sm:$0xff] %v7019_v55  ;;  %1716 = vmatpush.msra.mxu3 %v6953_v58  ;;  %1692 = vmatpush.msra.mxu2 %v6988_v2  ;;  %v1846_v2 = vsub.f32 %v7036_v11, %v7060_v45 }
  0x90   :  { %8787 = vst [vmem:[#allocation131_spill] sm:$0xff] %v7022_v54  ;;  %1651 = vmatpush.msra.mxu1 %v7040_v60  ;;  %1618 = vmatpush.msra.mxu0 %v6964_v42 }
  0x91   :  { %8788 = vst [vmem:[#allocation132_spill] sm:$0xff] %v7026_v40  ;;  %1718 = vmatpush.msra.mxu3 %v6964_v42  ;;  %v7068_v40 = vand.u32 4294901760, %v1661_v32  ;;  %1624 = vmatmul.f32.vlgmr.msra.gmra.mxu0 %v6430_v43  ;;  %v7084_v32 = vand.u32 4294901760, %v1840_v39  ;;  %v93_v39 = vld [vmem:[#allocation5 + $0x150] sm:$0xff] }
  0x92   :  { %8789 = vst [vmem:[#allocation133_spill] sm:$0xff] %v7033_v29  ;;  %1657 = vmatpush.msra.mxu1 %v7053_v30  ;;  %1695 = vmatmul.f32.vlgmr.msra.gmra.mxu2 %v6373_v23 }
  0x93   :  { %8790 = vst [vmem:[#allocation134_spill] sm:$0xff] %v7036_v11  ;;  %1722 = vmatmul.f32.vlgmr.msra.gmra.mxu3 %v6398_v31  ;;  %1797 = vmatpush.msrb.mxu2 %v6966_v61 }
  0x94   :  { %8791 = vst [vmem:[#allocation135_spill] sm:$0xff] %v7040_v60  ;;  %v7076_v60 = vand.u32 4294901760, %v1834_v0  ;;  %1741 = vmatpush.msrb.mxu0 %v6971_v56  ;;  %1830 = vmatpush.msrb.mxu3 %v7066_v53  ;;  %v7090_v0 = vand.u32 4294901760, %v1846_v2 }
  0x95   :  { %8792 = vst [vmem:[#allocation136_spill] sm:$0xff] %v7049_v63  ;;  %1663 = vmatpush.msra.mxu1 %v7068_v40  ;;  %1799 = vmatpush.msrb.mxu2 %v6978_v1 }
  0x96   :  { %8793 = vst [vmem:[#allocation137_spill] sm:$0xff] %v7053_v30  ;;  %1745 = vmatpush.msrb.mxu0 %v6983_v10  ;;  %1836 = vmatpush.msrb.mxu3 %v7076_v60  ;;  %v101_v30 = vld [vmem:[#allocation5 + $0x190] sm:$0xff] }
  0x97   :  { %8794 = vst [vmem:[#allocation138_spill] sm:$0xff] %v7060_v45  ;;  %1665 = vmatmul.f32.vlgmr.msra.gmra.mxu1 %v6353_v16  ;;  %1801 = vmatpush.msrb.mxu2 %v6993_v6  ;;  %v7102_v2 = vand.u32 4294901760, %v101_v30 }
  0x98   :  { %8795 = vst [vmem:[#allocation139_spill] sm:$0xff] %v7066_v53  ;;  %1772 = vmatpush.msrb.mxu1 %v6938_v7  ;;  %v7094_v53 = vand.u32 4294901760, %v109_v12  ;;  %1749 = vmatpush.msrb.mxu0 %v7000_v36 }
  0x99   :  { %8796 = vst [vmem:[#allocation140_spill] sm:$0xff] %v7068_v40  ;;  %1842 = vmatpush.msrb.mxu3 %v7084_v32  ;;  %v7098_v40 = vpop.f32.mrf.mxu0  ;;  %1803 = vmatpush.msrb.mxu2 %v7007_v59 }
  0x9a   :  { %8797 = vst [vmem:[#allocation141_spill] sm:$0xff] %v7076_v60  ;;  %1774 = vmatpush.msrb.mxu1 %v6944_v41  ;;  %1753 = vmatpush.msrb.mxu0 %v7019_v55  ;;  %v7109_v36 = vsub.f32 %v109_v12, %v7094_v53  ;;  %v110_v60 = vld [vmem:[#allocation5 + $0x1d8] sm:$0xff] }
  0x9b   :  { %8798 = vst [vmem:[#allocation142_spill] sm:$0xff] %v7084_v32  ;;  %1848 = vmatpush.msrb.mxu3 %v7090_v0  ;;  %1755 = vmatmul.f32.vlgmr.msrb.gmra.mxu0 %v6353_v16  ;;  %v7111_v32 = vand.u32 4294901760, %v93_v39  ;;  %v102_v55 = vld [vmem:[#allocation5 + $0x198] sm:$0xff]  ;;  %v7126_v56 = vand.u32 4294901760, %v110_v60 }
  0x9c   :  { %8799 = vst [vmem:[#allocation143_spill] sm:$0xff] %v7090_v0  ;;  %1776 = vmatpush.msrb.mxu1 %v6953_v58  ;;  %1809 = vmatmul.f32.vlgmr.msrb.gmra.mxu2 %v6430_v43  ;;  %v7118_v0 = vsub.f32 %v101_v30, %v7102_v2  ;;  %v7120_v10 = vpop.f32.mrf.mxu1  ;;  %v7138_v58 = vpop.f32.mrf.mxu3 }
  0x9d   :  { %8800 = vst [vmem:[#allocation144_spill] sm:$0xff] %v7094_v53  ;;  %1850 = vmatmul.f32.vlgmr.msrb.gmra.mxu3 %v6353_v16  ;;  %1926 = vmatpush.msra.mxu2 %v7016_v62  ;;  %v7134_v30 = vsub.f32 %v93_v39, %v7111_v32  ;;  %v94_v62 = vld [vmem:[#allocation5 + $0x158] sm:$0xff] }
  0x9e   :  { %8801 = vst [vmem:[#allocation145_spill] sm:$0xff] %v7098_v40  ;;  %v85_v40 = vld [vmem:[#allocation5 + $0x110] sm:$0xff]  ;;  %1868 = vmatpush.msra.mxu0 %v6991_v50  ;;  %1957 = vmatpush.msra.mxu3 %v6966_v61  ;;  %v7131_v50 = vand.u32 4294901760, %v7109_v36  ;;  %v86_v39 = vld [vmem:[#allocation5 + $0x118] sm:$0xff] }
  0x9f   :  { %8802 = vst [vmem:[#allocation146_spill] sm:$0xff] %v7102_v2  ;;  %1778 = vmatpush.msrb.mxu1 %v6964_v42  ;;  %v7124_v12 = vand.u32 4294901760, %v85_v40  ;;  %1930 = vmatpush.msra.mxu2 %v7033_v29  ;;  %v7142_v42 = vand.u32 4294901760, %v102_v55  ;;  %v7157_v29 = vand.u32 4294901760, %v94_v62 }
  0xa0   :  { %8803 = vst [vmem:[#allocation147_spill] sm:$0xff] %v7109_v36  ;;  %1871 = vmatpush.msra.mxu0 %v7005_v9  ;;  %1959 = vmatpush.msra.mxu3 %v6978_v1  ;;  %v7147_v9 = vand.u32 4294901760, %v7118_v0 }
  0xa1   :  { %8804 = vst [vmem:[#allocation148_spill] sm:$0xff] %v7111_v32  ;;  %1780 = vmatmul.f32.vlgmr.msrb.gmra.mxu1 %v6353_v16  ;;  %1934 = vmatpush.msra.mxu2 %v7049_v63  ;;  %v7159_v41 = vpop.f32.mrf.mxu0  ;;  %v2013_v63 = vsub.f32 %v7109_v36, %v7131_v50 }
  0xa2   :  { %8805 = vst [vmem:[#allocation149_spill] sm:$0xff] %v7118_v0  ;;  %1897 = vmatpush.msra.mxu1 %v6966_v61  ;;  %1874 = vmatpush.msra.mxu0 %v7022_v54  ;;  %v7166_v54 = vand.u32 4294901760, %v7134_v30 }
  0xa3   :  { %8806 = vst [vmem:[#allocation150_spill] sm:$0xff] %v7120_v10  ;;  %v7136_v10 = vpop.f32.mrf.mxu2  ;;  %1961 = vmatpush.msra.mxu3 %v6993_v6  ;;  %1938 = vmatpush.msra.mxu2 %v7060_v45 }
  0xa4   :  { %8807 = vst [vmem:[#allocation151_spill] sm:$0xff] %v7124_v12  ;;  %1899 = vmatpush.msra.mxu1 %v6978_v1  ;;  %1877 = vmatpush.msra.mxu0 %v7036_v11  ;;  %v2025_v1 = vsub.f32 %v7134_v30, %v7166_v54 }
  0xa5   :  { %8808 = vst [vmem:[#allocation152_spill] sm:$0xff] %v7126_v56  ;;  %1963 = vmatpush.msra.mxu3 %v7007_v59  ;;  %1880 = vmatmul.f32.vlgmr.msra.gmra.mxu0 %v6373_v23 }
  0xa6   :  { %8809 = vst [vmem:[#allocation153_spill] sm:$0xff] %v7131_v50  ;;  %1901 = vmatpush.msra.mxu1 %v6993_v6  ;;  %1940 = vmatmul.f32.vlgmr.msra.gmra.mxu2 %v6353_v16  ;;  %v7192_v6 = vand.u32 4294901760, %v2013_v63  ;;  %v7196_v61 = vpop.f32.mrf.mxu1 }
  0xa7   :  { %8810 = vst [vmem:[#allocation154_spill] sm:$0xff] %v7134_v30  ;;  %1965 = vmatmul.f32.vlgmr.msra.gmra.mxu3 %v6353_v16  ;;  %2053 = vmatpush.msrb.mxu2 %v7109_v36 }
  0xa8   :  { %8811 = vst [vmem:[#allocation155_spill] sm:$0xff] %v7136_v10  ;;  %v7155_v10 = vsub.f32 %v110_v60, %v7126_v56  ;;  %v7173_v60 = vand.u32 4294901760, %v86_v39  ;;  %1982 = vmatpush.msrb.mxu0 %v7094_v53  ;;  %2082 = vmatpush.msrb.mxu3 %v7094_v53  ;;  %v7212_v52 = vpop.f32.mrf.mxu3 }
  0xa9   :  { %8812 = vst [vmem:[#allocation156_spill] sm:$0xff] %v7138_v58  ;;  %v7152_v58 = vsub.f32 %v85_v40, %v7124_v12  ;;  %v7171_v40 = vsub.f32 %v102_v55, %v7142_v42  ;;  %v7188_v55 = vsub.f32 %v94_v62, %v7157_v29  ;;  %1903 = vmatpush.msra.mxu1 %v7007_v59 }
  0xaa   :  { %8813 = vst [vmem:[#allocation157_spill] sm:$0xff] %v7142_v42  ;;  %v7182_v11 = vand.u32 4294901760, %v7155_v10  ;;  %v7204_v62 = vsub.f32 %v86_v39, %v7173_v60  ;;  %2056 = vmatpush.msrb.mxu2 %v7118_v0  ;;  %1984 = vmatpush.msrb.mxu0 %v7102_v2  ;;  %v7234_v59 = vpop.f32.mrf.mxu0 }
  0xab   :  { %8814 = vst [vmem:[#allocation158_spill] sm:$0xff] %v7147_v9  ;;  %v7185_v45 = vand.u32 4294901760, %v7152_v58  ;;  %v7201_v7 = vand.u32 4294901760, %v7171_v40  ;;  %v7210_v36 = vpop.f32.mrf.mxu2  ;;  %2084 = vmatpush.msrb.mxu3 %v7102_v2  ;;  %1907 = vmatmul.f32.vlgmr.msra.gmra.mxu1 %v6398_v31 }
  0xac   :  { %8815 = vst [vmem:[#allocation159_spill] sm:$0xff] %v7152_v58  ;;  %2015 = vmatpush.msrb.mxu1 %v7192_v6  ;;  %2059 = vmatpush.msrb.mxu2 %v7134_v30 }
  0xad   :  { %8816 = vst [vmem:[#allocation160_spill] sm:$0xff] %v7155_v10  ;;  %v2031_v39 = vsub.f32 %v7152_v58, %v7185_v45  ;;  %1986 = vmatpush.msrb.mxu0 %v7111_v32  ;;  %2086 = vmatpush.msrb.mxu3 %v7111_v32 }
  0xae   :  { %8817 = vst [vmem:[#allocation161_spill] sm:$0xff] %v7157_v29  ;;  %2062 = vmatpush.msrb.mxu2 %v7152_v58 }
  0xaf   :  { %8818 = vst [vmem:[#allocation162_spill] sm:$0xff] %v7159_v41  ;;  %v2019_v41 = vsub.f32 %v7118_v0, %v7147_v9  ;;  %v7221_v0 = vand.u32 4294901760, %v7188_v55  ;;  %1988 = vmatpush.msrb.mxu0 %v7124_v12  ;;  %2088 = vmatpush.msrb.mxu3 %v7124_v12 }
  0xb0   :  { %8819 = vst [vmem:[#allocation163_spill] sm:$0xff] %v7166_v54  ;;  %1994 = vmatmul.f32.vlgmr.msrb.gmra.mxu0 %v6430_v43  ;;  %2065 = vmatmul.f32.vlgmr.msrb.gmra.mxu2 %v6373_v23 }
  0xb1   :  { %8820 = vst [vmem:[#allocation164_spill] sm:$0xff] %v7171_v40  ;;  %v7208_v63 = vand.u32 4294901760, %v2019_v41  ;;  %v7225_v41 = vand.u32 4294901760, %v2025_v1  ;;  %v2210_v30 = vsub.f32 %v7188_v55, %v7221_v0  ;;  %2092 = vmatmul.f32.vlgmr.msrb.gmra.mxu3 %v6398_v31  ;;  %2167 = vmatpush.msra.mxu2 %v7126_v56 }
  0xb2   :  { %8821 = vst [vmem:[#allocation165_spill] sm:$0xff] %v7173_v60  ;;  %2111 = vmatpush.msra.mxu0 %v7131_v50  ;;  %v7266_v58 = vpop.f32.mrf.mxu3 }
  0xb3   :  { %8822 = vst [vmem:[#allocation166_spill] sm:$0xff] %v7182_v11  ;;  %2021 = vmatpush.msrb.mxu1 %v7208_v63  ;;  %2169 = vmatpush.msra.mxu2 %v7142_v42 }
  0xb4   :  { %8823 = vst [vmem:[#allocation167_spill] sm:$0xff] %v7185_v45  ;;  %2115 = vmatpush.msra.mxu0 %v7147_v9  ;;  %v7278_v9 = vpop.f32.mrf.mxu0 }
  0xb5   :  { %8824 = vst [vmem:[#allocation168_spill] sm:$0xff] %v7188_v55  ;;  %2027 = vmatpush.msrb.mxu1 %v7225_v41  ;;  %2171 = vmatpush.msra.mxu2 %v7157_v29 }
  0xb6   :  { %8825 = vst [vmem:[#allocation169_spill] sm:$0xff] %v7192_v6  ;;  %v7242_v6 = vand.u32 4294901760, %v2031_v39  ;;  %v7260_v39 = vand.u32 4294901760, %v2210_v30  ;;  %2119 = vmatpush.msra.mxu0 %v7166_v54  ;;  %v112_v54 = vld [vmem:[#allocation5 + $0x1e8] sm:$0xff] }
  0xb7   :  { %8826 = vst [vmem:[#allocation170_spill] sm:$0xff] %v7196_v61  ;;  %v2198_v61 = vsub.f32 %v7155_v10, %v7182_v11  ;;  %2173 = vmatpush.msra.mxu2 %v7173_v60 }
  0xb8   :  { %8827 = vst [vmem:[#allocation171_spill] sm:$0xff] %v7201_v7  ;;  %2033 = vmatpush.msrb.mxu1 %v7242_v6  ;;  %2123 = vmatpush.msra.mxu0 %v7185_v45  ;;  %v104_v45 = vld [vmem:[#allocation5 + $0x1a8] sm:$0xff] }
  0xb9   :  { %8828 = vst [vmem:[#allocation172_spill] sm:$0xff] %v7204_v62  ;;  %v7240_v1 = vand.u32 4294901760, %v2198_v61  ;;  %v7256_v61 = vpop.f32.mrf.mxu1  ;;  %2035 = vmatmul.f32.vlgmr.msrb.gmra.mxu1 %v6353_v16  ;;  %2125 = vmatmul.f32.vlgmr.msra.gmra.mxu0 %v6353_v16 }
  0xba   :  { %8829 = vst [vmem:[#allocation173_spill] sm:$0xff] %v7208_v63  ;;  %2142 = vmatpush.msra.mxu1 %v7094_v53  ;;  %2179 = vmatmul.f32.vlgmr.msra.gmra.mxu2 %v6430_v43 }
  0xbb   :  { %8830 = vst [vmem:[#allocation174_spill] sm:$0xff] %v7210_v36  ;;  %v7232_v36 = vand.u32 4294901760, %v7204_v62  ;;  %2200 = vmatpush.msra.mxu3 %v7240_v1  ;;  %2296 = vmatpush.msrb.mxu2 %v7182_v11  ;;  %v96_v11 = vld [vmem:[#allocation5 + $0x168] sm:$0xff] }
  0xbc   :  { %8831 = vst [vmem:[#allocation175_spill] sm:$0xff] %v7212_v52  ;;  %v2204_v52 = vsub.f32 %v7171_v40, %v7201_v7  ;;  %2144 = vmatpush.msra.mxu1 %v7102_v2  ;;  %2238 = vmatpush.msrb.mxu0 %v7155_v10  ;;  %v7318_v50 = vpop.f32.mrf.mxu3 }
  0xbd   :  { %8832 = vst [vmem:[#allocation176_spill] sm:$0xff] %v7221_v0  ;;  %v2216_v63 = vsub.f32 %v7204_v62, %v7232_v36  ;;  %2300 = vmatpush.msrb.mxu2 %v7201_v7  ;;  %v7337_v7 = vand.u32 4294901760, %v96_v11 }
  0xbe   :  { %8833 = vst [vmem:[#allocation177_spill] sm:$0xff] %v7225_v41  ;;  %v111_v41 = vld [vmem:[#allocation5 + $0x1e0] sm:$0xff]  ;;  %2146 = vmatpush.msra.mxu1 %v7111_v32  ;;  %2241 = vmatpush.msrb.mxu0 %v7171_v40  ;;  %v7339_v32 = vpop.f32.mrf.mxu0 }
  0xbf   :  { %8834 = vst [vmem:[#allocation178_spill] sm:$0xff] %v7232_v36  ;;  %v7274_v30 = vand.u32 4294901760, %v111_v41  ;;  %2304 = vmatpush.msrb.mxu2 %v7221_v0 }
  0xc0   :  { %8835 = vst [vmem:[#allocation179_spill] sm:$0xff] %v7234_v59  ;;  %v7250_v59 = vand.u32 4294901760, %v2204_v52  ;;  %v7264_v52 = vpop.f32.mrf.mxu2  ;;  %2148 = vmatpush.msra.mxu1 %v7124_v12  ;;  %v7322_v12 = vand.u32 4294901760, %v104_v45  ;;  %2244 = vmatpush.msrb.mxu0 %v7188_v55 }
  0xc1   :  { %8836 = vst [vmem:[#allocation180_spill] sm:$0xff] %v7240_v1  ;;  %v103_v1 = vld [vmem:[#allocation5 + $0x1a0] sm:$0xff]  ;;  %2150 = vmatmul.f32.vlgmr.msra.gmra.mxu1 %v6353_v16  ;;  %2308 = vmatpush.msrb.mxu2 %v7232_v36 }
  0xc2   :  { %8837 = vst [vmem:[#allocation181_spill] sm:$0xff] %v7242_v6  ;;  %2206 = vmatpush.msra.mxu3 %v7250_v59  ;;  %v7306_v6 = vand.u32 4294901760, %v112_v54  ;;  %2267 = vmatpush.msrb.mxu1 %v7126_v56 }
  0xc3   :  { %8838 = vst [vmem:[#allocation182_spill] sm:$0xff] %v7250_v59  ;;  %v7300_v59 = vpop.f32.mrf.mxu1  ;;  %2247 = vmatpush.msrb.mxu0 %v7204_v62  ;;  %2310 = vmatmul.f32.vlgmr.msrb.gmra.mxu2 %v6353_v16 }
  0xc4   :  { %8839 = vst [vmem:[#allocation183_spill] sm:$0xff] %v7256_v61  ;;  %v7270_v61 = vand.u32 4294901760, %v2216_v63  ;;  %2212 = vmatpush.msra.mxu3 %v7260_v39  ;;  %v7282_v63 = vand.u32 4294901760, %v103_v1  ;;  %2269 = vmatpush.msrb.mxu1 %v7142_v42 }
  0xc5   :  { %8840 = vst [vmem:[#allocation184_spill] sm:$0xff] %v7260_v39  ;;  %2250 = vmatmul.f32.vlgmr.msrb.gmra.mxu0 %v6373_v23 }
  0xc6   :  { %8841 = vst [vmem:[#allocation185_spill] sm:$0xff] %v7264_v52  ;;  %v95_v52 = vld [vmem:[#allocation5 + $0x160] sm:$0xff]  ;;  %2218 = vmatpush.msra.mxu3 %v7270_v61  ;;  %2271 = vmatpush.msrb.mxu1 %v7157_v29  ;;  %v7392_v53 = vpop.f32.mrf.mxu3 }
  0xc7   :  { %8842 = vst [vmem:[#allocation186_spill] sm:$0xff] %v7266_v58  ;;  %v7289_v58 = vsub.f32 %v111_v41, %v7274_v30  ;;  %v7291_v39 = vand.u32 4294901760, %v95_v52  ;;  %2220 = vmatmul.f32.vlgmr.msra.gmra.mxu3 %v6353_v16  ;;  %2352 = vmatpush.msra.mxu0 %v7274_v30 }
  0xc8   :  { %8843 = vst [vmem:[#allocation187_spill] sm:$0xff] %v7270_v61  ;;  %v7298_v61 = vsub.f32 %v103_v1, %v7282_v63  ;;  %2327 = vmatpush.msrb.mxu3 %v7126_v56  ;;  %2273 = vmatpush.msrb.mxu1 %v7173_v60 }
  0xc9   :  { %8844 = vst [vmem:[#allocation188_spill] sm:$0xff] %v7274_v30  ;;  %v7311_v10 = vand.u32 4294901760, %v7289_v58  ;;  %v7314_v1 = vsub.f32 %v95_v52, %v7291_v39  ;;  %v88_v52 = vld [vmem:[#allocation5 + $0x128] sm:$0xff]  ;;  %2423 = vmatpush.msra.mxu2 %v7289_v58  ;;  %2354 = vmatpush.msra.mxu0 %v7282_v63 }
  0xca   :  { %8845 = vst [vmem:[#allocation189_spill] sm:$0xff] %v7278_v9  ;;  %v87_v9 = vld [vmem:[#allocation5 + $0x120] sm:$0xff]  ;;  %2329 = vmatpush.msrb.mxu3 %v7142_v42  ;;  %v7327_v40 = vand.u32 4294901760, %v7298_v61  ;;  %2277 = vmatmul.f32.vlgmr.msrb.gmra.mxu1 %v6398_v31 }
  0xcb   :  { %8846 = vst [vmem:[#allocation190_spill] sm:$0xff] %v7282_v63  ;;  %v7304_v41 = vand.u32 4294901760, %v87_v9  ;;  %v2383_v0 = vsub.f32 %v7289_v58, %v7311_v10  ;;  %v7346_v55 = vand.u32 4294901760, %v7314_v1  ;;  %v7376_v56 = vpop.f32.mrf.mxu1  ;;  %2426 = vmatpush.msra.mxu2 %v7298_v61  ;;  %2356 = vmatpush.msra.mxu0 %v7291_v39 }
  0xcc   :  { %8847 = vst [vmem:[#allocation191_spill] sm:$0xff] %v7289_v58  ;;  %2331 = vmatpush.msrb.mxu3 %v7157_v29 }
  0xcd   :  { %8848 = vst [vmem:[#allocation192_spill] sm:$0xff] %v7291_v39  ;;  %v7372_v29 = vand.u32 4294901760, %v2383_v0  ;;  %v2395_v42 = vsub.f32 %v7314_v1, %v7346_v55  ;;  %2429 = vmatpush.msra.mxu2 %v7314_v1  ;;  %2358 = vmatpush.msra.mxu0 %v7304_v41 }
  0xce   :  { %8849 = vst [vmem:[#allocation193_spill] sm:$0xff] %v7298_v61  ;;  %2333 = vmatpush.msrb.mxu3 %v7173_v60  ;;  %v7414_v60 = vpop.f32.mrf.mxu0  ;;  %2364 = vmatmul.f32.vlgmr.msra.gmra.mxu0 %v6430_v43 }
  0xcf   :  { %8850 = vst [vmem:[#allocation194_spill] sm:$0xff] %v7300_v59  ;;  %v7316_v59 = vpop.f32.mrf.mxu2  ;;  %2335 = vmatmul.f32.vlgmr.msrb.gmra.mxu3 %v6353_v16  ;;  %2385 = vmatpush.msra.mxu1 %v7372_v29 }
  0xd0   :  { %8851 = vst [vmem:[#allocation195_spill] sm:$0xff] %v7304_v41  ;;  %2452 = vmatpush.msra.mxu3 %v7274_v30  ;;  %2481 = vmatpush.msrb.mxu0 %v7311_v10 }
  0xd1   :  { %8852 = vst [vmem:[#allocation196_spill] sm:$0xff] %v7306_v6 }
  0xd2   :  { %8853 = vst [vmem:[#allocation197_spill] sm:$0xff] %v7311_v10  ;;  %2454 = vmatpush.msra.mxu3 %v7282_v63  ;;  %2485 = vmatpush.msrb.mxu0 %v7327_v40 }
  0xd3   :  { %8854 = vst [vmem:[#allocation198_spill] sm:$0xff] %v7314_v1 }
  0xd4   :  { %8855 = vst [vmem:[#allocation199_spill] sm:$0xff] %v7316_v59  ;;  %v7335_v59 = vsub.f32 %v112_v54, %v7306_v6  ;;  %v7353_v54 = vand.u32 4294901760, %v88_v52  ;;  %2456 = vmatpush.msra.mxu3 %v7291_v39  ;;  %2489 = vmatpush.msrb.mxu0 %v7346_v55 }
  0xd5   :  { %8856 = vst [vmem:[#allocation200_spill] sm:$0xff] %v7318_v50  ;;  %v7332_v50 = vsub.f32 %v87_v9, %v7304_v41  ;;  %v7351_v9 = vsub.f32 %v104_v45, %v7322_v12  ;;  %v7368_v45 = vsub.f32 %v96_v11, %v7337_v7 }
  0xd6   :  { %8857 = vst [vmem:[#allocation201_spill] sm:$0xff] %v7322_v12  ;;  %v7362_v62 = vand.u32 4294901760, %v7335_v59  ;;  %v7384_v11 = vsub.f32 %v88_v52, %v7353_v54  ;;  %2458 = vmatpush.msra.mxu3 %v7304_v41 }
  0xd7   :  { %8858 = vst [vmem:[#allocation202_spill] sm:$0xff] %v7327_v40  ;;  %v7365_v36 = vand.u32 4294901760, %v7332_v50  ;;  %v7381_v2 = vand.u32 4294901760, %v7351_v9  ;;  %v7390_v58 = vpop.f32.mrf.mxu2  ;;  %2432 = vmatpush.msra.mxu2 %v7332_v50  ;;  %2462 = vmatmul.f32.vlgmr.msra.gmra.mxu3 %v6398_v31 }
  0xd8   :  { %8859 = vst [vmem:[#allocation203_spill] sm:$0xff] %v7332_v50  ;;  %2435 = vmatmul.f32.vlgmr.msra.gmra.mxu2 %v6373_v23 }
  0xd9   :  { %8860 = vst [vmem:[#allocation204_spill] sm:$0xff] %v7335_v59  ;;  %v2401_v52 = vsub.f32 %v7332_v50, %v7365_v36  ;;  %2537 = vmatpush.msrb.mxu2 %v7306_v6  ;;  %v7446_v50 = vpop.f32.mrf.mxu3  ;;  %2493 = vmatpush.msrb.mxu0 %v7365_v36 }
  0xda   :  { %8861 = vst [vmem:[#allocation205_spill] sm:$0xff] %v7337_v7  ;;  %2495 = vmatmul.f32.vlgmr.msrb.gmra.mxu0 %v6353_v16 }
  0xdb   :  { %8862 = vst [vmem:[#allocation206_spill] sm:$0xff] %v7339_v32  ;;  %v2389_v32 = vsub.f32 %v7298_v61, %v7327_v40  ;;  %v7401_v61 = vand.u32 4294901760, %v7368_v45  ;;  %2539 = vmatpush.msrb.mxu2 %v7322_v12  ;;  %v7458_v40 = vpop.f32.mrf.mxu0  ;;  %2608 = vmatpush.msra.mxu0 %v7335_v59 }
  0xdc   :  { %8863 = vst [vmem:[#allocation207_spill] sm:$0xff] %v7346_v55  ;;  %v114_v55 = vld [vmem:[#allocation5 + $0x1f8] sm:$0xff] }
  0xdd   :  { %8864 = vst [vmem:[#allocation208_spill] sm:$0xff] %v7351_v9  ;;  %v7388_v0 = vand.u32 4294901760, %v2389_v32  ;;  %v7405_v32 = vand.u32 4294901760, %v2395_v42  ;;  %v2580_v1 = vsub.f32 %v7368_v45, %v7401_v61  ;;  %2541 = vmatpush.msrb.mxu2 %v7337_v7  ;;  %2611 = vmatpush.msra.mxu0 %v7351_v9 }
  0xde   :  { %8865 = vst [vmem:[#allocation209_spill] sm:$0xff] %v7353_v54 }
  0xdf   :  { %8866 = vst [vmem:[#allocation210_spill] sm:$0xff] %v7362_v62  ;;  %2391 = vmatpush.msra.mxu1 %v7388_v0  ;;  %2543 = vmatpush.msrb.mxu2 %v7353_v54 }
  0xe0   :  { %8867 = vst [vmem:[#allocation211_spill] sm:$0xff] %v7365_v36  ;;  %2549 = vmatmul.f32.vlgmr.msrb.gmra.mxu2 %v6430_v43  ;;  %v106_v36 = vld [vmem:[#allocation5 + $0x1b8] sm:$0xff]  ;;  %2614 = vmatpush.msra.mxu0 %v7368_v45 }
  0xe1   :  { %8868 = vst [vmem:[#allocation212_spill] sm:$0xff] %v7368_v45  ;;  %2397 = vmatpush.msra.mxu1 %v7405_v32  ;;  %2666 = vmatpush.msra.mxu2 %v7362_v62  ;;  %v7498_v10 = vpop.f32.mrf.mxu3 }
  0xe2   :  { %8869 = vst [vmem:[#allocation213_spill] sm:$0xff] %v7372_v29  ;;  %v7422_v29 = vand.u32 4294901760, %v2401_v52  ;;  %v7440_v52 = vand.u32 4294901760, %v2580_v1  ;;  %2617 = vmatpush.msra.mxu0 %v7384_v11 }
  0xe3   :  { %8870 = vst [vmem:[#allocation214_spill] sm:$0xff] %v7376_v56  ;;  %v2568_v56 = vsub.f32 %v7335_v59, %v7362_v62  ;;  %2670 = vmatpush.msra.mxu2 %v7381_v2  ;;  %v98_v62 = vld [vmem:[#allocation5 + $0x178] sm:$0xff]  ;;  %2620 = vmatmul.f32.vlgmr.msra.gmra.mxu0 %v6373_v23 }
  0xe4   :  { %8871 = vst [vmem:[#allocation215_spill] sm:$0xff] %v7381_v2  ;;  %2403 = vmatpush.msra.mxu1 %v7422_v29 }
  0xe5   :  { %8872 = vst [vmem:[#allocation216_spill] sm:$0xff] %v7384_v11  ;;  %v7420_v42 = vand.u32 4294901760, %v2568_v56  ;;  %v7436_v56 = vpop.f32.mrf.mxu1  ;;  %2405 = vmatmul.f32.vlgmr.msra.gmra.mxu1 %v6353_v16  ;;  %2674 = vmatpush.msra.mxu2 %v7401_v61 }
  0xe6   :  { %8873 = vst [vmem:[#allocation217_spill] sm:$0xff] %v7388_v0  ;;  %2512 = vmatpush.msrb.mxu1 %v7274_v30 }
  0xe7   :  { %8874 = vst [vmem:[#allocation218_spill] sm:$0xff] %v7390_v58  ;;  %v7412_v58 = vand.u32 4294901760, %v7384_v11  ;;  %2570 = vmatpush.msrb.mxu3 %v7420_v42 }
  0xe8   :  { %8875 = vst [vmem:[#allocation219_spill] sm:$0xff] %v7392_v53  ;;  %v2574_v53 = vsub.f32 %v7351_v9, %v7381_v2  ;;  %2514 = vmatpush.msrb.mxu1 %v7282_v63  ;;  %v7517_v2 = vand.u32 4294901760, %v98_v62 }
  0xe9   :  { %8876 = vst [vmem:[#allocation220_spill] sm:$0xff] %v7401_v61  ;;  %v2586_v0 = vsub.f32 %v7384_v11, %v7412_v58  ;;  %2678 = vmatpush.msra.mxu2 %v7412_v58  ;;  %v7572_v30 = vpop.f32.mrf.mxu3 }
  0xea   :  { %8877 = vst [vmem:[#allocation221_spill] sm:$0xff] %v7405_v32  ;;  %v113_v32 = vld [vmem:[#allocation5 + $0x1f0] sm:$0xff]  ;;  %2516 = vmatpush.msrb.mxu1 %v7291_v39  ;;  %v7519_v39 = vpop.f32.mrf.mxu0  ;;  %2680 = vmatmul.f32.vlgmr.msra.gmra.mxu2 %v6353_v16 }
  0xeb   :  { %8878 = vst [vmem:[#allocation222_spill] sm:$0xff] %v7412_v58  ;;  %v7454_v1 = vand.u32 4294901760, %v113_v32 }
  0xec   :  { %8879 = vst [vmem:[#allocation223_spill] sm:$0xff] %v7414_v60  ;;  %v7430_v60 = vand.u32 4294901760, %v2574_v53  ;;  %v7444_v53 = vpop.f32.mrf.mxu2  ;;  %2518 = vmatpush.msrb.mxu1 %v7304_v41  ;;  %v7502_v41 = vand.u32 4294901760, %v106_v36 }
  0xed   :  { %8880 = vst [vmem:[#allocation224_spill] sm:$0xff] %v7420_v42  ;;  %v105_v42 = vld [vmem:[#allocation5 + $0x1b0] sm:$0xff]  ;;  %2520 = vmatmul.f32.vlgmr.msrb.gmra.mxu1 %v6353_v16  ;;  %2722 = vmatpush.msrb.mxu0 %v7454_v1 }
  0xee   :  { %8881 = vst [vmem:[#allocation225_spill] sm:$0xff] %v7422_v29  ;;  %2576 = vmatpush.msrb.mxu3 %v7430_v60  ;;  %v7486_v29 = vand.u32 4294901760, %v114_v55  ;;  %2637 = vmatpush.msra.mxu1 %v7306_v6 }
  0xef   :  { %8882 = vst [vmem:[#allocation226_spill] sm:$0xff] %v7430_v60  ;;  %v7480_v60 = vpop.f32.mrf.mxu1 }
  0xf0   :  { %8883 = vst [vmem:[#allocation227_spill] sm:$0xff] %v7436_v56  ;;  %v7450_v56 = vand.u32 4294901760, %v2586_v0  ;;  %2582 = vmatpush.msrb.mxu3 %v7440_v52  ;;  %v7462_v0 = vand.u32 4294901760, %v105_v42  ;;  %2639 = vmatpush.msra.mxu1 %v7322_v12 }
  0xf1   :  { %8884 = vst [vmem:[#allocation228_spill] sm:$0xff] %v7440_v52 }
  0xf2   :  { %8885 = vst [vmem:[#allocation229_spill] sm:$0xff] %v7444_v53  ;;  %v97_v53 = vld [vmem:[#allocation5 + $0x170] sm:$0xff]  ;;  %2588 = vmatpush.msrb.mxu3 %v7450_v56  ;;  %2641 = vmatpush.msra.mxu1 %v7337_v7 }
  0xf3   :  { %8886 = vst [vmem:[#allocation230_spill] sm:$0xff] %v7446_v50  ;;  %v7469_v50 = vsub.f32 %v113_v32, %v7454_v1  ;;  %v7471_v52 = vand.u32 4294901760, %v97_v53  ;;  %2590 = vmatmul.f32.vlgmr.msrb.gmra.mxu3 %v6353_v16  ;;  %2724 = vmatpush.msrb.mxu0 %v7462_v0 }
  0xf4   :  { %8887 = vst [vmem:[#allocation231_spill] sm:$0xff] %v7450_v56  ;;  %v7478_v56 = vsub.f32 %v105_v42, %v7462_v0  ;;  %2697 = vmatpush.msra.mxu3 %v7306_v6  ;;  %2643 = vmatpush.msra.mxu1 %v7353_v54 }
  0xf5   :  { %8888 = vst [vmem:[#allocation232_spill] sm:$0xff] %v7458_v40  ;;  %v89_v40 = vld [vmem:[#allocation5 + $0x130] sm:$0xff]  ;;  %v7491_v59 = vand.u32 4294901760, %v7469_v50  ;;  %v7494_v42 = vsub.f32 %v97_v53, %v7471_v52  ;;  %v90_v53 = vld [vmem:[#allocation5 + $0x138] sm:$0xff]  ;;  %2793 = vmatpush.msrb.mxu2 %v7469_v50  ;;  %2647 = vmatmul.f32.vlgmr.msra.gmra.mxu1 %v6398_v31 }
  0xf6   :  { %8889 = vst [vmem:[#allocation233_spill] sm:$0xff] %v7469_v50  ;;  %v7484_v32 = vand.u32 4294901760, %v89_v40  ;;  %2699 = vmatpush.msra.mxu3 %v7322_v12  ;;  %v7507_v9 = vand.u32 4294901760, %v7478_v56  ;;  %2726 = vmatpush.msrb.mxu0 %v7471_v52 }
  0xf7   :  { %8890 = vst [vmem:[#allocation234_spill] sm:$0xff] %v7478_v56  ;;  %v2753_v61 = vsub.f32 %v7469_v50, %v7491_v59  ;;  %v7526_v45 = vand.u32 4294901760, %v7494_v42  ;;  %v7556_v6 = vpop.f32.mrf.mxu1  ;;  %2796 = vmatpush.msrb.mxu2 %v7478_v56 }
  0xf8   :  { %8891 = vst [vmem:[#allocation235_spill] sm:$0xff] %v7480_v60  ;;  %v7496_v60 = vpop.f32.mrf.mxu2  ;;  %2701 = vmatpush.msra.mxu3 %v7337_v7  ;;  %2728 = vmatpush.msrb.mxu0 %v7484_v32 }
  0xf9   :  { %8892 = vst [vmem:[#allocation236_spill] sm:$0xff] %v7491_v59  ;;  %v7552_v7 = vand.u32 4294901760, %v2753_v61  ;;  %v2765_v12 = vsub.f32 %v7494_v42, %v7526_v45  ;;  %2799 = vmatpush.msrb.mxu2 %v7494_v42  ;;  %2734 = vmatmul.f32.vlgmr.msrb.gmra.mxu0 %v6430_v43 }
  0xfa   :  { %8893 = vst [vmem:[#allocation237_spill] sm:$0xff] %v7494_v42  ;;  %2703 = vmatpush.msra.mxu3 %v7353_v54  ;;  %v7594_v54 = vpop.f32.mrf.mxu0  ;;  %2851 = vmatpush.msra.mxu0 %v7491_v59 }
  0xfb   :  { %8894 = vst [vmem:[#allocation238_spill] sm:$0xff] %v7496_v60  ;;  %v7515_v60 = vsub.f32 %v114_v55, %v7486_v29  ;;  %v7533_v55 = vand.u32 4294901760, %v90_v53  ;;  %2705 = vmatmul.f32.vlgmr.msra.gmra.mxu3 %v6353_v16  ;;  %2755 = vmatpush.msrb.mxu1 %v7552_v7 }
  0xfc   :  { %8895 = vst [vmem:[#allocation239_spill] sm:$0xff] %v7498_v10  ;;  %v7512_v10 = vsub.f32 %v89_v40, %v7484_v32  ;;  %v7531_v40 = vsub.f32 %v106_v36, %v7502_v41  ;;  %v7548_v36 = vsub.f32 %v98_v62, %v7517_v2  ;;  %2822 = vmatpush.msrb.mxu3 %v7454_v1 }
  0xfd   :  { %8896 = vst [vmem:[#allocation240_spill] sm:$0xff] %v7515_v60  ;;  %v7542_v11 = vand.u32 4294901760, %v7515_v60  ;;  %v7564_v62 = vsub.f32 %v90_v53, %v7533_v55  ;;  %2855 = vmatpush.msra.mxu0 %v7507_v9 }
  0xfe   :  { %8897 = vst [vmem:[#allocation241_spill] sm:$0xff] %v7519_v39  ;;  %v2759_v39 = vsub.f32 %v7478_v56, %v7507_v9  ;;  %v7545_v58 = vand.u32 4294901760, %v7512_v10  ;;  %v7561_v63 = vand.u32 4294901760, %v7531_v40  ;;  %2824 = vmatpush.msrb.mxu3 %v7462_v0  ;;  %v7581_v56 = vand.u32 4294901760, %v7548_v36  ;;  %2802 = vmatpush.msrb.mxu2 %v7512_v10 }
  0xff   :  { %8898 = vst [vmem:[#allocation242_spill] sm:$0xff] %v7542_v11  ;;  %2805 = vmatmul.f32.vlgmr.msrb.gmra.mxu2 %v6373_v23  ;;  %2859 = vmatpush.msra.mxu0 %v7526_v45 }
 0x100   :  { %8899 = vst [vmem:[#allocation243_spill] sm:$0xff] %v7552_v7  ;;  %v7568_v61 = vand.u32 4294901760, %v2759_v39  ;;  %v7570_v50 = vpop.f32.mrf.mxu2  ;;  %v2771_v53 = vsub.f32 %v7512_v10, %v7545_v58  ;;  %v7585_v39 = vand.u32 4294901760, %v2765_v12  ;;  %2826 = vmatpush.msrb.mxu3 %v7471_v52  ;;  %v2950_v42 = vsub.f32 %v7548_v36, %v7581_v56  ;;  %2907 = vmatpush.msra.mxu2 %v7486_v29 }
 0x101   :  { %8900 = vst [vmem:[#allocation244_spill] sm:$0xff] %v7556_v6  ;;  %v2938_v6 = vsub.f32 %v7515_v60, %v7542_v11  ;;  %2863 = vmatpush.msra.mxu0 %v7545_v58 }
 0x102   :  { %8901 = vst [vmem:[#allocation245_spill] sm:$0xff] %v7564_v62  ;;  %2761 = vmatpush.msrb.mxu1 %v7568_v61  ;;  %2828 = vmatpush.msrb.mxu3 %v7484_v32  ;;  %v7602_v7 = vand.u32 4294901760, %v2771_v53  ;;  %v7620_v53 = vand.u32 4294901760, %v2950_v42  ;;  %v47_v42 = vld [vmem:[#allocation2] sm:$0xf] }
 0x103   :  { %8902 = vst [vmem:[#allocation246_spill] sm:$0xff] %v7568_v61  ;;  %v7600_v12 = vand.u32 4294901760, %v2938_v6  ;;  %2832 = vmatmul.f32.vlgmr.msrb.gmra.mxu3 %v6398_v31  ;;  %v7616_v6 = vpop.f32.mrf.mxu1  ;;  %2909 = vmatpush.msra.mxu2 %v7502_v41 }
 0x104   :  { %8903 = vst [vmem:[#allocation247_spill] sm:$0xff] %v7570_v50  ;;  %v7592_v50 = vand.u32 4294901760, %v7564_v62  ;;  %2767 = vmatpush.msrb.mxu1 %v7585_v39  ;;  %2865 = vmatmul.f32.vlgmr.msra.gmra.mxu0 %v6353_v16 }
 0x105   :  { %8904 = vst [vmem:[#allocation248_spill] sm:$0xff] %v7572_v30  ;;  %v2944_v30 = vsub.f32 %v7531_v40, %v7561_v63  ;;  %2940 = vmatpush.msra.mxu3 %v7600_v12  ;;  %2911 = vmatpush.msra.mxu2 %v7517_v2 }
 0x106   :  { %8905 = vst [vmem:[#allocation249_spill] sm:$0xff] %v7585_v39  ;;  %v2956_v61 = vsub.f32 %v7564_v62, %v7592_v50  ;;  %2773 = vmatpush.msrb.mxu1 %v7602_v7  ;;  %v7626_v39 = vpop.f32.mrf.mxu3  ;;  %2978 = vmatpush.msrb.mxu0 %v7515_v60  ;;  %v6195_v60 = vld [vmem:[#allocation2 + $0x4] sm:$0xf] }
 0x107   :  { %8906 = vst [vmem:[#allocation250_spill] sm:$0xff] %v7594_v54  ;;  %v7610_v54 = vand.u32 4294901760, %v2944_v30  ;;  %2775 = vmatmul.f32.vlgmr.msrb.gmra.mxu1 %v6353_v16  ;;  %2913 = vmatpush.msra.mxu2 %v7533_v55 }
 0x108   :  { %8907 = vst [vmem:[#allocation251_spill] sm:$0xff] %v7616_v6  ;;  %v7624_v30 = vpop.f32.mrf.mxu2  ;;  %v7630_v59 = vand.u32 4294901760, %v2956_v61  ;;  %2882 = vmatpush.msra.mxu1 %v7454_v1  ;;  %v7636_v6 = vpop.f32.mrf.mxu0  ;;  %v3080_v61 = vsel %vm115_vm0, %v47_v42, 0  ;;  %2919 = vmatmul.f32.vlgmr.msra.gmra.mxu2 %v6430_v43 }
 0x109   :  { %8908 = vst [vmem:[#allocation252_spill] sm:$0xff] %v7624_v30  ;;  %2946 = vmatpush.msra.mxu3 %v7610_v54  ;;  %3036 = vmatpush.msrb.mxu2 %v7542_v11  ;;  %v6091_v11 = vmul.f32 %v6195_v60, %v47_v42 }
 0x10a   :  { %8909 = vst [vmem:[#allocation253_spill] sm:$0xff] %v7626_v39  ;;  %2884 = vmatpush.msra.mxu1 %v7462_v0  ;;  %2981 = vmatpush.msrb.mxu0 %v7531_v40 }
 0x10b   :  { %2952 = vmatpush.msra.mxu3 %v7620_v53  ;;  %8910 = vst [vmem:[#allocation254_spill] sm:$0xff] %v7636_v6  ;;  %v7649_v6 = vand.u32 4294901760, %v3080_v61  ;;  %v7651_v39 = vpop.f32.mrf.mxu1  ;;  %3040 = vmatpush.msrb.mxu2 %v7561_v63 }
 0x10c   :  { %2886 = vmatpush.msra.mxu1 %v7471_v52  ;;  %8911 = vst [vmem:[#allocation255_spill] sm:$0xff] %v7651_v39  ;;  %2984 = vmatpush.msrb.mxu0 %v7548_v36 }
 0x10d   :  { %2958 = vmatpush.msra.mxu3 %v7630_v59  ;;  %3044 = vmatpush.msrb.mxu2 %v7581_v56  ;;  %v7666_v39 = vsub.f32 %v3080_v61, %v7649_v6 }
 0x10e   :  { %2960 = vmatmul.f32.vlgmr.msra.gmra.mxu3 %v6353_v16  ;;  %2888 = vmatpush.msra.mxu1 %v7484_v32  ;;  %v7659_v43 = vpop.f32.mrf.mxu3 }
 0x10f   :  { %3067 = vmatpush.msrb.mxu3 %v7486_v29  ;;  %8913 = vst [vmem:[#allocation257_spill] sm:$0xff] %v7659_v43  ;;  %2890 = vmatmul.f32.vlgmr.msra.gmra.mxu1 %v6353_v16  ;;  %v6093_v43 = vsel %vm6092_vm1, %v6091_v11, 0.0  ;;  %v7680_v61 = vand.u32 4294901760, %v7666_v39 }
 0x110   :  { %v7657_v30 = vpop.f32.mrf.mxu2  ;;  %3007 = vmatpush.msrb.mxu1 %v7486_v29  ;;  %3048 = vmatpush.msrb.mxu2 %v7592_v50 }
 0x111   :  { %8912 = vst [vmem:[#allocation256_spill] sm:$0xff] %v7657_v30  ;;  %3069 = vmatpush.msrb.mxu3 %v7502_v41  ;;  %v7670_v30 = vpop.f32.mrf.mxu0  ;;  %2987 = vmatpush.msrb.mxu0 %v7564_v62  ;;  %v3105_v11 = vsub.f32 %v7666_v39, %v7680_v61 }
 0x112   :  { %8914 = vst [vmem:[#allocation258_spill] sm:$0xff] %v7670_v30  ;;  %3009 = vmatpush.msrb.mxu1 %v7502_v41  ;;  %2990 = vmatmul.f32.vlgmr.msrb.gmra.mxu0 %v6373_v23  ;;  %v6096_v23 = vmul.f32 %v47_v42, %v47_v42 }
 0x113   :  { %3071 = vmatpush.msrb.mxu3 %v7517_v2  ;;  %3050 = vmatmul.f32.vlgmr.msrb.gmra.mxu2 %v6353_v16  ;;  %v7685_v30 = vpop.f32.mrf.mxu1 }
 0x114   :  { %3011 = vmatpush.msrb.mxu1 %v7517_v2  ;;  %3166 = vmatpush.msra.mxu2 %v6344_v13  ;;  %8915 = vst [vmem:[#allocation259_spill] sm:$0xff] %v7685_v30  ;;  %v6100_v13 = vmul.f32 %v6195_v60, %v6195_v60  ;;  %v6097_v42 = vsel %vm6092_vm1, %v6096_v23, 0.0  ;;  %v8937_v60 = vld [vmem:[#allocation43_spill] sm:$0xff] }
 0x115   :  { %3073 = vmatpush.msrb.mxu3 %v7533_v55  ;;  %6094 = vadd.xlane.f32.xlu0 %v6093_v43  ;;  %v7708_v43 = vand.u32 4294901760, %v3105_v11 }
 0x116   :  { %3075 = vmatmul.f32.vlgmr.msrb.gmra.mxu3 %v6353_v16  ;;  %3095 = vmatpush.msra.mxu0 %v6333_v3  ;;  %v7695_v16 = vpop.f32.mrf.mxu3 }
 0x117   :  { %3195 = vmatpush.msra.mxu3 %v6333_v3  ;;  %3013 = vmatpush.msrb.mxu1 %v7533_v55  ;;  %8917 = vst [vmem:[#allocation261_spill] sm:$0xff] %v7695_v16 }
 0x118   :  { %3169 = vmatpush.msra.mxu2 %v6348_v14  ;;  %v7693_v62 = vpop.f32.mrf.mxu2  ;;  %3097 = vmatpush.msra.mxu0 %v6335_v4 }
 0x119   :  { %8916 = vst [vmem:[#allocation260_spill] sm:$0xff] %v7693_v62  ;;  %3197 = vmatpush.msra.mxu3 %v6335_v4  ;;  %3017 = vmatmul.f32.vlgmr.msrb.gmra.mxu1 %v6398_v31  ;;  %v7703_v14 = vpop.f32.mrf.mxu0  ;;  %v8987_v62 = vld [vmem:[#allocation64_spill] sm:$0xff] }
 0x11a   :  { %3172 = vmatpush.msra.mxu2 %v6351_v15  ;;  %3128 = vmatpush.msra.mxu1 %v6412_v37  ;;  %8918 = vst [vmem:[#allocation262_spill] sm:$0xff] %v7703_v14  ;;  %v6101_v15 = vsel %vm6092_vm1, %v6100_v13, 0.0  ;;  %v8938_v13 = vld [vmem:[#allocation44_spill] sm:$0xff]  ;;  %v8983_v14 = vld [vmem:[#allocation61_spill] sm:$0xff] }
 0x11b   :  { %3099 = vmatpush.msra.mxu0 %v6337_v5  ;;  %3199 = vmatpush.msra.mxu3 %v6337_v5 }
 0x11c   :  { %3175 = vmatpush.msra.mxu2 %v6356_v17  ;;  %3134 = vmatpush.msra.mxu1 %v6416_v38  ;;  %v7718_v17 = vpop.f32.mrf.mxu1  ;;  %v8930_v38 = vld [vmem:[#allocation19_spill] sm:$0xff] }
 0x11d   :  { %3101 = vmatpush.msra.mxu0 %v6339_v8  ;;  %3201 = vmatpush.msra.mxu3 %v6339_v8  ;;  %8919 = vst [vmem:[#allocation263_spill] sm:$0xff] %v7718_v17  ;;  %v8982_v17 = vld [vmem:[#allocation77_spill] sm:$0xff] }
 0x11e   :  { %3280 = vmatpush.msrb.mxu2 %v6358_v18  ;;  %3140 = vmatpush.msra.mxu1 %v6432_v44  ;;  %v7725_v37 = vpop.f32.mrf.mxu3  ;;  %v8931_v44 = vld [vmem:[#allocation27_spill] sm:$0xff] }
 0x11f   :  { %6098 = vadd.xlane.f32.xlu0 %v6097_v42  ;;  %3107 = vmatmul.f32.vlgmr.msra.gmra.mxu0 %v7708_v43  ;;  %8921 = vst [vmem:[#allocation265_spill] sm:$0xff] %v7725_v37  ;;  %v8939_v42 = vld [vmem:[#allocation25_spill] sm:$0xff]  ;;  %v8979_v37 = vld [vmem:[#allocation76_spill] sm:$0xff] }
 0x120   :  { %3178 = vmatmul.f32.vlgmr.msra.gmra.mxu2 %v7666_v39  ;;  %3205 = vmatmul.f32.vlgmr.msra.gmra.mxu3 %v7680_v61  ;;  %v7723_v31 = vpop.f32.mrf.mxu2 }
 0x121   :  { %3224 = vmatpush.msrb.mxu0 %v6367_v21  ;;  %3313 = vmatpush.msrb.mxu3 %v6440_v47  ;;  %8920 = vst [vmem:[#allocation264_spill] sm:$0xff] %v7723_v31  ;;  %v7733_v21 = vpop.f32.mrf.mxu0  ;;  %v8933_v47 = vld [vmem:[#allocation21_spill] sm:$0xff] }
 0x122   :  { %6102 = vadd.xlane.f32.xlu1 %v6101_v15  ;;  %3146 = vmatpush.msra.mxu1 %v6446_v49  ;;  %v8940_v15 = vld [vmem:[#allocation26_spill] sm:$0xff]  ;;  %v8980_v31 = vld [vmem:[#allocation57_spill] sm:$0xff] }
 0x123   :  { %3282 = vmatpush.msrb.mxu2 %v6360_v19  ;;  %3228 = vmatpush.msrb.mxu0 %v6370_v22 }
 0x124   :  { %3319 = vmatpush.msrb.mxu3 %v6442_v48  ;;  %3148 = vmatmul.f32.vlgmr.msra.gmra.mxu1 %v7649_v6  ;;  %v7745_v22 = vpop.f32.mrf.mxu1  ;;  %v8934_v48 = vld [vmem:[#allocation41_spill] sm:$0xff] }
 0x125   :  { %3284 = vmatpush.msrb.mxu2 %v6362_v20  ;;  %3255 = vmatpush.msrb.mxu1 %v6333_v3 }
 0x126   :  { %3232 = vmatpush.msrb.mxu0 %v6376_v24  ;;  %3325 = vmatpush.msrb.mxu3 %v6455_v51  ;;  %v8922_v24 = vld [vmem:[#allocation15_spill] sm:$0xff]  ;;  %v8935_v51 = vld [vmem:[#allocation22_spill] sm:$0xff] }
 0x127   :  { %3286 = vmatpush.msrb.mxu2 %v6436_v46  ;;  %3257 = vmatpush.msrb.mxu1 %v6335_v4  ;;  %v7753_v4 = vpop.f32.mrf.mxu3 }
 0x128   :  { %3236 = vmatpush.msrb.mxu0 %v6383_v26  ;;  %3331 = vmatpush.msrb.mxu3 %v6472_v57  ;;  %v7751_v3 = vpop.f32.mrf.mxu2  ;;  %v8925_v26 = vld [vmem:[#allocation16_spill] sm:$0xff]  ;;  %v8936_v57 = vld [vmem:[#allocation23_spill] sm:$0xff] }
 0x129   :  { %3238 = vmatmul.f32.vlgmr.msrb.gmra.mxu0 %v7649_v6  ;;  %3259 = vmatpush.msrb.mxu1 %v6337_v5  ;;  %v7761_v5 = vpop.f32.mrf.mxu0 }
 0x12a   :  { %3292 = vmatmul.f32.vlgmr.msrb.gmra.mxu2 %v7708_v43  ;;  %3333 = vmatmul.f32.vlgmr.msrb.gmra.mxu3 %v7649_v6 }
 0x12b   :  { %3409 = vmatpush.msra.mxu2 %v6404_v33  ;;  %3351 = vmatpush.msra.mxu0 %v6380_v25  ;;  %v8928_v33 = vld [vmem:[#allocation24_spill] sm:$0xff] }
 0x12c   :  { %3440 = vmatpush.msra.mxu3 %v6358_v18  ;;  %3261 = vmatpush.msrb.mxu1 %v6339_v8  ;;  %v8923_v8 = vld [vmem:[#allocation14_spill] sm:$0xff]  ;;  %v7773_v25 = vpop.f32.mrf.mxu1 }
 0x12d   :  { %3413 = vmatpush.msra.mxu2 %v6407_v34  ;;  %3354 = vmatpush.msra.mxu0 %v6386_v27 }
 0x12e   :  { %3442 = vmatpush.msra.mxu3 %v6360_v19  ;;  %3263 = vmatmul.f32.vlgmr.msrb.gmra.mxu1 %v7649_v6 }
 0x12f   :  { %3417 = vmatpush.msra.mxu2 %v6410_v35  ;;  %3380 = vmatpush.msra.mxu1 %v6358_v18  ;;  %v8924_v18 = vld [vmem:[#allocation18_spill] sm:$0xff]  ;;  %v7781_v27 = vpop.f32.mrf.mxu3  ;;  %v8929_v35 = vld [vmem:[#allocation36_spill] sm:$0xff] }
 0x130   :  { %3357 = vmatpush.msra.mxu0 %v6389_v28  ;;  %3444 = vmatpush.msra.mxu3 %v6362_v20  ;;  %v8926_v28 = vld [vmem:[#allocation20_spill] sm:$0xff] }
 0x131   :  { %3421 = vmatpush.msra.mxu2 %v8922_v24  ;;  %3382 = vmatpush.msra.mxu1 %v6360_v19  ;;  %v7779_v19 = vpop.f32.mrf.mxu2  ;;  %v7789_v34 = vpop.f32.mrf.mxu0  ;;  %v8941_v24 = vld [vmem:[#allocation45_spill] sm:$0xff] }
 0x132   :  { %3360 = vmatpush.msra.mxu0 %v8923_v8  ;;  %3446 = vmatpush.msra.mxu3 %v6436_v46  ;;  %v8942_v8 = vld [vmem:[#allocation29_spill] sm:$0xff] }
 0x133   :  { %3363 = vmatmul.f32.vlgmr.msra.gmra.mxu0 %v7666_v39  ;;  %3384 = vmatpush.msra.mxu1 %v6362_v20  ;;  %v8927_v20 = vld [vmem:[#allocation17_spill] sm:$0xff] }
 0x134   :  { %3423 = vmatmul.f32.vlgmr.msra.gmra.mxu2 %v7649_v6  ;;  %3448 = vmatmul.f32.vlgmr.msra.gmra.mxu3 %v7649_v6  ;;  %v7801_v49 = vpop.f32.mrf.mxu1 }
 0x135   :  { %3536 = vmatpush.msrb.mxu2 %v8924_v18  ;;  %3465 = vmatpush.msrb.mxu0 %v8925_v26 }
 0x136   :  { %3565 = vmatpush.msrb.mxu3 %v8925_v26  ;;  %3386 = vmatpush.msra.mxu1 %v6436_v46  ;;  %v8932_v46 = vld [vmem:[#allocation39_spill] sm:$0xff] }
 0x137   :  { %3539 = vmatpush.msrb.mxu2 %v8926_v28  ;;  %3467 = vmatpush.msrb.mxu0 %v8927_v20  ;;  %v7809_v11 = vpop.f32.mrf.mxu3  ;;  %v8943_v28 = vld [vmem:[#allocation30_spill] sm:$0xff] }
 0x138   :  { %3567 = vmatpush.msrb.mxu3 %v8927_v20  ;;  %3390 = vmatmul.f32.vlgmr.msra.gmra.mxu1 %v7680_v61 }
 0x139   :  { %3542 = vmatpush.msrb.mxu2 %v8928_v33  ;;  %3498 = vmatpush.msrb.mxu1 %v8929_v35  ;;  %v7807_v23 = vpop.f32.mrf.mxu2  ;;  %v7817_v18 = vpop.f32.mrf.mxu0  ;;  %v8944_v33 = vld [vmem:[#allocation46_spill] sm:$0xff]  ;;  %v8945_v35 = vld [vmem:[#allocation32_spill] sm:$0xff] }
 0x13a   :  { %3469 = vmatpush.msrb.mxu0 %v8930_v38  ;;  %3569 = vmatpush.msrb.mxu3 %v8930_v38 }
 0x13b   :  { %3545 = vmatpush.msrb.mxu2 %v8931_v44  ;;  %3504 = vmatpush.msrb.mxu1 %v8932_v46  ;;  %v8946_v44 = vld [vmem:[#allocation34_spill] sm:$0xff]  ;;  %v8947_v46 = vld [vmem:[#allocation47_spill] sm:$0xff] }
 0x13c   :  { %3471 = vmatpush.msrb.mxu0 %v8933_v47  ;;  %3571 = vmatpush.msrb.mxu3 %v8933_v47 }
 0x13d   :  { %3477 = vmatmul.f32.vlgmr.msrb.gmra.mxu0 %v7708_v43  ;;  %3510 = vmatpush.msrb.mxu1 %v8934_v48  ;;  %v7829_v48 = vpop.f32.mrf.mxu1 }
 0x13e   :  { %3548 = vmatmul.f32.vlgmr.msrb.gmra.mxu2 %v7666_v39  ;;  %3575 = vmatmul.f32.vlgmr.msrb.gmra.mxu3 %v7680_v61 }
 0x13f   :  { %3650 = vmatpush.msra.mxu2 %v8935_v51  ;;  %3594 = vmatpush.msra.mxu0 %v8936_v57  ;;  %v8949_v57 = vld [vmem:[#allocation28_spill] sm:$0xff] }
 0x140   :  { %3683 = vmatpush.msra.mxu3 %v8937_v60  ;;  %3516 = vmatpush.msrb.mxu1 %v8938_v13  ;;  %v7837_v60 = vpop.f32.mrf.mxu3  ;;  %v8952_v13 = vld [vmem:[#allocation37_spill] sm:$0xff] }
 0x141   :  { %3652 = vmatpush.msra.mxu2 %v8939_v42  ;;  %3598 = vmatpush.msra.mxu0 %v8940_v15  ;;  %8951 = vst [vmem:[#allocation14_spill] sm:$0xff] %v7837_v60  ;;  %v8954_v15 = vld [vmem:[#allocation40_spill] sm:$0xff]  ;;  %v9082_v60 = vld [vmem:[#allocation131_spill] sm:$0xff] }
 0x142   :  { %3689 = vmatpush.msra.mxu3 %v8941_v24  ;;  %3518 = vmatmul.f32.vlgmr.msrb.gmra.mxu1 %v7649_v6  ;;  %v7845_v24 = vpop.f32.mrf.mxu0 }
 0x143   :  { %3654 = vmatpush.msra.mxu2 %v8942_v8  ;;  %3625 = vmatpush.msra.mxu1 %v8925_v26  ;;  %v8948_v26 = vld [vmem:[#allocation33_spill] sm:$0xff]  ;;  %8955 = vst [vmem:[#allocation18_spill] sm:$0xff] %v7845_v24 }
 0x144   :  { %3602 = vmatpush.msra.mxu0 %v8943_v28  ;;  %3695 = vmatpush.msra.mxu3 %v8944_v33  ;;  %v8956_v28 = vld [vmem:[#allocation35_spill] sm:$0xff]  ;;  %v8957_v33 = vld [vmem:[#allocation42_spill] sm:$0xff] }
 0x145   :  { %3656 = vmatpush.msra.mxu2 %v8945_v35  ;;  %3627 = vmatpush.msra.mxu1 %v8927_v20  ;;  %v7835_v20 = vpop.f32.mrf.mxu2 }
 0x146   :  { %3606 = vmatpush.msra.mxu0 %v8946_v44  ;;  %3701 = vmatpush.msra.mxu3 %v8947_v46  ;;  %8950 = vst [vmem:[#allocation15_spill] sm:$0xff] %v7835_v20  ;;  %v7857_v44 = vpop.f32.mrf.mxu1  ;;  %v8961_v46 = vld [vmem:[#allocation48_spill] sm:$0xff]  ;;  %v9101_v20 = vld [vmem:[#allocation158_spill] sm:$0xff] }
 0x147   :  { %3608 = vmatmul.f32.vlgmr.msra.gmra.mxu0 %v7649_v6  ;;  %3629 = vmatpush.msra.mxu1 %v8930_v38  ;;  %v8953_v38 = vld [vmem:[#allocation31_spill] sm:$0xff]  ;;  %8959 = vst [vmem:[#allocation16_spill] sm:$0xff] %v7857_v44 }
 0x148   :  { %3662 = vmatmul.f32.vlgmr.msra.gmra.mxu2 %v7708_v43  ;;  %3703 = vmatmul.f32.vlgmr.msra.gmra.mxu3 %v7649_v6 }
 0x149   :  { %3779 = vmatpush.msrb.mxu2 %v8948_v26  ;;  %3721 = vmatpush.msrb.mxu0 %v8949_v57  ;;  %v8963_v57 = vld [vmem:[#allocation52_spill] sm:$0xff] }
 0x14a   :  { %3810 = vmatpush.msrb.mxu3 %v8935_v51  ;;  %3631 = vmatpush.msra.mxu1 %v8933_v47  ;;  %v8958_v47 = vld [vmem:[#allocation38_spill] sm:$0xff]  ;;  %v7865_v26 = vpop.f32.mrf.mxu3 }
 0x14b   :  { %3783 = vmatpush.msrb.mxu2 %v8952_v13  ;;  %3724 = vmatpush.msrb.mxu0 %v8953_v38  ;;  %8962 = vst [vmem:[#allocation20_spill] sm:$0xff] %v7865_v26  ;;  %v8965_v13 = vld [vmem:[#allocation56_spill] sm:$0xff]  ;;  %v7873_v38 = vpop.f32.mrf.mxu0  ;;  %v9102_v26 = vld [vmem:[#allocation182_spill] sm:$0xff] }
 0x14c   :  { %3812 = vmatpush.msrb.mxu3 %v8939_v42  ;;  %3633 = vmatmul.f32.vlgmr.msra.gmra.mxu1 %v7649_v6  ;;  %8966 = vst [vmem:[#allocation17_spill] sm:$0xff] %v7873_v38 }
 0x14d   :  { %3787 = vmatpush.msrb.mxu2 %v8954_v15  ;;  %3750 = vmatpush.msrb.mxu1 %v8935_v51  ;;  %v8960_v51 = vld [vmem:[#allocation50_spill] sm:$0xff]  ;;  %v8967_v15 = vld [vmem:[#allocation68_spill] sm:$0xff] }
 0x14e   :  { %3727 = vmatpush.msrb.mxu0 %v8956_v28  ;;  %3814 = vmatpush.msrb.mxu3 %v8942_v8  ;;  %v8968_v28 = vld [vmem:[#allocation51_spill] sm:$0xff] }
 0x14f   :  { %3791 = vmatpush.msrb.mxu2 %v8957_v33  ;;  %3752 = vmatpush.msrb.mxu1 %v8939_v42  ;;  %v7863_v42 = vpop.f32.mrf.mxu2  ;;  %v8969_v33 = vld [vmem:[#allocation59_spill] sm:$0xff] }
 0x150   :  { %3730 = vmatpush.msrb.mxu0 %v8958_v47  ;;  %3816 = vmatpush.msrb.mxu3 %v8945_v35  ;;  %v8971_v47 = vld [vmem:[#allocation53_spill] sm:$0xff] }
 0x151   :  { %3733 = vmatmul.f32.vlgmr.msrb.gmra.mxu0 %v7666_v39  ;;  %3754 = vmatpush.msrb.mxu1 %v8942_v8  ;;  %v8964_v8 = vld [vmem:[#allocation49_spill] sm:$0xff] }
 0x152   :  { %3793 = vmatmul.f32.vlgmr.msrb.gmra.mxu2 %v7649_v6  ;;  %3818 = vmatmul.f32.vlgmr.msrb.gmra.mxu3 %v7649_v6  ;;  %v7893_v30 = vpop.f32.mrf.mxu3 }
 0x153   :  { %3906 = vmatpush.msra.mxu2 %v8960_v51  ;;  %3835 = vmatpush.msra.mxu0 %v8961_v46  ;;  %v8972_v51 = vld [vmem:[#allocation73_spill] sm:$0xff]  ;;  %8978 = vst [vmem:[#allocation19_spill] sm:$0xff] %v7893_v30  ;;  %v7901_v16 = vpop.f32.mrf.mxu0 }
 0x154   :  { %3935 = vmatpush.msra.mxu3 %v8961_v46  ;;  %3756 = vmatpush.msrb.mxu1 %v8945_v35  ;;  %v8970_v35 = vld [vmem:[#allocation71_spill] sm:$0xff]  ;;  %8984 = vst [vmem:[#allocation27_spill] sm:$0xff] %v7901_v16  ;;  %v9023_v16 = vld [vmem:[#allocation108_spill] sm:$0xff] }
 0x155   :  { %3909 = vmatpush.msra.mxu2 %v8963_v57  ;;  %3837 = vmatpush.msra.mxu0 %v8964_v8  ;;  %v7885_v57 = vpop.f32.mrf.mxu1 }
 0x156   :  { %3937 = vmatpush.msra.mxu3 %v8964_v8  ;;  %3760 = vmatmul.f32.vlgmr.msrb.gmra.mxu1 %v7680_v61  ;;  %8973 = vst [vmem:[#allocation24_spill] sm:$0xff] %v7885_v57  ;;  %v9099_v57 = vld [vmem:[#allocation181_spill] sm:$0xff] }
 0x157   :  { %3912 = vmatpush.msra.mxu2 %v8965_v13  ;;  %3868 = vmatpush.msra.mxu1 %v8967_v15  ;;  %v8974_v13 = vld [vmem:[#allocation54_spill] sm:$0xff]  ;;  %v8975_v15 = vld [vmem:[#allocation55_spill] sm:$0xff] }
 0x158   :  { %3839 = vmatpush.msra.mxu0 %v8968_v28  ;;  %3939 = vmatpush.msra.mxu3 %v8968_v28 }
 0x159   :  { %3915 = vmatpush.msra.mxu2 %v8969_v33  ;;  %3874 = vmatpush.msra.mxu1 %v8970_v35  ;;  %v8976_v33 = vld [vmem:[#allocation75_spill] sm:$0xff]  ;;  %v7891_v35 = vpop.f32.mrf.mxu2 }
 0x15a   :  { %3841 = vmatpush.msra.mxu0 %v8971_v47  ;;  %3941 = vmatpush.msra.mxu3 %v8971_v47  ;;  %8977 = vst [vmem:[#allocation36_spill] sm:$0xff] %v7891_v35  ;;  %v9080_v35 = vld [vmem:[#allocation127_spill] sm:$0xff] }
 0x15b   :  { %3847 = vmatmul.f32.vlgmr.msra.gmra.mxu0 %v7708_v43  ;;  %3880 = vmatpush.msra.mxu1 %v8972_v51  ;;  %v8981_v51 = vld [vmem:[#allocation58_spill] sm:$0xff] }
 0x15c   :  { %3918 = vmatmul.f32.vlgmr.msra.gmra.mxu2 %v7666_v39  ;;  %3945 = vmatmul.f32.vlgmr.msra.gmra.mxu3 %v7680_v61 }
 0x15d   :  { %4020 = vmatpush.msrb.mxu2 %v8974_v13  ;;  %3964 = vmatpush.msrb.mxu0 %v8975_v15  ;;  %v8985_v15 = vld [vmem:[#allocation62_spill] sm:$0xff] }
 0x15e   :  { %4053 = vmatpush.msrb.mxu3 %v8976_v33  ;;  %3886 = vmatpush.msra.mxu1 %v8979_v37  ;;  %v8986_v33 = vld [vmem:[#allocation78_spill] sm:$0xff] }
 0x15f   :  { %4022 = vmatpush.msrb.mxu2 %v8980_v31  ;;  %3968 = vmatpush.msrb.mxu0 %v8981_v51  ;;  %v8988_v37 = vld [vmem:[#allocation66_spill] sm:$0xff]  ;;  %v8989_v51 = vld [vmem:[#allocation79_spill] sm:$0xff] }
 0x160   :  { %4059 = vmatpush.msrb.mxu3 %v8982_v17  ;;  %3888 = vmatmul.f32.vlgmr.msra.gmra.mxu1 %v7649_v6 }
 0x161   :  { %4024 = vmatpush.msrb.mxu2 %v8983_v14  ;;  %3995 = vmatpush.msrb.mxu1 %v8961_v46  ;;  %v8991_v46 = vld [vmem:[#allocation65_spill] sm:$0xff] }
 0x162   :  { %3972 = vmatpush.msrb.mxu0 %v8985_v15  ;;  %4065 = vmatpush.msrb.mxu3 %v8986_v33  ;;  %v7913_v17 = vpop.f32.mrf.mxu1  ;;  %v8992_v15 = vld [vmem:[#allocation60_spill] sm:$0xff]  ;;  %v7921_v33 = vpop.f32.mrf.mxu3 }
 0x163   :  { %4026 = vmatpush.msrb.mxu2 %v8987_v62  ;;  %3997 = vmatpush.msrb.mxu1 %v8964_v8  ;;  %8990 = vst [vmem:[#allocation39_spill] sm:$0xff] %v7913_v17  ;;  %v7919_v8 = vpop.f32.mrf.mxu2 }
 0x164   :  { %3976 = vmatpush.msrb.mxu0 %v8988_v37  ;;  %4071 = vmatpush.msrb.mxu3 %v8989_v51  ;;  %8993 = vst [vmem:[#allocation21_spill] sm:$0xff] %v7919_v8  ;;  %v8995_v37 = vld [vmem:[#allocation69_spill] sm:$0xff]  ;;  %v8997_v51 = vld [vmem:[#allocation72_spill] sm:$0xff] }
 0x165   :  { %3978 = vmatmul.f32.vlgmr.msrb.gmra.mxu0 %v7649_v6  ;;  %3999 = vmatpush.msrb.mxu1 %v8968_v28  ;;  %8994 = vst [vmem:[#allocation41_spill] sm:$0xff] %v7921_v33  ;;  %v8996_v28 = vld [vmem:[#allocation63_spill] sm:$0xff]  ;;  %v9000_v33 = vld [vmem:[#allocation74_spill] sm:$0xff]  ;;  %v9016_v8 = vld [vmem:[#allocation105_spill] sm:$0xff] }
 0x166   :  { %4032 = vmatmul.f32.vlgmr.msrb.gmra.mxu2 %v7708_v43  ;;  %4073 = vmatmul.f32.vlgmr.msrb.gmra.mxu3 %v7649_v6 }
 0x167   :  { %4149 = vmatpush.msra.mxu2 %v8991_v46  ;;  %4091 = vmatpush.msra.mxu0 %v8992_v15  ;;  %v7929_v46 = vpop.f32.mrf.mxu0  ;;  %v8999_v15 = vld [vmem:[#allocation67_spill] sm:$0xff] }
 0x168   :  { %4180 = vmatpush.msra.mxu3 %v8974_v13  ;;  %4001 = vmatpush.msrb.mxu1 %v8971_v47  ;;  %8998 = vst [vmem:[#allocation22_spill] sm:$0xff] %v7929_v46  ;;  %v9001_v47 = vld [vmem:[#allocation70_spill] sm:$0xff]  ;;  %v9013_v46 = vld [vmem:[#allocation91_spill] sm:$0xff] }
 0x169   :  { %4153 = vmatpush.msra.mxu2 %v8995_v37  ;;  %4094 = vmatpush.msra.mxu0 %v8996_v28  ;;  %v9004_v28 = vld [vmem:[#allocation80_spill] sm:$0xff] }
 0x16a   :  { %4182 = vmatpush.msra.mxu3 %v8980_v31  ;;  %4003 = vmatmul.f32.vlgmr.msrb.gmra.mxu1 %v7649_v6  ;;  %v7941_v37 = vpop.f32.mrf.mxu1 }
 0x16b   :  { %4157 = vmatpush.msra.mxu2 %v8997_v51  ;;  %4120 = vmatpush.msra.mxu1 %v8974_v13  ;;  %9002 = vst [vmem:[#allocation23_spill] sm:$0xff] %v7941_v37  ;;  %v9003_v13 = vld [vmem:[#allocation82_spill] sm:$0xff]  ;;  %v9007_v51 = vld [vmem:[#allocation84_spill] sm:$0xff]  ;;  %v9012_v37 = vld [vmem:[#allocation83_spill] sm:$0xff] }
 0x16c   :  { %4097 = vmatpush.msra.mxu0 %v8999_v15  ;;  %4184 = vmatpush.msra.mxu3 %v8983_v14  ;;  %v9009_v15 = vld [vmem:[#allocation88_spill] sm:$0xff] }
 0x16d   :  { %4161 = vmatpush.msra.mxu2 %v9000_v33  ;;  %4122 = vmatpush.msra.mxu1 %v8980_v31  ;;  %v7947_v31 = vpop.f32.mrf.mxu2 }
 0x16e   :  { %4100 = vmatpush.msra.mxu0 %v9001_v47  ;;  %4186 = vmatpush.msra.mxu3 %v8987_v62  ;;  %9005 = vst [vmem:[#allocation43_spill] sm:$0xff] %v7947_v31  ;;  %v9026_v31 = vld [vmem:[#allocation109_spill] sm:$0xff] }
 0x16f   :  { %4103 = vmatmul.f32.vlgmr.msra.gmra.mxu0 %v7666_v39  ;;  %4124 = vmatpush.msra.mxu1 %v8983_v14  ;;  %v9008_v14 = vld [vmem:[#allocation81_spill] sm:$0xff]  ;;  %v7957_v47 = vpop.f32.mrf.mxu0 }
 0x170   :  { %4163 = vmatmul.f32.vlgmr.msra.gmra.mxu2 %v7649_v6  ;;  %4188 = vmatmul.f32.vlgmr.msra.gmra.mxu3 %v7649_v6  ;;  %9010 = vst [vmem:[#allocation25_spill] sm:$0xff] %v7957_v47  ;;  %v9019_v47 = vld [vmem:[#allocation87_spill] sm:$0xff] }
 0x171   :  { %4276 = vmatpush.msrb.mxu2 %v9003_v13  ;;  %4205 = vmatpush.msrb.mxu0 %v9004_v28  ;;  %v9011_v13 = vld [vmem:[#allocation100_spill] sm:$0xff] }
 0x172   :  { %4305 = vmatpush.msrb.mxu3 %v9004_v28  ;;  %4126 = vmatpush.msra.mxu1 %v8987_v62  ;;  %v9014_v62 = vld [vmem:[#allocation103_spill] sm:$0xff] }
 0x173   :  { %4279 = vmatpush.msrb.mxu2 %v9007_v51  ;;  %4207 = vmatpush.msrb.mxu0 %v9008_v14  ;;  %v9015_v51 = vld [vmem:[#allocation85_spill] sm:$0xff] }
 0x174   :  { %4307 = vmatpush.msrb.mxu3 %v9008_v14  ;;  %4130 = vmatmul.f32.vlgmr.msra.gmra.mxu1 %v7680_v61 }
 0x175   :  { %4282 = vmatpush.msrb.mxu2 %v9009_v15  ;;  %4238 = vmatpush.msrb.mxu1 %v9011_v13  ;;  %v7969_v15 = vpop.f32.mrf.mxu1  ;;  %v9018_v13 = vld [vmem:[#allocation86_spill] sm:$0xff] }
 0x176   :  { %v7949_v33 = vpop.f32.mrf.mxu3  ;;  %4209 = vmatpush.msrb.mxu0 %v9012_v37  ;;  %4309 = vmatpush.msrb.mxu3 %v9012_v37  ;;  %9017 = vst [vmem:[#allocation26_spill] sm:$0xff] %v7969_v15  ;;  %v9027_v15 = vld [vmem:[#allocation93_spill] sm:$0xff] }
 0x177   :  { %9006 = vst [vmem:[#allocation44_spill] sm:$0xff] %v7949_v33  ;;  %4285 = vmatpush.msrb.mxu2 %v9013_v46  ;;  %4244 = vmatpush.msrb.mxu1 %v9014_v62  ;;  %v9020_v46 = vld [vmem:[#allocation107_spill] sm:$0xff]  ;;  %v7975_v62 = vpop.f32.mrf.mxu2  ;;  %v9024_v33 = vld [vmem:[#allocation89_spill] sm:$0xff]  ;;  %v7985_v44 = vpop.f32.mrf.mxu0 }
 0x178   :  { %4211 = vmatpush.msrb.mxu0 %v9015_v51  ;;  %4311 = vmatpush.msrb.mxu3 %v9015_v51  ;;  %9021 = vst [vmem:[#allocation45_spill] sm:$0xff] %v7975_v62  ;;  %v9071_v62 = vld [vmem:[#allocation125_spill] sm:$0xff] }
 0x179   :  { %4217 = vmatmul.f32.vlgmr.msrb.gmra.mxu0 %v7708_v43  ;;  %4250 = vmatpush.msrb.mxu1 %v9016_v8  ;;  %v9025_v8 = vld [vmem:[#allocation90_spill] sm:$0xff]  ;;  %9028 = vst [vmem:[#allocation30_spill] sm:$0xff] %v7985_v44 }
 0x17a   :  { %4288 = vmatmul.f32.vlgmr.msrb.gmra.mxu2 %v7666_v39  ;;  %4315 = vmatmul.f32.vlgmr.msrb.gmra.mxu3 %v7680_v61  ;;  %v9069_v44 = vld [vmem:[#allocation122_spill] sm:$0xff] }
 0x17b   :  { %4390 = vmatpush.msra.mxu2 %v9018_v13  ;;  %4334 = vmatpush.msra.mxu0 %v9019_v47  ;;  %v9029_v47 = vld [vmem:[#allocation94_spill] sm:$0xff] }
 0x17c   :  { %4423 = vmatpush.msra.mxu3 %v9020_v46  ;;  %4256 = vmatpush.msrb.mxu1 %v9023_v16  ;;  %v9030_v46 = vld [vmem:[#allocation110_spill] sm:$0xff] }
 0x17d   :  { %4392 = vmatpush.msra.mxu2 %v9024_v33  ;;  %4338 = vmatpush.msra.mxu0 %v9025_v8  ;;  %v9032_v16 = vld [vmem:[#allocation98_spill] sm:$0xff]  ;;  %v9033_v8 = vld [vmem:[#allocation111_spill] sm:$0xff] }
 0x17e   :  { %v7977_v17 = vpop.f32.mrf.mxu3  ;;  %4429 = vmatpush.msra.mxu3 %v9026_v31  ;;  %4258 = vmatmul.f32.vlgmr.msrb.gmra.mxu1 %v7649_v6 }
 0x17f   :  { %9022 = vst [vmem:[#allocation29_spill] sm:$0xff] %v7977_v17  ;;  %4394 = vmatpush.msra.mxu2 %v9027_v15  ;;  %4365 = vmatpush.msra.mxu1 %v9004_v28  ;;  %v9031_v17 = vld [vmem:[#allocation96_spill] sm:$0xff]  ;;  %v9035_v28 = vld [vmem:[#allocation97_spill] sm:$0xff] }
 0x180   :  { %4342 = vmatpush.msra.mxu0 %v9029_v47  ;;  %4435 = vmatpush.msra.mxu3 %v9030_v46  ;;  %v9036_v47 = vld [vmem:[#allocation92_spill] sm:$0xff] }
 0x181   :  { %4396 = vmatpush.msra.mxu2 %v9031_v17  ;;  %4367 = vmatpush.msra.mxu1 %v9008_v14 }
 0x182   :  { %4346 = vmatpush.msra.mxu0 %v9032_v16  ;;  %4441 = vmatpush.msra.mxu3 %v9033_v8  ;;  %v8003_v14 = vpop.f32.mrf.mxu2  ;;  %v9039_v16 = vld [vmem:[#allocation101_spill] sm:$0xff]  ;;  %v9041_v8 = vld [vmem:[#allocation104_spill] sm:$0xff] }
 0x183   :  { %4348 = vmatmul.f32.vlgmr.msra.gmra.mxu0 %v7649_v6  ;;  %4369 = vmatpush.msra.mxu1 %v9012_v37  ;;  %9037 = vst [vmem:[#allocation32_spill] sm:$0xff] %v8003_v14  ;;  %v9040_v37 = vld [vmem:[#allocation95_spill] sm:$0xff]  ;;  %v9060_v14 = vld [vmem:[#allocation137_spill] sm:$0xff] }
 0x184   :  { %4402 = vmatmul.f32.vlgmr.msra.gmra.mxu2 %v7708_v43  ;;  %v7997_v31 = vpop.f32.mrf.mxu1  ;;  %4443 = vmatmul.f32.vlgmr.msra.gmra.mxu3 %v7649_v6 }
 0x185   :  { %9034 = vst [vmem:[#allocation46_spill] sm:$0xff] %v7997_v31  ;;  %4519 = vmatpush.msrb.mxu2 %v9035_v28  ;;  %4461 = vmatpush.msrb.mxu0 %v9036_v47  ;;  %v8013_v28 = vpop.f32.mrf.mxu0  ;;  %v9043_v47 = vld [vmem:[#allocation99_spill] sm:$0xff]  ;;  %v9068_v31 = vld [vmem:[#allocation121_spill] sm:$0xff] }
 0x186   :  { %4550 = vmatpush.msrb.mxu3 %v9018_v13  ;;  %v8005_v46 = vpop.f32.mrf.mxu3  ;;  %4371 = vmatpush.msra.mxu1 %v9015_v51  ;;  %9042 = vst [vmem:[#allocation47_spill] sm:$0xff] %v8013_v28  ;;  %v9045_v51 = vld [vmem:[#allocation102_spill] sm:$0xff]  ;;  %v9057_v28 = vld [vmem:[#allocation123_spill] sm:$0xff] }
 0x187   :  { %9038 = vst [vmem:[#allocation34_spill] sm:$0xff] %v8005_v46  ;;  %4523 = vmatpush.msrb.mxu2 %v9039_v16  ;;  %4464 = vmatpush.msrb.mxu0 %v9040_v37  ;;  %v9044_v46 = vld [vmem:[#allocation106_spill] sm:$0xff]  ;;  %v9048_v37 = vld [vmem:[#allocation112_spill] sm:$0xff] }
 0x188   :  { %4552 = vmatpush.msrb.mxu3 %v9024_v33  ;;  %4373 = vmatmul.f32.vlgmr.msra.gmra.mxu1 %v7649_v6 }
 0x189   :  { %4527 = vmatpush.msrb.mxu2 %v9041_v8  ;;  %4490 = vmatpush.msrb.mxu1 %v9018_v13  ;;  %v9047_v13 = vld [vmem:[#allocation114_spill] sm:$0xff]  ;;  %v9051_v8 = vld [vmem:[#allocation116_spill] sm:$0xff] }
 0x18a   :  { %4467 = vmatpush.msrb.mxu0 %v9043_v47  ;;  %4554 = vmatpush.msrb.mxu3 %v9027_v15  ;;  %v9053_v47 = vld [vmem:[#allocation120_spill] sm:$0xff] }
 0x18b   :  { %4531 = vmatpush.msrb.mxu2 %v9044_v46  ;;  %4492 = vmatpush.msrb.mxu1 %v9024_v33  ;;  %v8031_v33 = vpop.f32.mrf.mxu2 }
 0x18c   :  { %4470 = vmatpush.msrb.mxu0 %v9045_v51  ;;  %4556 = vmatpush.msrb.mxu3 %v9031_v17  ;;  %v8025_v16 = vpop.f32.mrf.mxu1  ;;  %9049 = vst [vmem:[#allocation28_spill] sm:$0xff] %v8031_v33  ;;  %v9067_v33 = vld [vmem:[#allocation140_spill] sm:$0xff] }
 0x18d   :  { %4473 = vmatmul.f32.vlgmr.msrb.gmra.mxu0 %v7666_v39  ;;  %4494 = vmatpush.msrb.mxu1 %v9027_v15  ;;  %9046 = vst [vmem:[#allocation33_spill] sm:$0xff] %v8025_v16  ;;  %v9052_v15 = vld [vmem:[#allocation113_spill] sm:$0xff]  ;;  %v9056_v16 = vld [vmem:[#allocation115_spill] sm:$0xff] }
 0x18e   :  { %4533 = vmatmul.f32.vlgmr.msrb.gmra.mxu2 %v7649_v6  ;;  %4558 = vmatmul.f32.vlgmr.msrb.gmra.mxu3 %v7649_v6 }
 0x18f   :  { %4646 = vmatpush.msra.mxu2 %v9047_v13  ;;  %4575 = vmatpush.msra.mxu0 %v9048_v37  ;;  %v8041_v51 = vpop.f32.mrf.mxu0  ;;  %v9055_v13 = vld [vmem:[#allocation132_spill] sm:$0xff] }
 0x190   :  { %4675 = vmatpush.msra.mxu3 %v9048_v37  ;;  %4496 = vmatpush.msrb.mxu1 %v9031_v17  ;;  %9054 = vst [vmem:[#allocation31_spill] sm:$0xff] %v8041_v51  ;;  %v9058_v17 = vld [vmem:[#allocation135_spill] sm:$0xff] }
 0x191   :  { %v8033_v46 = vpop.f32.mrf.mxu3  ;;  %4649 = vmatpush.msra.mxu2 %v9051_v8  ;;  %4577 = vmatpush.msra.mxu0 %v9052_v15  ;;  %v9059_v8 = vld [vmem:[#allocation117_spill] sm:$0xff]  ;;  %v9063_v51 = vld [vmem:[#allocation119_spill] sm:$0xff] }
 0x192   :  { %9050 = vst [vmem:[#allocation37_spill] sm:$0xff] %v8033_v46  ;;  %4677 = vmatpush.msra.mxu3 %v9052_v15  ;;  %4500 = vmatmul.f32.vlgmr.msrb.gmra.mxu1 %v7680_v61 }
 0x193   :  { %4652 = vmatpush.msra.mxu2 %v9053_v47  ;;  %4608 = vmatpush.msra.mxu1 %v9055_v13  ;;  %v9062_v13 = vld [vmem:[#allocation118_spill] sm:$0xff] }
 0x194   :  { %4579 = vmatpush.msra.mxu0 %v9056_v16  ;;  %4679 = vmatpush.msra.mxu3 %v9056_v16 }
 0x195   :  { %4655 = vmatpush.msra.mxu2 %v9057_v28  ;;  %4614 = vmatpush.msra.mxu1 %v9058_v17  ;;  %v9064_v28 = vld [vmem:[#allocation139_spill] sm:$0xff] }
 0x196   :  { %4581 = vmatpush.msra.mxu0 %v9059_v8  ;;  %4681 = vmatpush.msra.mxu3 %v9059_v8  ;;  %v8053_v47 = vpop.f32.mrf.mxu1  ;;  %v8059_v17 = vpop.f32.mrf.mxu2 }
 0x197   :  { %4587 = vmatmul.f32.vlgmr.msra.gmra.mxu0 %v7708_v43  ;;  %4620 = vmatpush.msra.mxu1 %v9060_v14  ;;  %9061 = vst [vmem:[#allocation40_spill] sm:$0xff] %v8053_v47  ;;  %v6095_v14 = vpop.xlane.xlu0 %6094  ;;  %v9070_v47 = vld [vmem:[#allocation141_spill] sm:$0xff] }
 0x198   :  { %4658 = vmatmul.f32.vlgmr.msra.gmra.mxu2 %v7666_v39  ;;  %4685 = vmatmul.f32.vlgmr.msra.gmra.mxu3 %v7680_v61  ;;  %9065 = vst [vmem:[#allocation35_spill] sm:$0xff] %v8059_v17  ;;  %v9073_v17 = vld [vmem:[#allocation142_spill] sm:$0xff] }
 0x199   :  { %4760 = vmatpush.msrb.mxu2 %v9062_v13  ;;  %4704 = vmatpush.msrb.mxu0 %v9063_v51  ;;  %v8061_v46 = vpop.f32.mrf.mxu3 }
 0x19a   :  { %4793 = vmatpush.msrb.mxu3 %v9064_v28  ;;  %9066 = vst [vmem:[#allocation42_spill] sm:$0xff] %v8061_v46  ;;  %4626 = vmatpush.msra.mxu1 %v9067_v33  ;;  %v9072_v28 = vld [vmem:[#allocation126_spill] sm:$0xff]  ;;  %v9074_v46 = vld [vmem:[#allocation128_spill] sm:$0xff] }
 0x19b   :  { %4762 = vmatpush.msrb.mxu2 %v9068_v31  ;;  %4708 = vmatpush.msrb.mxu0 %v9069_v44  ;;  %v9075_v33 = vld [vmem:[#allocation130_spill] sm:$0xff]  ;;  %v9076_v44 = vld [vmem:[#allocation143_spill] sm:$0xff] }
 0x19c   :  { %4799 = vmatpush.msrb.mxu3 %v9070_v47  ;;  %4628 = vmatmul.f32.vlgmr.msra.gmra.mxu1 %v7649_v6  ;;  %v3108_v51 = vpop.f32.mrf.mxu0 }
 0x19d   :  { %4764 = vmatpush.msrb.mxu2 %v9071_v62  ;;  %4735 = vmatpush.msrb.mxu1 %v9048_v37  ;;  %v9077_v37 = vld [vmem:[#allocation129_spill] sm:$0xff] }
 0x19e   :  { %4712 = vmatpush.msrb.mxu0 %v9072_v28  ;;  %4805 = vmatpush.msrb.mxu3 %v9073_v17  ;;  %v9078_v28 = vld [vmem:[#allocation124_spill] sm:$0xff] }
 0x19f   :  { %4766 = vmatpush.msrb.mxu2 %v9074_v46  ;;  %4737 = vmatpush.msrb.mxu1 %v9052_v15  ;;  %v6104_v15 = vmul.f32 2.0, %v6095_v14 }
 0x1a0   :  { %4716 = vmatpush.msrb.mxu0 %v9075_v33  ;;  %4811 = vmatpush.msrb.mxu3 %v9076_v44  ;;  %v9079_v44 = vld [vmem:[#allocation133_spill] sm:$0xff] }
 0x1a1   :  { %4718 = vmatmul.f32.vlgmr.msrb.gmra.mxu0 %v7649_v6  ;;  %4739 = vmatpush.msrb.mxu1 %v9056_v16  ;;  %v3149_v47 = vpop.f32.mrf.mxu1  ;;  %v6099_v16 = vpop.xlane.xlu0 %6098 }
 0x1a2   :  { %4772 = vmatmul.f32.vlgmr.msrb.gmra.mxu2 %v7708_v43  ;;  %4813 = vmatmul.f32.vlgmr.msrb.gmra.mxu3 %v7649_v6  ;;  %v3150_v17 = vadd.f32 %v3149_v47, %v3108_v51  ;;  %v9081_v51 = vld [vmem:[#allocation136_spill] sm:$0xff] }
 0x1a3   :  { %4889 = vmatpush.msra.mxu2 %v9077_v37  ;;  %4831 = vmatpush.msra.mxu0 %v9078_v28  ;;  %v3179_v33 = vpop.f32.mrf.mxu2  ;;  %v3206_v30 = vpop.f32.mrf.mxu3  ;;  %v6105_v28 = vmul.f32 %v6104_v15, %v6095_v14 }
 0x1a4   :  { %4920 = vmatpush.msra.mxu3 %v9062_v13  ;;  %4741 = vmatpush.msrb.mxu1 %v9059_v8  ;;  %v3180_v24 = vadd.f32 %v3179_v33, %v3150_v17  ;;  %v6106_v8 = vmul.f32 %v6099_v16, %v6099_v16  ;;  %v6103_v17 = vpop.xlane.xlu1 %6102  ;;  %v9084_v33 = vld [vmem:[#allocation134_spill] sm:$0xff] }
 0x1a5   :  { %4893 = vmatpush.msra.mxu2 %v9079_v44  ;;  %4834 = vmatpush.msra.mxu0 %v9080_v35  ;;  %v9083_v44 = vld [vmem:[#allocation138_spill] sm:$0xff] }
 0x1a6   :  { %4922 = vmatpush.msra.mxu3 %v9068_v31  ;;  %4743 = vmatmul.f32.vlgmr.msrb.gmra.mxu1 %v7649_v6  ;;  %v3207_v47 = vadd.f32 %v3206_v30, %v3180_v24  ;;  %v3239_v37 = vpop.f32.mrf.mxu0  ;;  %v6107_v30 = vsub.f32 %v6105_v28, %v6106_v8 }
 0x1a7   :  { %4897 = vmatpush.msra.mxu2 %v9081_v51  ;;  %4860 = vmatpush.msra.mxu1 %v9062_v13  ;;  %v9085_v13 = vld [vmem:[#allocation147_spill] sm:$0xff] }
 0x1a8   :  { %4837 = vmatpush.msra.mxu0 %v9082_v60  ;;  %4924 = vmatpush.msra.mxu3 %v9071_v62  ;;  %v3240_v35 = vadd.f32 %v3239_v37, %v3207_v47  ;;  %v6108_v60 = vmul.f32 %v6103_v17, %v6103_v17  ;;  %v9088_v47 = vld [vmem:[#allocation146_spill] sm:$0xff] }
 0x1a9   :  { %4901 = vmatpush.msra.mxu2 %v9083_v44  ;;  %4862 = vmatpush.msra.mxu1 %v9068_v31  ;;  %v9086_v31 = vld [vmem:[#allocation144_spill] sm:$0xff]  ;;  %v9089_v44 = vld [vmem:[#allocation154_spill] sm:$0xff] }
 0x1aa   :  { %4840 = vmatpush.msra.mxu0 %v9084_v33  ;;  %4926 = vmatpush.msra.mxu3 %v9074_v46  ;;  %v6109_v37 = vsub.f32 %v6107_v30, %v6108_v60  ;;  %v9091_v33 = vld [vmem:[#allocation148_spill] sm:$0xff] }
 0x1ab   :  { %4843 = vmatmul.f32.vlgmr.msra.gmra.mxu0 %v7666_v39  ;;  %4864 = vmatpush.msra.mxu1 %v9071_v62  ;;  %v3264_v24 = vpop.f32.mrf.mxu1  ;;  %v9087_v62 = vld [vmem:[#allocation149_spill] sm:$0xff] }
 0x1ac   :  { %4903 = vmatmul.f32.vlgmr.msra.gmra.mxu2 %v7649_v6  ;;  %4928 = vmatmul.f32.vlgmr.msra.gmra.mxu3 %v7649_v6  ;;  %v8101_v14 = vadd.f32 %v3264_v24, %v3240_v35  ;;  %v9090_v35 = vld [vmem:[#allocation169_spill] sm:$0xff]  ;;  %v6110_v30 = vadd.f32 1.0, %v6109_v37 }
 0x1ad   :  { %5016 = vmatpush.msrb.mxu2 %v9085_v13  ;;  %4945 = vmatpush.msrb.mxu0 %v9086_v31  ;;  %v3293_v15 = vpop.f32.mrf.mxu2  ;;  %v3334_v16 = vpop.f32.mrf.mxu3  ;;  %v6123_v13 = vsub.f32 %v6108_v60, %v6105_v28  ;;  %v9096_v28 = vld [vmem:[#allocation152_spill] sm:$0xff] }
 0x1ae   :  { %5045 = vmatpush.msrb.mxu3 %v9086_v31  ;;  %4866 = vmatpush.msra.mxu1 %v9074_v46  ;;  %v3335_v51 = vadd.f32 %v3334_v16, %v3293_v15  ;;  %v9092_v46 = vld [vmem:[#allocation159_spill] sm:$0xff]  ;;  %v9093_v15 = vld [vmem:[#allocation173_spill] sm:$0xff]  ;;  %v6111_v37 = vmax.f32 %v6110_v30, 0.0 }
 0x1af   :  { %5019 = vmatpush.msrb.mxu2 %v9087_v62  ;;  %4947 = vmatpush.msrb.mxu0 %v9088_v47  ;;  %v9094_v16 = vld [vmem:[#allocation151_spill] sm:$0xff]  ;;  %v9095_v62 = vld [vmem:[#allocation177_spill] sm:$0xff]  ;;  %v6124_v60 = vadd.f32 %v6123_v13, %v6106_v8 }
 0x1b0   :  { %5047 = vmatpush.msrb.mxu3 %v9088_v47  ;;  %4870 = vmatmul.f32.vlgmr.msra.gmra.mxu1 %v7680_v61  ;;  %v3364_v17 = vpop.f32.mrf.mxu0  ;;  %v9103_v8 = vld [vmem:[#allocation161_spill] sm:$0xff] }
 0x1b1   :  { %5022 = vmatpush.msrb.mxu2 %v9089_v44  ;;  %4978 = vmatpush.msrb.mxu1 %v9090_v35  ;;  %v3365_v24 = vadd.f32 %v3364_v17, %v3335_v51  ;;  %v9097_v17 = vld [vmem:[#allocation153_spill] sm:$0xff]  ;;  %v9098_v35 = vld [vmem:[#allocation180_spill] sm:$0xff] }
 0x1b2   :  { %4949 = vmatpush.msrb.mxu0 %v9091_v33  ;;  %5049 = vmatpush.msrb.mxu3 %v9091_v33 }
 0x1b3   :  { %5025 = vmatpush.msrb.mxu2 %v9092_v46  ;;  %4984 = vmatpush.msrb.mxu1 %v9093_v15 }
 0x1b4   :  { %4951 = vmatpush.msrb.mxu0 %v9094_v16  ;;  %5051 = vmatpush.msrb.mxu3 %v9094_v16 }
 0x1b5   :  { %4957 = vmatmul.f32.vlgmr.msrb.gmra.mxu0 %v7708_v43  ;;  %4990 = vmatpush.msrb.mxu1 %v9095_v62  ;;  %v3391_v44 = vpop.f32.mrf.mxu1  ;;  %v9100_v62 = vld [vmem:[#allocation157_spill] sm:$0xff] }
 0x1b6   :  { %5028 = vmatmul.f32.vlgmr.msrb.gmra.mxu2 %v7666_v39  ;;  %5055 = vmatmul.f32.vlgmr.msrb.gmra.mxu3 %v7680_v61  ;;  %v3392_v51 = vadd.f32 %v3391_v44, %v3365_v24  ;;  %v6125_v24 = vsel %vm6112_vm2, %v6124_v60, 0.0  ;;  %v9104_v44 = vld [vmem:[#allocation163_spill] sm:$0xff] }
 0x1b7   :  { %5130 = vmatpush.msra.mxu2 %v9096_v28  ;;  %5074 = vmatpush.msra.mxu0 %v9097_v17  ;;  %v3424_v46 = vpop.f32.mrf.mxu2  ;;  %v3449_v15 = vpop.f32.mrf.mxu3  ;;  %v9108_v60 = vld [vmem:[#allocation187_spill] sm:$0xff]  ;;  %v9109_v17 = vld [vmem:[#allocation166_spill] sm:$0xff] }
 0x1b8   :  { %5163 = vmatpush.msra.mxu3 %v9098_v35  ;;  %4996 = vmatpush.msrb.mxu1 %v9099_v57  ;;  %v3425_v38 = vadd.f32 %v3424_v46, %v3392_v51  ;;  %v6113_v57 = vsel %vm6112_vm2, %v6111_v37, 0.0  ;;  %v9105_v51 = vld [vmem:[#allocation184_spill] sm:$0xff] }
 0x1b9   :  { %5132 = vmatpush.msra.mxu2 %v9100_v62  ;;  %5078 = vmatpush.msra.mxu0 %v9101_v20  ;;  %v9106_v20 = vld [vmem:[#allocation165_spill] sm:$0xff]  ;;  %v9110_v37 = vld [vmem:[#allocation160_spill] sm:$0xff] }
 0x1ba   :  { %5169 = vmatpush.msra.mxu3 %v9102_v26  ;;  %4998 = vmatmul.f32.vlgmr.msrb.gmra.mxu1 %v7649_v6  ;;  %v8132_v13 = vadd.f32 %v3449_v15, %v3425_v38  ;;  %v3478_v30 = vpop.f32.mrf.mxu0  ;;  %v9107_v26 = vld [vmem:[#allocation167_spill] sm:$0xff] }
 0x1bb   :  { %5134 = vmatpush.msra.mxu2 %v9103_v8  ;;  %5105 = vmatpush.msra.mxu1 %v9086_v31  ;;  %v9111_v15 = vld [vmem:[#allocation171_spill] sm:$0xff] }
 0x1bc   :  { %5082 = vmatpush.msra.mxu0 %v9104_v44  ;;  %5175 = vmatpush.msra.mxu3 %v9105_v51  ;;  %v9113_v44 = vld [vmem:[#allocation176_spill] sm:$0xff] }
 0x1bd   :  { %5136 = vmatpush.msra.mxu2 %v9106_v20  ;;  %5107 = vmatpush.msra.mxu1 %v9088_v47 }
 0x1be   :  { %6126 = vadd.xlane.f32.xlu2 %v6125_v24  ;;  %6114 = vadd.xlane.f32.xlu1 %v6113_v57  ;;  %v9112_v24 = vld [vmem:[#allocation164_spill] sm:$0xff] }
 0x1bf   :  { %5086 = vmatpush.msra.mxu0 %v9107_v26  ;;  %5181 = vmatpush.msra.mxu3 %v9108_v60  ;;  %v3519_v38 = vpop.f32.mrf.mxu1  ;;  %v9114_v57 = vld [vmem:[#allocation168_spill] sm:$0xff] }
 0x1c0   :  { %5088 = vmatmul.f32.vlgmr.msra.gmra.mxu0 %v7649_v6  ;;  %5109 = vmatpush.msra.mxu1 %v9091_v33  ;;  %v3520_v31 = vadd.f32 %v3519_v38, %v3478_v30  ;;  %v9116_v26 = vld [vmem:[#allocation172_spill] sm:$0xff]  ;;  %v9117_v38 = vld [vmem:[#allocation191_spill] sm:$0xff] }
 0x1c1   :  { %5142 = vmatmul.f32.vlgmr.msra.gmra.mxu2 %v7708_v43  ;;  %5183 = vmatmul.f32.vlgmr.msra.gmra.mxu3 %v7649_v6  ;;  %v3549_v35 = vpop.f32.mrf.mxu2  ;;  %v3576_v47 = vpop.f32.mrf.mxu3 }
 0x1c2   :  { %5259 = vmatpush.msrb.mxu2 %v9109_v17  ;;  %5201 = vmatpush.msrb.mxu0 %v9110_v37  ;;  %v3550_v46 = vadd.f32 %v3549_v35, %v3520_v31 }
 0x1c3   :  { %5290 = vmatpush.msrb.mxu3 %v9096_v28  ;;  %5111 = vmatpush.msra.mxu1 %v9094_v16  ;;  %v9115_v16 = vld [vmem:[#allocation178_spill] sm:$0xff] }
 0x1c4   :  { %5263 = vmatpush.msrb.mxu2 %v9111_v15  ;;  %5204 = vmatpush.msrb.mxu0 %v9112_v24  ;;  %v3577_v33 = vadd.f32 %v3576_v47, %v3550_v46  ;;  %v3609_v30 = vpop.f32.mrf.mxu0  ;;  %v9119_v47 = vld [vmem:[#allocation193_spill] sm:$0xff]  ;;  %v9121_v46 = vld [vmem:[#allocation198_spill] sm:$0xff] }
 0x1c5   :  { %5292 = vmatpush.msrb.mxu3 %v9100_v62  ;;  %5113 = vmatmul.f32.vlgmr.msra.gmra.mxu1 %v7649_v6  ;;  %v9122_v24 = vld [vmem:[#allocation213_spill] sm:$0xff] }
 0x1c6   :  { %5267 = vmatpush.msrb.mxu2 %v9113_v44  ;;  %5230 = vmatpush.msrb.mxu1 %v9096_v28  ;;  %v3610_v51 = vadd.f32 %v3609_v30, %v3577_v33  ;;  %v9123_v33 = vld [vmem:[#allocation192_spill] sm:$0xff]  ;;  %v9124_v30 = vld [vmem:[#allocation203_spill] sm:$0xff] }
 0x1c7   :  { %5207 = vmatpush.msrb.mxu0 %v9114_v57  ;;  %5294 = vmatpush.msrb.mxu3 %v9103_v8  ;;  %v9126_v44 = vld [vmem:[#allocation195_spill] sm:$0xff] }
 0x1c8   :  { %5271 = vmatpush.msrb.mxu2 %v9115_v16  ;;  %5232 = vmatpush.msrb.mxu1 %v9100_v62  ;;  %v9118_v62 = vld [vmem:[#allocation188_spill] sm:$0xff] }
 0x1c9   :  { %5210 = vmatpush.msrb.mxu0 %v9116_v26  ;;  %5296 = vmatpush.msrb.mxu3 %v9106_v20  ;;  %v3634_v60 = vpop.f32.mrf.mxu1  ;;  %v9128_v26 = vld [vmem:[#allocation196_spill] sm:$0xff] }
 0x1ca   :  { %5213 = vmatmul.f32.vlgmr.msrb.gmra.mxu0 %v7666_v39  ;;  %5234 = vmatpush.msrb.mxu1 %v9103_v8  ;;  %v8165_v28 = vadd.f32 %v3634_v60, %v3610_v51  ;;  %v9120_v8 = vld [vmem:[#allocation190_spill] sm:$0xff]  ;;  %v9127_v51 = vld [vmem:[#allocation221_spill] sm:$0xff] }
 0x1cb   :  { %5273 = vmatmul.f32.vlgmr.msrb.gmra.mxu2 %v7649_v6  ;;  %5298 = vmatmul.f32.vlgmr.msrb.gmra.mxu3 %v7649_v6  ;;  %v3663_v31 = vpop.f32.mrf.mxu2  ;;  %v3704_v17 = vpop.f32.mrf.mxu3 }
 0x1cc   :  { %5386 = vmatpush.msra.mxu2 %v9117_v38  ;;  %5315 = vmatpush.msra.mxu0 %v9118_v62  ;;  %v3705_v35 = vadd.f32 %v3704_v17, %v3663_v31  ;;  %v9129_v31 = vld [vmem:[#allocation197_spill] sm:$0xff]  ;;  %v9130_v17 = vld [vmem:[#allocation224_spill] sm:$0xff] }
 0x1cd   :  { %5415 = vmatpush.msra.mxu3 %v9118_v62  ;;  %5236 = vmatpush.msrb.mxu1 %v9106_v20  ;;  %v9125_v20 = vld [vmem:[#allocation217_spill] sm:$0xff] }
 0x1ce   :  { %5389 = vmatpush.msra.mxu2 %v9119_v47  ;;  %5317 = vmatpush.msra.mxu0 %v9120_v8  ;;  %v3734_v37 = vpop.f32.mrf.mxu0  ;;  %v9131_v47 = vld [vmem:[#allocation225_spill] sm:$0xff] }
 0x1cf   :  { %5417 = vmatpush.msra.mxu3 %v9120_v8  ;;  %5240 = vmatmul.f32.vlgmr.msrb.gmra.mxu1 %v7680_v61  ;;  %v3735_v15 = vadd.f32 %v3734_v37, %v3705_v35  ;;  %v9132_v37 = vld [vmem:[#allocation201_spill] sm:$0xff] }
 0x1d0   :  { %5392 = vmatpush.msra.mxu2 %v9121_v46  ;;  %5348 = vmatpush.msra.mxu1 %v9122_v24  ;;  %v9133_v46 = vld [vmem:[#allocation202_spill] sm:$0xff] }
 0x1d1   :  { %5319 = vmatpush.msra.mxu0 %v9123_v33  ;;  %5419 = vmatpush.msra.mxu3 %v9123_v33  ;;  %v9134_v24 = vld [vmem:[#allocation226_spill] sm:$0xff] }
 0x1d2   :  { %5395 = vmatpush.msra.mxu2 %v9124_v30  ;;  %5354 = vmatpush.msra.mxu1 %v9125_v20  ;;  %v9135_v20 = vld [vmem:[#allocation205_spill] sm:$0xff] }
 0x1d3   :  { %5321 = vmatpush.msra.mxu0 %v9126_v44  ;;  %5421 = vmatpush.msra.mxu3 %v9126_v44  ;;  %v3761_v57 = vpop.f32.mrf.mxu1 }
 0x1d4   :  { %5327 = vmatmul.f32.vlgmr.msra.gmra.mxu0 %v7708_v43  ;;  %5360 = vmatpush.msra.mxu1 %v9127_v51  ;;  %v3762_v16 = vadd.f32 %v3761_v57, %v3735_v15  ;;  %v9136_v57 = vld [vmem:[#allocation207_spill] sm:$0xff]  ;;  %v9137_v51 = vld [vmem:[#allocation228_spill] sm:$0xff] }
 0x1d5   :  { %5398 = vmatmul.f32.vlgmr.msra.gmra.mxu2 %v7666_v39  ;;  %5425 = vmatmul.f32.vlgmr.msra.gmra.mxu3 %v7680_v61  ;;  %v3794_v60 = vpop.f32.mrf.mxu2  ;;  %v3819_v38 = vpop.f32.mrf.mxu3 }
 0x1d6   :  { %5500 = vmatpush.msrb.mxu2 %v9128_v26  ;;  %5444 = vmatpush.msrb.mxu0 %v9129_v31  ;;  %v3795_v35 = vadd.f32 %v3794_v60, %v3762_v16  ;;  %v9138_v16 = vld [vmem:[#allocation209_spill] sm:$0xff]  ;;  %v9139_v60 = vld [vmem:[#allocation211_spill] sm:$0xff] }
 0x1d7   :  { %5533 = vmatpush.msrb.mxu3 %v9130_v17  ;;  %5366 = vmatpush.msra.mxu1 %v9131_v47  ;;  %v9140_v31 = vld [vmem:[#allocation231_spill] sm:$0xff]  ;;  %v9141_v17 = vld [vmem:[#allocation210_spill] sm:$0xff] }
 0x1d8   :  { %5502 = vmatpush.msrb.mxu2 %v9132_v37  ;;  %5448 = vmatpush.msrb.mxu0 %v9133_v46  ;;  %v8195_v15 = vadd.f32 %v3819_v38, %v3795_v35  ;;  %v3848_v30 = vpop.f32.mrf.mxu0  ;;  %v9142_v46 = vld [vmem:[#allocation204_spill] sm:$0xff] }
 0x1d9   :  { %5539 = vmatpush.msrb.mxu3 %v9134_v24  ;;  %5368 = vmatmul.f32.vlgmr.msra.gmra.mxu1 %v7649_v6  ;;  %v9143_v24 = vld [vmem:[#allocation215_spill] sm:$0xff] }
 0x1da   :  { %5504 = vmatpush.msrb.mxu2 %v9135_v20  ;;  %5475 = vmatpush.msrb.mxu1 %v9118_v62 }
 0x1db   :  { %5452 = vmatpush.msrb.mxu0 %v9136_v57  ;;  %5545 = vmatpush.msrb.mxu3 %v9137_v51  ;;  %v9144_v57 = vld [vmem:[#allocation208_spill] sm:$0xff] }
 0x1dc   :  { %5506 = vmatpush.msrb.mxu2 %v9138_v16  ;;  %5477 = vmatpush.msrb.mxu1 %v9120_v8  ;;  %v9145_v51 = vld [vmem:[#allocation220_spill] sm:$0xff] }
 0x1dd   :  { %5456 = vmatpush.msrb.mxu0 %v9139_v60  ;;  %5551 = vmatpush.msrb.mxu3 %v9140_v31  ;;  %v3889_v38 = vpop.f32.mrf.mxu1  ;;  %v9146_v60 = vld [vmem:[#allocation212_spill] sm:$0xff] }
 0x1de   :  { %5458 = vmatmul.f32.vlgmr.msrb.gmra.mxu0 %v7649_v6  ;;  %5479 = vmatpush.msrb.mxu1 %v9123_v33  ;;  %v3890_v62 = vadd.f32 %v3889_v38, %v3848_v30  ;;  %v9148_v38 = vld [vmem:[#allocation216_spill] sm:$0xff] }
 0x1df   :  { %5512 = vmatmul.f32.vlgmr.msrb.gmra.mxu2 %v7708_v43  ;;  %5553 = vmatmul.f32.vlgmr.msrb.gmra.mxu3 %v7649_v6  ;;  %v3919_v35 = vpop.f32.mrf.mxu2  ;;  %v3946_v47 = vpop.f32.mrf.mxu3 }
 0x1e0   :  { %5629 = vmatpush.msra.mxu2 %v9141_v17  ;;  %5571 = vmatpush.msra.mxu0 %v9142_v46  ;;  %v3920_v8 = vadd.f32 %v3919_v35, %v3890_v62  ;;  %v9149_v35 = vld [vmem:[#allocation233_spill] sm:$0xff]  ;;  %v9150_v46 = vld [vmem:[#allocation234_spill] sm:$0xff] }
 0x1e1   :  { %5660 = vmatpush.msra.mxu3 %v9128_v26  ;;  %5481 = vmatpush.msrb.mxu1 %v9126_v44  ;;  %v9147_v44 = vld [vmem:[#allocation222_spill] sm:$0xff] }
 0x1e2   :  { %5633 = vmatpush.msra.mxu2 %v9143_v24  ;;  %5574 = vmatpush.msra.mxu0 %v9144_v57  ;;  %v3947_v33 = vadd.f32 %v3946_v47, %v3920_v8  ;;  %v3979_v30 = vpop.f32.mrf.mxu0  ;;  %v9151_v24 = vld [vmem:[#allocation237_spill] sm:$0xff]  ;;  %v9152_v57 = vld [vmem:[#allocation243_spill] sm:$0xff] }
 0x1e3   :  { %5662 = vmatpush.msra.mxu3 %v9132_v37  ;;  %5483 = vmatmul.f32.vlgmr.msrb.gmra.mxu1 %v7649_v6 }
 0x1e4   :  { %5637 = vmatpush.msra.mxu2 %v9145_v51  ;;  %5600 = vmatpush.msra.mxu1 %v9128_v26  ;;  %v3980_v31 = vadd.f32 %v3979_v30, %v3947_v33  ;;  %v9154_v30 = vld [vmem:[#allocation249_spill] sm:$0xff] }
 0x1e5   :  { %5577 = vmatpush.msra.mxu0 %v9146_v60  ;;  %5664 = vmatpush.msra.mxu3 %v9135_v20 }
 0x1e6   :  { %5641 = vmatpush.msra.mxu2 %v9147_v44  ;;  %5602 = vmatpush.msra.mxu1 %v9132_v37 }
 0x1e7   :  { %5580 = vmatpush.msra.mxu0 %v9148_v38  ;;  %5666 = vmatpush.msra.mxu3 %v9138_v16  ;;  %v4004_v62 = vpop.f32.mrf.mxu1 }
 0x1e8   :  { %5583 = vmatmul.f32.vlgmr.msra.gmra.mxu0 %v7666_v39  ;;  %5604 = vmatpush.msra.mxu1 %v9135_v20  ;;  %v8229_v26 = vadd.f32 %v4004_v62, %v3980_v31  ;;  %v9155_v31 = vld [vmem:[#allocation236_spill] sm:$0xff] }
 0x1e9   :  { %5643 = vmatmul.f32.vlgmr.msra.gmra.mxu2 %v7649_v6  ;;  %v4033_v17 = vpop.f32.mrf.mxu2  ;;  %5668 = vmatmul.f32.vlgmr.msra.gmra.mxu3 %v7649_v6  ;;  %v4074_v47 = vpop.f32.mrf.mxu3 }
 0x1ea   :  { %5756 = vmatpush.msrb.mxu2 %v9149_v35  ;;  %5685 = vmatpush.msrb.mxu0 %v7454_v1  ;;  %v4075_v37 = vadd.f32 %v4074_v47, %v4033_v17 }
 0x1eb   :  { %5785 = vmatpush.msrb.mxu3 %v7454_v1  ;;  %5606 = vmatpush.msra.mxu1 %v9138_v16  ;;  %v9153_v16 = vld [vmem:[#allocation246_spill] sm:$0xff] }
 0x1ec   :  { %5759 = vmatpush.msrb.mxu2 %v9150_v46  ;;  %v4104_v20 = vpop.f32.mrf.mxu0  ;;  %5687 = vmatpush.msrb.mxu0 %v7462_v0 }
 0x1ed   :  { %5787 = vmatpush.msrb.mxu3 %v7462_v0  ;;  %v4105_v8 = vadd.f32 %v4104_v20, %v4075_v37  ;;  %5610 = vmatmul.f32.vlgmr.msra.gmra.mxu1 %v7680_v61 }
 0x1ee   :  { %5762 = vmatpush.msrb.mxu2 %v9151_v24  ;;  %5718 = vmatpush.msrb.mxu1 %v9152_v57  ;;  %v9159_v24 = vld [vmem:[#allocation145_spill] sm:$0xff]  ;;  %v9160_v57 = vld [vmem:[#allocation150_spill] sm:$0xff] }
 0x1ef   :  { %5689 = vmatpush.msrb.mxu0 %v7471_v52  ;;  %5789 = vmatpush.msrb.mxu3 %v7471_v52 }
 0x1f0   :  { %5765 = vmatpush.msrb.mxu2 %v7512_v10  ;;  %5724 = vmatpush.msrb.mxu1 %v9153_v16  ;;  %v187_v16 = vadd.f32 %v9160_v57, %v9159_v24 }
 0x1f1   :  { %5691 = vmatpush.msrb.mxu0 %v7484_v32  ;;  %5791 = vmatpush.msrb.mxu3 %v7484_v32  ;;  %v4131_v33 = vpop.f32.mrf.mxu1 }
 0x1f2   :  { %5697 = vmatmul.f32.vlgmr.msrb.gmra.mxu0 %v7708_v43  ;;  %5730 = vmatpush.msrb.mxu1 %v9154_v30  ;;  %v4132_v51 = vadd.f32 %v4131_v33, %v4105_v8  ;;  %v9161_v30 = vld [vmem:[#allocation174_spill] sm:$0xff] }
 0x1f3   :  { %5768 = vmatmul.f32.vlgmr.msrb.gmra.mxu2 %v7666_v39  ;;  %v4164_v60 = vpop.f32.mrf.mxu2  ;;  %5795 = vmatmul.f32.vlgmr.msrb.gmra.mxu3 %v7680_v61  ;;  %v4189_v10 = vpop.f32.mrf.mxu3 }
 0x1f4   :  { %5870 = vmatpush.msra.mxu2 %v7486_v29  ;;  %5814 = vmatpush.msra.mxu0 %v9155_v31  ;;  %v4165_v44 = vadd.f32 %v4164_v60, %v4132_v51  ;;  %v9162_v51 = vld [vmem:[#allocation175_spill] sm:$0xff] }
 0x1f5   :  { %5903 = vmatpush.msra.mxu3 %v7600_v12  ;;  %5736 = vmatpush.msrb.mxu1 %v7602_v7  ;;  %v9157_v12 = vld [vmem:[#allocation240_spill] sm:$0xff]  ;;  %v372_v60 = vadd.f32 %v9162_v51, %v9161_v30 }
 0x1f6   :  { %5872 = vmatpush.msra.mxu2 %v7502_v41  ;;  %v4218_v38 = vpop.f32.mrf.mxu0  ;;  %5818 = vmatpush.msra.mxu0 %v7507_v9  ;;  %v8259_v62 = vadd.f32 %v4189_v10, %v4165_v44 }
 0x1f7   :  { %5909 = vmatpush.msra.mxu3 %v7610_v54  ;;  %5738 = vmatmul.f32.vlgmr.msrb.gmra.mxu1 %v7649_v6 }
 0x1f8   :  { %5874 = vmatpush.msra.mxu2 %v7517_v2  ;;  %5845 = vmatpush.msra.mxu1 %v7454_v1 }
 0x1f9   :  { %5822 = vmatpush.msra.mxu0 %v7526_v45  ;;  %5915 = vmatpush.msra.mxu3 %v7620_v53  ;;  %v9156_v45 = vld [vmem:[#allocation242_spill] sm:$0xff] }
 0x1fa   :  { %5876 = vmatpush.msra.mxu2 %v7533_v55  ;;  %5847 = vmatpush.msra.mxu1 %v7462_v0 }
 0x1fb   :  { %5826 = vmatpush.msra.mxu0 %v7545_v58  ;;  %5921 = vmatpush.msra.mxu3 %v7630_v59  ;;  %v4259_v7 = vpop.f32.mrf.mxu1 }
 0x1fc   :  { %5828 = vmatmul.f32.vlgmr.msra.gmra.mxu0 %v7649_v6  ;;  %5849 = vmatpush.msra.mxu1 %v7471_v52  ;;  %v4260_v9 = vadd.f32 %v4259_v7, %v4218_v38 }
 0x1fd   :  { %5882 = vmatmul.f32.vlgmr.msra.gmra.mxu2 %v7708_v43  ;;  %v4289_v54 = vpop.f32.mrf.mxu2  ;;  %5923 = vmatmul.f32.vlgmr.msra.gmra.mxu3 %v7649_v6  ;;  %v4316_v1 = vpop.f32.mrf.mxu3 }
 0x1fe   :  { %5999 = vmatpush.msrb.mxu2 %v9156_v45  ;;  %5941 = vmatpush.msrb.mxu0 %v9157_v12  ;;  %v4290_v58 = vadd.f32 %v4289_v54, %v4260_v9  ;;  %v9163_v9 = vld [vmem:[#allocation155_spill] sm:$0xff] }
 0x1ff   :  { %5851 = vmatpush.msra.mxu1 %v7484_v32  ;;  %6030 = vmatpush.msrb.mxu3 %v7486_v29  ;;  %v217_v54 = vadd.f32 %v9163_v9, %v187_v16  ;;  %v9165_v12 = vld [vmem:[#allocation183_spill] sm:$0xff] }
 0x200   :  { %6003 = vmatpush.msrb.mxu2 %v7561_v63  ;;  %v4349_v59 = vpop.f32.mrf.mxu0  ;;  %5944 = vmatpush.msrb.mxu0 %v7531_v40  ;;  %v4317_v52 = vadd.f32 %v4316_v1, %v4290_v58  ;;  %v9158_v63 = vld [vmem:[#allocation245_spill] sm:$0xff] }
 0x201   :  { %5853 = vmatmul.f32.vlgmr.msra.gmra.mxu1 %v7649_v6  ;;  %6032 = vmatpush.msrb.mxu3 %v7502_v41 }
 0x202   :  { %5970 = vmatpush.msrb.mxu1 %v7486_v29  ;;  %6007 = vmatpush.msrb.mxu2 %v7581_v56  ;;  %v4350_v0 = vadd.f32 %v4349_v59, %v4317_v52  ;;  %v9166_v52 = vld [vmem:[#allocation156_spill] sm:$0xff] }
 0x203   :  { %5947 = vmatpush.msrb.mxu0 %v7548_v36  ;;  %6034 = vmatpush.msrb.mxu3 %v7517_v2 }
 0x204   :  { %5972 = vmatpush.msrb.mxu1 %v7502_v41  ;;  %6011 = vmatpush.msrb.mxu2 %v7592_v50 }
 0x205   :  { %5950 = vmatpush.msrb.mxu0 %v9158_v63  ;;  %v4374_v29 = vpop.f32.mrf.mxu1  ;;  %6013 = vmatmul.f32.vlgmr.msrb.gmra.mxu2 %v7649_v6 }
 0x206   :  { %5953 = vmatmul.f32.vlgmr.msrb.gmra.mxu0 %v7666_v39  ;;  %5974 = vmatpush.msrb.mxu1 %v7517_v2  ;;  %v8293_v56 = vadd.f32 %v4374_v29, %v4350_v0  ;;  %v244_v0 = vadd.f32 %v9166_v52, %v217_v54  ;;  %v9173_v52 = vld [vmem:[#allocation194_spill] sm:$0xff] }
 0x207   :  { %6036 = vmatpush.msrb.mxu3 %v7533_v55  ;;  %v4403_v32 = vpop.f32.mrf.mxu2  ;;  %v4444_v50 = vpop.f32.mrf.mxu3 }
 0x208   :  { %5976 = vmatpush.msrb.mxu1 %v7533_v55  ;;  %6038 = vmatmul.f32.vlgmr.msrb.gmra.mxu3 %v7649_v6  ;;  %v4445_v41 = vadd.f32 %v4444_v50, %v4403_v32  ;;  %v1667_v6 = vadd.f32 %v7745_v22, %v7733_v21  ;;  %v9164_v21 = vld [vmem:[#allocation179_spill] sm:$0xff]  ;;  %v9167_v32 = vld [vmem:[#allocation185_spill] sm:$0xff] }
 0x209   :  { %5980 = vmatmul.f32.vlgmr.msrb.gmra.mxu1 %v7680_v61  ;;  %v1852_v61 = vadd.f32 %v7781_v27, %v7779_v19  ;;  %v402_v22 = vadd.f32 %v9164_v21, %v372_v60 }
 0x20a   :  { %v4474_v40 = vpop.f32.mrf.mxu0  ;;  %v1697_v38 = vadd.f32 %v7751_v3, %v1667_v6 }
 0x20b   :  { %v4475_v36 = vadd.f32 %v4474_v40, %v4445_v41  ;;  %v1882_v7 = vadd.f32 %v7789_v34, %v1852_v61  ;;  %v429_v58 = vadd.f32 %v9165_v12, %v402_v22  ;;  %v9171_v12 = vld [vmem:[#allocation20_spill] sm:$0xff] }
 0x20c   :  { %v1724_v59 = vadd.f32 %v7753_v4, %v1697_v38 }
 0x20d   :  { %v1909_v19 = vadd.f32 %v7801_v49, %v1882_v7  ;;  %v462_v50 = vadd.f32 %v9167_v32, %v429_v58  ;;  %v2222_v58 = vadd.f32 %v9171_v12, %v7863_v42  ;;  %v9180_v42 = vld [vmem:[#allocation24_spill] sm:$0xff] }
 0x20e   :  { %v1757_v41 = vadd.f32 %v7761_v5, %v1724_v59  ;;  %v9170_v5 = vld [vmem:[#allocation170_spill] sm:$0xff]  ;;  %v9172_v59 = vld [vmem:[#allocation189_spill] sm:$0xff] }
 0x20f   :  { %v4501_v39 = vpop.f32.mrf.mxu1  ;;  %v1942_v63 = vadd.f32 %v7807_v23, %v1909_v19  ;;  %v9169_v23 = vld [vmem:[#allocation186_spill] sm:$0xff] }
 0x210   :  { %v4502_v2 = vadd.f32 %v4501_v39, %v4475_v36  ;;  %v9168_v36 = vld [vmem:[#allocation162_spill] sm:$0xff] }
 0x211   :  { %v4534_v53 = vpop.f32.mrf.mxu2  ;;  %v4559_v43 = vpop.f32.mrf.mxu3  ;;  %v277_v39 = vadd.f32 %v9168_v36, %v244_v0  ;;  %v557_v0 = vadd.f32 %v9173_v52, %v9172_v59  ;;  %v9177_v36 = vld [vmem:[#allocation17_spill] sm:$0xff] }
 0x212   :  { %v4535_v17 = vadd.f32 %v4534_v53, %v4502_v2  ;;  %v1967_v2 = vadd.f32 %v7809_v11, %v1942_v63 }
 0x213   :  { %v302_v61 = vadd.f32 %v9170_v5, %v277_v39  ;;  %v2252_v39 = vadd.f32 %v9177_v36, %v2222_v58 }
 0x214   :  { %v8298_v35 = vadd.f32 %v4559_v43, %v4535_v17  ;;  %v4588_v47 = vpop.f32.mrf.mxu0 }
 0x219   :  { %v4629_v37 = vpop.f32.mrf.mxu1 }
 0x21a   :  { %v4630_v8 = vadd.f32 %v4629_v37, %v4588_v47 }
 0x21b   :  { %v4659_v46 = vpop.f32.mrf.mxu2  ;;  %v4686_v20 = vpop.f32.mrf.mxu3 }
 0x21c   :  { %v4660_v10 = vadd.f32 %v4659_v46, %v4630_v8  ;;  %v487_v46 = vadd.f32 %v9169_v23, %v462_v50 }
 0x21e   :  { %v4719_v55 = vpop.f32.mrf.mxu0  ;;  %v4687_v27 = vadd.f32 %v4686_v20, %v4660_v10  ;;  %v1782_v20 = vadd.f32 %v7773_v25, %v1757_v41  ;;  %v6043_v57 = vmul.f32 %v1967_v2, %v487_v46  ;;  %v9178_v2 = vld [vmem:[#allocation199_spill] sm:$0xff]  ;;  %v9182_v46 = vld [vmem:[#allocation14_spill] sm:$0xff] }
 0x220   :  { %v4720_v3 = vadd.f32 %v4719_v55, %v4687_v27  ;;  %v6042_v51 = vmul.f32 %v1782_v20, %v302_v61 }
 0x223   :  { %v4744_v33 = vpop.f32.mrf.mxu1 }
 0x224   :  { %v4745_v53 = vadd.f32 %v4744_v33, %v4720_v3  ;;  %v9174_v3 = vld [vmem:[#allocation218_spill] sm:$0xff] }
 0x225   :  { %v4773_v31 = vpop.f32.mrf.mxu2  ;;  %v4814_v44 = vpop.f32.mrf.mxu3 }
 0x226   :  { %v4815_v45 = vadd.f32 %v4814_v44, %v4773_v31  ;;  %v6050_v16 = vmul.f32 %v4745_v53, %v8101_v14  ;;  %v587_v53 = vadd.f32 %v9178_v2, %v557_v0  ;;  %v9195_v2 = vld [vmem:[#allocation39_spill] sm:$0xff] }
 0x228   :  { %v4844_v1 = vpop.f32.mrf.mxu0  ;;  %v6058_v44 = vsub.f32 %v6042_v51, %v6050_v16  ;;  %v9185_v16 = vld [vmem:[#allocation229_spill] sm:$0xff] }
 0x229   :  { %v4845_v29 = vadd.f32 %v4844_v1, %v4815_v45  ;;  %v2037_v1 = vadd.f32 %v7829_v48, %v7817_v18  ;;  %v9179_v48 = vld [vmem:[#allocation223_spill] sm:$0xff] }
 0x22d   :  { %v4871_v34 = vpop.f32.mrf.mxu1 }
 0x22e   :  { %v4872_v40 = vadd.f32 %v4871_v34, %v4845_v29  ;;  %v9175_v29 = vld [vmem:[#allocation219_spill] sm:$0xff] }
 0x22f   :  { %v4904_v49 = vpop.f32.mrf.mxu2  ;;  %v4929_v17 = vpop.f32.mrf.mxu3  ;;  %v742_v34 = vadd.f32 %v9175_v29, %v9174_v3 }
 0x230   :  { %v4905_v4 = vadd.f32 %v4904_v49, %v4872_v40  ;;  %v9176_v40 = vld [vmem:[#allocation15_spill] sm:$0xff] }
 0x231   :  { %v6127_v43 = vpop.xlane.xlu2 %6126  ;;  %v6115_v37 = vpop.xlane.xlu1 %6114  ;;  %v2067_v49 = vadd.f32 %v9176_v40, %v2037_v1  ;;  %v9192_v40 = vld [vmem:[#allocation43_spill] sm:$0xff] }
 0x232   :  { %v6128_v47 = vrot.slane %v6127_v43, 4  ;;  %v6116_v55 = vrot.slane %v6115_v37, 4  ;;  %v4930_v8 = vadd.f32 %v4929_v17, %v4905_v4  ;;  %v4958_v6 = vpop.f32.mrf.mxu0  ;;  %v2279_v4 = vadd.f32 %v9180_v42, %v2252_v39  ;;  %v9194_v39 = vld [vmem:[#allocation27_spill] sm:$0xff] }
 0x233   :  { %v2094_v20 = vadd.f32 %v9182_v46, %v2067_v49  ;;  %v9193_v49 = vld [vmem:[#allocation44_spill] sm:$0xff] }
 0x234   :  { %v6129_v24 = vadd.f32 %v6128_v47, %v6127_v43  ;;  %v6117_v11 = vadd.f32 %v6116_v55, %v6115_v37  ;;  %v6051_v33 = vmul.f32 %v4930_v8, %v8132_v13  ;;  %v772_v43 = vadd.f32 %v9179_v48, %v742_v34  ;;  %v9181_v37 = vld [vmem:[#allocation227_spill] sm:$0xff]  ;;  %v9183_v55 = vld [vmem:[#allocation200_spill] sm:$0xff] }
 0x235   :  { %v614_v8 = vadd.f32 %v9183_v55, %v587_v53  ;;  %v2592_v36 = vadd.f32 %v9193_v49, %v9192_v40  ;;  %v9196_v53 = vld [vmem:[#allocation232_spill] sm:$0xff]  ;;  %v9198_v48 = vld [vmem:[#allocation247_spill] sm:$0xff] }
 0x236   :  { %v6130_v30 = vrot.slane %v6129_v24, 2  ;;  %v6118_v60 = vrot.slane %v6117_v11, 2  ;;  %v6059_v10 = vsub.f32 %v6043_v57, %v6051_v33  ;;  %v799_v23 = vadd.f32 %v9181_v37, %v772_v43  ;;  %v9186_v33 = vld [vmem:[#allocation18_spill] sm:$0xff]  ;;  %v9199_v43 = vld [vmem:[#allocation248_spill] sm:$0xff]  ;;  %v9200_v37 = vld [vmem:[#allocation25_spill] sm:$0xff] }
 0x237   :  { %v4999_v38 = vpop.f32.mrf.mxu1  ;;  %v1112_v42 = vadd.f32 %v9199_v43, %v9198_v48 }
 0x238   :  { %v6131_v31 = vadd.f32 %v6130_v30, %v6129_v24  ;;  %v6074_v25 = vrot.slane %v6059_v10, 4  ;;  %v6119_v7 = vadd.f32 %v6118_v60, %v6117_v11  ;;  %v5000_v45 = vadd.f32 %v4999_v38, %v4958_v6  ;;  %v9184_v6 = vld [vmem:[#allocation36_spill] sm:$0xff] }
 0x239   :  { %v5029_v9 = vpop.f32.mrf.mxu2  ;;  %v5056_v22 = vpop.f32.mrf.mxu3  ;;  %v2312_v5 = vadd.f32 %v9184_v6, %v2279_v4  ;;  %v832_v11 = vadd.f32 %v9185_v16, %v799_v23  ;;  %v2127_v30 = vadd.f32 %v9186_v33, %v2094_v20  ;;  %v2622_v23 = vadd.f32 %v9200_v37, %v2592_v36  ;;  %v9201_v20 = vld [vmem:[#allocation21_spill] sm:$0xff]  ;;  %v9202_v6 = vld [vmem:[#allocation238_spill] sm:$0xff]  ;;  %v9215_v36 = vld [vmem:[#allocation244_spill] sm:$0xff] }
 0x23a   :  { %v6132_v54 = vrot.slane %v6131_v31, 1  ;;  %v6079_v21 = vsel %vm6078_vm3, %v6058_v44, %v6074_v25  ;;  %v6120_v19 = vrot.slane %v6119_v7, 1  ;;  %v5030_v32 = vadd.f32 %v5029_v9, %v5000_v45  ;;  %v9188_v25 = vld [vmem:[#allocation19_spill] sm:$0xff] }
 0x23b   :  { %6087 = vst [vmem:[#allocation7] sm:$0xff] %v6079_v21  ;;  %v2337_v38 = vadd.f32 %v9188_v25, %v2312_v5  ;;  %v9189_v21 = vld [vmem:[#allocation230_spill] sm:$0xff] }
 0x23c   :  { %v6133_v14 = vadd.f32 %v6132_v54, %v6131_v31  ;;  %v6121_v13 = vadd.f32 %v6120_v19, %v6119_v7  ;;  %v5057_v17 = vadd.f32 %v5056_v22, %v5030_v32  ;;  %v9187_v31 = vld [vmem:[#allocation206_spill] sm:$0xff]  ;;  %v857_v22 = vadd.f32 %v9189_v21, %v832_v11  ;;  %v9190_v19 = vld [vmem:[#allocation16_spill] sm:$0xff] }
 0x23d   :  { %v5089_v27 = vpop.f32.mrf.mxu0  ;;  %v647_v44 = vadd.f32 %v9187_v31, %v614_v8  ;;  %v6135_v8 = vlaneseq }
 0x23e   :  { %6184 = vpush %v6121_v13  ;;  %v5090_v61 = vadd.f32 %v5089_v27, %v5057_v17  ;;  %v9191_v13 = vld [vmem:[#allocation214_spill] sm:$0xff]  ;;  %v6045_v1 = vmul.f32 %v2337_v38, %v857_v22  ;;  %v9207_v38 = vld [vmem:[#allocation239_spill] sm:$0xff] }
 0x23f   :  { %6186 = vpush %v6133_v14  ;;  %v2152_v14 = vadd.f32 %v9190_v19, %v2127_v30  ;;  %v672_v45 = vadd.f32 %v9191_v13, %v647_v44  ;;  %v6136_v44 = vshrl.u32 %v6135_v8, 7  ;;  %v6138_v25 = vand.u32 127, %v6135_v8  ;;  %v9209_v19 = vld [vmem:[#allocation252_spill] sm:$0xff]  ;;  %v9210_v13 = vld [vmem:[#allocation22_spill] sm:$0xff] }
 0x240   :  { %v9216_v8 = vld [vmem:[#allocation30_spill] sm:$0xff] }
 0x241   :  { %v6044_v59 = vmul.f32 %v2152_v14, %v672_v45  ;;  %vm6139_vm4 = vcmp.eq.s32.totalorder %v6136_v44, 0  ;;  %vm6140_vm5 = vcmp.eq.s32.totalorder %v6138_v25, 0  ;;  %vm6144_vm6 = vcmp.eq.s32.totalorder %v6138_v25, 1  ;;  %v9224_v25 = vld [vmem:[#allocation32_spill] sm:$0xff] }
 0x242   :  { %v5114_v63 = vpop.f32.mrf.mxu1  ;;  %vm6141_vm7 = vmand %vm6139_vm4, %vm6140_vm5 }
 0x243   :  { %v5115_v7 = vadd.f32 %v5114_v63, %v5090_v61  ;;  %v9203_v61 = vld [vmem:[#allocation250_spill] sm:$0xff]  ;;  %vm6145_vm8 = vmand %vm6139_vm4, %vm6144_vm6 }
 0x244   :  { %v5143_v50 = vpop.f32.mrf.mxu2  ;;  %v5184_v41 = vpop.f32.mrf.mxu3 }
 0x245   :  { %v5185_v47 = vadd.f32 %v5184_v41, %v5143_v50  ;;  %v6052_v12 = vmul.f32 %v5115_v7, %v8165_v28  ;;  %v2407_v28 = vadd.f32 %v9195_v2, %v9194_v39 }
 0x247   :  { %v5214_v18 = vpop.f32.mrf.mxu0  ;;  %v6060_v3 = vsub.f32 %v6044_v59, %v6052_v12  ;;  %v2437_v55 = vadd.f32 %v9201_v20, %v2407_v28 }
 0x248   :  { %v5215_v24 = vadd.f32 %v5214_v18, %v5185_v47 }
 0x24c   :  { %v5241_v57 = vpop.f32.mrf.mxu1 }
 0x24d   :  { %v5242_v51 = vadd.f32 %v5241_v57, %v5215_v24  ;;  %v1142_v24 = vadd.f32 %v9203_v61, %v1112_v42  ;;  %v9204_v57 = vld [vmem:[#allocation26_spill] sm:$0xff]  ;;  %v9218_v61 = vld [vmem:[#allocation28_spill] sm:$0xff] }
 0x24e   :  { %v5274_v60 = vpop.f32.mrf.mxu2  ;;  %v5299_v10 = vpop.f32.mrf.mxu3  ;;  %v2649_v16 = vadd.f32 %v9204_v57, %v2622_v23 }
 0x24f   :  { %v5275_v9 = vadd.f32 %v5274_v60, %v5242_v51  ;;  %v9205_v51 = vld [vmem:[#allocation251_spill] sm:$0xff] }
 0x250   :  { %v1169_v60 = vadd.f32 %v9205_v51, %v1142_v24  ;;  %v9219_v24 = vld [vmem:[#allocation37_spill] sm:$0xff]  ;;  %v9222_v51 = vld [vmem:[#allocation260_spill] sm:$0xff] }
 0x251   :  { %v5328_v54 = vpop.f32.mrf.mxu0  ;;  %v5300_v27 = vadd.f32 %v5299_v10, %v5275_v9  ;;  %v9206_v10 = vld [vmem:[#allocation41_spill] sm:$0xff]  ;;  %v2962_v57 = vadd.f32 %v9219_v24, %v9218_v61 }
 0x252   :  { %v2464_v31 = vadd.f32 %v9206_v10, %v2437_v55  ;;  %v9208_v9 = vld [vmem:[#allocation45_spill] sm:$0xff]  ;;  %v1202_v14 = vadd.f32 %v9209_v19, %v1169_v60 }
 0x253   :  { %v6053_v58 = vmul.f32 %v5300_v27, %v8195_v15  ;;  %v9197_v15 = vld [vmem:[#allocation235_spill] sm:$0xff]  ;;  %v9223_v60 = vld [vmem:[#allocation261_spill] sm:$0xff] }
 0x254   :  { %v927_v18 = vadd.f32 %v9197_v15, %v9196_v53  ;;  %v2497_v45 = vadd.f32 %v9210_v13, %v2464_v31  ;;  %v1482_v10 = vadd.f32 %v9223_v60, %v9222_v51  ;;  %v9228_v13 = vld [vmem:[#allocation40_spill] sm:$0xff] }
 0x255   :  { %v6061_v52 = vsub.f32 %v6045_v1, %v6053_v58  ;;  %v9211_v58 = vld [vmem:[#allocation241_spill] sm:$0xff] }
 0x256   :  { %v5369_v0 = vpop.f32.mrf.mxu1  ;;  %v957_v5 = vadd.f32 %v9202_v6, %v927_v18  ;;  %v9217_v6 = vld [vmem:[#allocation46_spill] sm:$0xff] }
 0x257   :  { %v6075_v29 = vrot.slane %v6061_v52, 4  ;;  %v5370_v41 = vadd.f32 %v5369_v0, %v5328_v54  ;;  %v2682_v54 = vadd.f32 %v9208_v9, %v2649_v16  ;;  %v9212_v52 = vld [vmem:[#allocation29_spill] sm:$0xff] }
 0x258   :  { %v5399_v63 = vpop.f32.mrf.mxu2  ;;  %v5426_v34 = vpop.f32.mrf.mxu3  ;;  %v984_v7 = vadd.f32 %v9207_v38, %v957_v5  ;;  %v2777_v5 = vadd.f32 %v9217_v6, %v9216_v8 }
 0x259   :  { %v6080_v32 = vsel %vm6078_vm3, %v6060_v3, %v6075_v29  ;;  %v5400_v17 = vadd.f32 %v5399_v63, %v5370_v41  ;;  %v2707_v0 = vadd.f32 %v9212_v52, %v2682_v54  ;;  %v9214_v41 = vld [vmem:[#allocation23_spill] sm:$0xff]  ;;  %v9230_v52 = vld [vmem:[#allocation34_spill] sm:$0xff] }
 0x25a   :  { %6088 = vst [vmem:[#allocation7 + $0x8] sm:$0xff] %v6080_v32  ;;  %v1017_v59 = vadd.f32 %v9211_v58, %v984_v7  ;;  %v2522_v40 = vadd.f32 %v9214_v41, %v2497_v45  ;;  %v2807_v38 = vadd.f32 %v9224_v25, %v2777_v5  ;;  %v9225_v7 = vld [vmem:[#allocation31_spill] sm:$0xff] }
 0x25b   :  { %v5459_v50 = vpop.f32.mrf.mxu0  ;;  %v5427_v33 = vadd.f32 %v5426_v34, %v5400_v17  ;;  %v9213_v34 = vld [vmem:[#allocation253_spill] sm:$0xff]  ;;  %v2992_v9 = vadd.f32 %v9225_v7, %v2962_v57  ;;  %v9229_v58 = vld [vmem:[#allocation263_spill] sm:$0xff] }
 0x25c   :  { %v1227_v32 = vadd.f32 %v9213_v34, %v1202_v14  ;;  %v1042_v39 = vadd.f32 %v9215_v36, %v1017_v59  ;;  %v9227_v14 = vld [vmem:[#allocation262_spill] sm:$0xff] }
 0x25d   :  { %v5460_v21 = vadd.f32 %v5459_v50, %v5427_v33  ;;  %v9221_v33 = vld [vmem:[#allocation255_spill] sm:$0xff]  ;;  %v3019_v45 = vadd.f32 %v9228_v13, %v2992_v9 }
 0x25e   :  { %v6047_v2 = vmul.f32 %v2707_v0, %v1227_v32  ;;  %v6046_v42 = vmul.f32 %v2522_v40, %v1042_v39  ;;  %v2834_v0 = vadd.f32 %v9230_v52, %v2807_v38  ;;  %v9232_v32 = vld [vmem:[#allocation35_spill] sm:$0xff] }
 0x25f   :  { %v9234_v39 = vld [vmem:[#allocation47_spill] sm:$0xff] }
 0x260   :  { %v5484_v4 = vpop.f32.mrf.mxu1 }
 0x261   :  { %v5485_v29 = vadd.f32 %v5484_v4, %v5460_v21 }
 0x262   :  { %v5513_v47 = vpop.f32.mrf.mxu2  ;;  %v5554_v46 = vpop.f32.mrf.mxu3 }
 0x263   :  { %v5555_v30 = vadd.f32 %v5554_v46, %v5513_v47  ;;  %v6054_v53 = vmul.f32 %v5485_v29, %v8229_v26 }
 0x265   :  { %v5584_v11 = vpop.f32.mrf.mxu0  ;;  %v6062_v37 = vsub.f32 %v6046_v42, %v6054_v53  ;;  %v9235_v53 = vld [vmem:[#allocation258_spill] sm:$0xff] }
 0x266   :  { %v5585_v22 = vadd.f32 %v5584_v11, %v5555_v30  ;;  %v9220_v11 = vld [vmem:[#allocation254_spill] sm:$0xff] }
 0x267   :  { %v1297_v30 = vadd.f32 %v9221_v33, %v9220_v11 }
 0x26a   :  { %v5611_v27 = vpop.f32.mrf.mxu1 }
 0x26b   :  { %v5612_v1 = vadd.f32 %v5611_v27, %v5585_v22  ;;  %v9226_v22 = vld [vmem:[#allocation256_spill] sm:$0xff]  ;;  %v1512_v27 = vadd.f32 %v9227_v14, %v1482_v10 }
 0x26c   :  { %v5644_v12 = vpop.f32.mrf.mxu2  ;;  %v5669_v3 = vpop.f32.mrf.mxu3  ;;  %v1327_v19 = vadd.f32 %v9226_v22, %v1297_v30 }
 0x26d   :  { %v5645_v63 = vadd.f32 %v5644_v12, %v5612_v1  ;;  %v1539_v59 = vadd.f32 %v9229_v58, %v1512_v27 }
 0x26f   :  { %v5698_v50 = vpop.f32.mrf.mxu0  ;;  %v5670_v49 = vadd.f32 %v5669_v3, %v5645_v63  ;;  %s6185_s0 = spop %6184  ;;  %v9231_v63 = vld [vmem:[#allocation257_spill] sm:$0xff] }
 0x270   :  { %v6142_v28 = vstv %s6185_s0  ;;  %s6187_s26 = spop %6186  ;;  %v1354_v34 = vadd.f32 %v9231_v63, %v1327_v19 }
 0x271   :  { %v6055_v15 = vmul.f32 %v5670_v49, %v8259_v62  ;;  %v6143_v18 = vsel %vm6141_vm7, %v6142_v28, 0.0  ;;  %v6146_v48 = vstv %s6187_s26  ;;  %v9233_v49 = vld [vmem:[#allocation264_spill] sm:$0xff] }
 0x272   :  { %v6147_v43 = vsel %vm6145_vm8, %v6146_v48, 0.0  ;;  %v1572_v36 = vadd.f32 %v9233_v49, %v1539_v59 }
 0x273   :  { %v6063_v4 = vsub.f32 %v6047_v2, %v6055_v15  ;;  %v6148_v17 = vadd.f32 %v6147_v43, %v6143_v18  ;;  %v2867_v2 = vadd.f32 %v9234_v39, %v2834_v0  ;;  %v1387_v15 = vadd.f32 %v9235_v53, %v1354_v34  ;;  %v9236_v18 = vld [vmem:[#allocation42_spill] sm:$0xff] }
 0x274   :  { %v5739_v47 = vpop.f32.mrf.mxu1 }
 0x275   :  { %v6076_v23 = vrot.slane %v6063_v4, 4  ;;  %6149 = vst [vmem:[#allocation8] sm:$0xff] %v6148_v17  ;;  %v5740_v62 = vadd.f32 %v5739_v47, %v5698_v50  ;;  %v3052_v50 = vadd.f32 %v9232_v32, %v3019_v45  ;;  %v9237_v17 = vld [vmem:[#allocation265_spill] sm:$0xff] }
 0x276   :  { %v5769_v46 = vpop.f32.mrf.mxu2  ;;  %v5796_v20 = vpop.f32.mrf.mxu3  ;;  %6171 = dma.vmem_to_hbm [thread:$0]  %s6167_s25, 128, %s6169_s29, [#allocation9]   ;;  %v1597_v47 = vadd.f32 %v9237_v17, %v1572_v36 }
 0x277   :  { %v6081_v55 = vsel %vm6078_vm3, %v6062_v37, %v6076_v23  ;;  %v5770_v31 = vadd.f32 %v5769_v46, %v5740_v62  ;;  %v3077_v48 = vadd.f32 %v9236_v18, %v3052_v50  ;;  %v9238_v37 = vld [vmem:[#allocation33_spill] sm:$0xff] }
 0x278   :  { %6089 = vst [vmem:[#allocation7 + $0x10] sm:$0xff] %v6081_v55  ;;  %v2892_v23 = vadd.f32 %v9238_v37, %v2867_v2 }
 0x279   :  { %v5829_v26 = vpop.f32.mrf.mxu0  ;;  %v5797_v1 = vadd.f32 %v5796_v20, %v5770_v31  ;;  %v9239_v20 = vld [vmem:[#allocation259_spill] sm:$0xff] }
 0x27a   :  { %v1412_v55 = vadd.f32 %v9239_v20, %v1387_v15 }
 0x27b   :  { %v5830_v41 = vadd.f32 %v5829_v26, %v5797_v1  ;;  %v6049_v26 = vmul.f32 %v3077_v48, %v1597_v47 }
 0x27c   :  { %v6048_v6 = vmul.f32 %v2892_v23, %v1412_v55 }
 0x27e   :  { %v5854_v16 = vpop.f32.mrf.mxu1 }
 0x27f   :  { %v5855_v43 = vadd.f32 %v5854_v16, %v5830_v41 }
 0x280   :  { %v5883_v44 = vpop.f32.mrf.mxu2  ;;  %v5924_v54 = vpop.f32.mrf.mxu3 }
 0x281   :  { %v5925_v21 = vadd.f32 %v5924_v54, %v5883_v44  ;;  %v6056_v62 = vmul.f32 %v5855_v43, %v8293_v56 }
 0x283   :  { %v5954_v12 = vpop.f32.mrf.mxu0  ;;  %v6064_v61 = vsub.f32 %v6048_v6, %v6056_v62 }
 0x284   :  { %v5955_v3 = vadd.f32 %v5954_v12, %v5925_v21 }
 0x286   :  { %v5981_v29 = vpop.f32.mrf.mxu1 }
 0x287   :  { %v5982_v40 = vadd.f32 %v5981_v29, %v5955_v3 }
 0x288   :  { %v6014_v28 = vpop.f32.mrf.mxu2 }
 0x289   :  { %v6015_v42 = vadd.f32 %v6014_v28, %v5982_v40 }
 0x28b   :  { %v6039_v4 = vpop.f32.mrf.mxu3 }
 0x28c   :  { %v6040_v46 = vadd.f32 %v6039_v4, %v6015_v42 }
 0x28e   :  { %v6057_v8 = vmul.f32 %v6040_v46, %v8298_v35 }
 0x290   :  { %v6065_v5 = vsub.f32 %v6049_v26, %v6057_v8 }
 0x292   :  { %v6077_v24 = vrot.slane %v6065_v5, 4 }
 0x294   :  { %v6082_v57 = vsel %vm6078_vm3, %v6064_v61, %v6077_v24 }
 0x295   :  { %6090 = vst [vmem:[#allocation7 + $0x18] sm:$0xff] %v6082_v57 }
 0x296   :  { %6160 = dma.vmem_to_hbm [thread:$0]  %s6156_s30, 512, %s6158_s6, [#allocation4]  }
 0x297   :  { %6296 = dma.done.wait [#allocation4], 512  }
 0x298   :  { %6297 = vsyncadd [#allocation4], 4294966784 }
 0x299   :  { %6298 = dma.done.wait [#allocation9], 128  }
 0x29a   :  { %6299 = vsyncadd [#allocation9], 4294967168 }
 0x29b   :  { %6180 = vsyncpa [#allocation3], 1 }
 0x29c   :  { %6181 = vsyncpa [#allocation6], 1 }
 0x29d   :  { %6182 = vsyncpa [#allocation4], 1 }
 0x29e   :  { %6183 = vsyncpa [#allocation9], 1 }

</bundles_post_ra>
